<compile_context>
chip_gen: v6e
topology: v6e:2x2x1
jax: 0.10.0
libtpu: 0.0.40
codegen_flags: <defaults>
</compile_context>

<pallas_src>
from functools import partial

import jax
import jax.numpy as jnp
from jax.experimental import pallas as pl
from jax.experimental.pallas import tpu as pltpu

BN_EPS = 1e-3


# -------------------------- fused Pallas kernel ------------------------------

def _make_block8_kernel(scale, use_relu):
    scale = float(scale)
    use_relu = bool(use_relu)

    def kernel(xf_ref, xres_ref, w0_ref, b0_ref, w10_ref, b10_ref, sh_ref,
               w13_ref, b13_ref, w31_ref, b31_ref, wc0_ref, wc1_ref, cb_ref,
               o_ref, x0_s, x1_s):
        # Branches are computed once (first grid step) and kept resident in VMEM
        # scratch; subsequent grid steps only stream the final conv's weights.
        @pl.when(pl.program_id(0) == 0)
        def _():
            xb = xf_ref[...]                                         # (M, 1792) bf16

            # branch0: 1x1 conv (BN scale folded into weights) + bias + ReLU
            y0 = jnp.dot(xb, w0_ref[...], preferred_element_type=jnp.float32)
            x0_s[...] = jnp.maximum(y0 + b0_ref[...], 0.0).astype(jnp.bfloat16)

            # branch1[0]: 1x1 conv + bias + ReLU
            y1 = jnp.dot(xb, w10_ref[...], preferred_element_type=jnp.float32)
            x1 = jnp.maximum(y1 + b10_ref[...], 0.0).astype(jnp.bfloat16)

            # branch1[1]: (1,3) conv, padding (0,1) -> 3 shifted-row matmuls
            y = jnp.dot(x1, w13_ref[1], preferred_element_type=jnp.float32)
            xl = jnp.dot(sh_ref[0], x1,
                         preferred_element_type=jnp.float32).astype(jnp.bfloat16)
            y = y + jnp.dot(xl, w13_ref[0], preferred_element_type=jnp.float32)
            xr = jnp.dot(sh_ref[1], x1,
                         preferred_element_type=jnp.float32).astype(jnp.bfloat16)
            y = y + jnp.dot(xr, w13_ref[2], preferred_element_type=jnp.float32)
            x1 = jnp.maximum(y + b13_ref[...], 0.0).astype(jnp.bfloat16)

            # branch1[2]: (3,1) conv, padding (1,0) -> 3 shifted-row matmuls
            y = jnp.dot(x1, w31_ref[1], preferred_element_type=jnp.float32)
            xu = jnp.dot(sh_ref[2], x1,
                         preferred_element_type=jnp.float32).astype(jnp.bfloat16)
            y = y + jnp.dot(xu, w31_ref[0], preferred_element_type=jnp.float32)
            xd = jnp.dot(sh_ref[3], x1,
                         preferred_element_type=jnp.float32).astype(jnp.bfloat16)
            y = y + jnp.dot(xd, w31_ref[2], preferred_element_type=jnp.float32)
            x1_s[...] = jnp.maximum(y + b31_ref[...], 0.0).astype(jnp.bfloat16)

        # Final 1x1 conv (this grid step's slice of the 1792 output channels),
        # split per branch (no concat), then scale + residual + optional ReLU.
        y = jnp.dot(x0_s[...], wc0_ref[...], preferred_element_type=jnp.float32)
        y = y + jnp.dot(x1_s[...], wc1_ref[...], preferred_element_type=jnp.float32)
        y = (y + cb_ref[...]) * scale + xres_ref[...]
        if use_relu:
            y = jnp.maximum(y, 0.0)
        o_ref[...] = y

    return kernel


# -------------------------- parameter prep (trace-time) ----------------------

def _fold_bn(gamma, beta, mean, var, eps=BN_EPS):
    s = gamma / jnp.sqrt(var + eps)
    return s, beta - mean * s


def _w_1x1_scaled(w, s):
    # (Co, Ci, 1, 1) -> (Ci, Co), per-output-channel BN scale folded in.
    return jnp.transpose(w[:, :, 0, 0], (1, 0)) * s[None, :]


def _w_taps_scaled(w, s, along_w):
    # (Co, Ci, 1, 3) or (Co, Ci, 3, 1) -> (3, Ci, Co), BN scale folded in.
    t = w[:, :, 0, :] if along_w else w[:, :, :, 0]      # (Co, Ci, 3)
    t = jnp.transpose(t, (2, 1, 0))                      # (3, Ci, Co)
    return t * s[None, None, :]


def _shift_mats(N, H, W):
    # 0/1 matrices S so that (S @ X)[m] = X[m + delta] (flattened NHWC row index)
    # when the shifted spatial position stays inside the image, else 0.
    M = N * H * W
    m = jnp.arange(M)
    w = m % W
    h = (m // W) % H
    cols = jnp.arange(M)[None, :]
    rows = m[:, None]

    def mk(delta, valid):
        return ((cols == rows + delta) & valid[:, None]).astype(jnp.float32)

    return jnp.stack([
        mk(-1, w >= 1),        # left  neighbor (w-1)
        mk(+1, w <= W - 2),    # right neighbor (w+1)
        mk(-W, h >= 1),        # up    neighbor (h-1)
        mk(+W, h <= H - 2),    # down  neighbor (h+1)
    ], axis=0)


# -------------------------- forward wrapper ----------------------------------

@partial(jax.jit, static_argnames=("scale", "noReLU"))
def block8_forward(x_nchw, params, scale=1.0, noReLU=False):
    N, C, H, W = x_nchw.shape
    M = N * H * W
    x_nhwc = jnp.transpose(x_nchw, (0, 2, 3, 1))
    xf = x_nhwc.reshape(M, C)                    # f32 residual
    xf_bf = xf.astype(jnp.bfloat16)              # bf16 matmul operand

    s0, b0 = _fold_bn(*params['b0_bn'])
    s10, b10 = _fold_bn(*params['b1_0_bn'])
    s11, b11 = _fold_bn(*params['b1_1_bn'])
    s12, b12 = _fold_bn(*params['b1_2_bn'])

    w0 = _w_1x1_scaled(params['b0_w'], s0).astype(jnp.bfloat16)      # (1792,192)
    w10 = _w_1x1_scaled(params['b1_0_w'], s10).astype(jnp.bfloat16)  # (1792,192)
    w13 = _w_taps_scaled(params['b1_1_w'], s11, True).astype(jnp.bfloat16)   # (3,192,192)
    w31 = _w_taps_scaled(params['b1_2_w'], s12, False).astype(jnp.bfloat16)  # (3,192,192)

    cw = jnp.transpose(params['c_w'][:, :, 0, 0], (1, 0))            # (384, 1792)
    wc0 = cw[:192].astype(jnp.bfloat16)                              # x0 rows
    wc1 = cw[192:].astype(jnp.bfloat16)                              # x1 rows
    cb = params['c_b'].reshape(1, C)

    sh = _shift_mats(N, H, W).astype(jnp.bfloat16)                   # (4, M, M)

    # Tile the final conv's 1792 output channels so its weight stream overlaps
    # the branch compute (896 = 7 * 128 lanes -> unmasked, lane-dense stores).
    tc = C // 2
    if tc % 128 != 0 or C % tc != 0:
        tc = C
    grid = (C // tc,)

    res2 = lambda j: (0, 0)
    res3 = lambda j: (0, 0, 0)
    tile_cout = lambda j: (0, j)

    out = pl.pallas_call(
        _make_block8_kernel(scale, not noReLU),
        out_shape=jax.ShapeDtypeStruct((M, C), jnp.float32),
        grid=grid,
        in_specs=[
            pl.BlockSpec((M, C), res2),            # xf (bf16), resident
            pl.BlockSpec((M, tc), tile_cout),      # residual slice (f32)
            pl.BlockSpec((C, 192), res2),          # branch0 1x1 weight
            pl.BlockSpec((1, 192), res2),          # branch0 folded BN bias
            pl.BlockSpec((C, 192), res2),          # branch1[0] 1x1 weight
            pl.BlockSpec((1, 192), res2),          # branch1[0] bias
            pl.BlockSpec((4, M, M), res3),         # spatial shift matrices
            pl.BlockSpec((3, 192, 192), res3),     # branch1[1] (1,3) tap weights
            pl.BlockSpec((1, 192), res2),          # branch1[1] bias
            pl.BlockSpec((3, 192, 192), res3),     # branch1[2] (3,1) tap weights
            pl.BlockSpec((1, 192), res2),          # branch1[2] bias
            pl.BlockSpec((192, tc), tile_cout),    # final conv weight (x0 half)
            pl.BlockSpec((192, tc), tile_cout),    # final conv weight (x1 half)
            pl.BlockSpec((1, tc), tile_cout),      # final conv bias
        ],
        out_specs=pl.BlockSpec((M, tc), tile_cout),
        scratch_shapes=[pltpu.VMEM((M, 192), jnp.bfloat16),   # x0 (branch0 out)
                        pltpu.VMEM((M, 192), jnp.bfloat16)],  # x1 (branch1 out)
        compiler_params=pltpu.CompilerParams(
            dimension_semantics=("arbitrary",)),
    )(xf_bf, xf, w0, b0.reshape(1, 192), w10, b10.reshape(1, 192),
      sh, w13, b11.reshape(1, 192) * 0 + b11.reshape(1, 192),  # b13
      w31, b12.reshape(1, 192),
      wc0, wc1, cb)

    return jnp.transpose(out.reshape(N, H, W, C), (0, 3, 1, 2))


# -------------------------- reference (lax.conv) -----------------------------

def _ref_basic_conv(x, w, bnp, padding):
    y = jax.lax.conv_general_dilated(
        x, w, (1, 1), padding,
        dimension_numbers=('NCHW', 'OIHW', 'NCHW'),
        precision=jax.lax.Precision.HIGHEST)
    g, b, m, v = bnp
    s = g / jnp.sqrt(v + BN_EPS)
    y = y * s[None, :, None, None] + (b - m * s)[None, :, None, None]
    return jnp.maximum(y, 0.0)


def block8_reference(x, params, scale=1.0, noReLU=False):
    x0 = _ref_basic_conv(x, params['b0_w'], params['b0_bn'], 'VALID')
    x1 = _ref_basic_conv(x, params['b1_0_w'], params['b1_0_bn'], 'VALID')
    x1 = _ref_basic_conv(x1, params['b1_1_w'], params['b1_1_bn'], ((0, 0), (1, 1)))
    x1 = _ref_basic_conv(x1, params['b1_2_w'], params['b1_2_bn'], ((1, 1), (0, 0)))
    cat = jnp.concatenate([x0, x1], axis=1)
    out = jax.lax.conv_general_dilated(
        cat, params['c_w'], (1, 1), 'VALID',
        dimension_numbers=('NCHW', 'OIHW', 'NCHW'),
        precision=jax.lax.Precision.HIGHEST)
    out = out + params['c_b'][None, :, None, None]
    out = out * scale + x
    if not noReLU:
        out = jnp.maximum(out, 0.0)
    return out


# -------------------------- deterministic params -----------------------------

def init_params(key):
    ks = jax.random.split(key, 10)

    def conv_w(k, shape):
        return 0.02 * jax.random.normal(k, shape, jnp.float32)

    def bn(k, c):
        k1, k2, k3, k4 = jax.random.split(k, 4)
        gamma = 1.0 + 0.1 * jax.random.normal(k1, (c,), jnp.float32)
        beta = 0.1 * jax.random.normal(k2, (c,), jnp.float32)
        mean = 0.1 * jax.random.normal(k3, (c,), jnp.float32)
        var = 0.5 + 0.5 * jnp.abs(jax.random.normal(k4, (c,), jnp.float32))
        return (gamma, beta, mean, var)

    return {
        'b0_w': conv_w(ks[0], (192, 1792, 1, 1)), 'b0_bn': bn(ks[1], 192),
        'b1_0_w': conv_w(ks[2], (192, 1792, 1, 1)), 'b1_0_bn': bn(ks[3], 192),
        'b1_1_w': conv_w(ks[4], (192, 192, 1, 3)), 'b1_1_bn': bn(ks[5], 192),
        'b1_2_w': conv_w(ks[6], (192, 192, 3, 1)), 'b1_2_bn': bn(ks[7], 192),
        'c_w': conv_w(ks[8], (1792, 384, 1, 1)),
        'c_b': 0.02 * jax.random.normal(ks[9], (1792,), jnp.float32),
    }


# -------------------------- main --------------------------------------------

if __name__ == "__main__":
    # Block8 channel counts are fixed by the module (1792 in/out); small
    # batch / spatial dims (the real net runs Block8 on 3x3 feature maps).
    N, C, H, W = 2, 1792, 3, 3
    SCALE, NO_RELU = 0.2, False

    x = jax.random.normal(jax.random.PRNGKey(0), (N, C, H, W), jnp.float32)
    params = init_params(jax.random.PRNGKey(42))

    out = block8_forward(x, params, scale=SCALE, noReLU=NO_RELU)
    out = jax.block_until_ready(out)

    ref = jax.block_until_ready(block8_reference(x, params, scale=SCALE, noReLU=NO_RELU))
    assert out.shape == (N, C, H, W) and out.dtype == jnp.float32
    if not jnp.allclose(out, ref, atol=1e-2, rtol=1e-2):
        raise AssertionError("Pallas Block8 output mismatch vs lax.conv reference")

    print("KERNEL_OK")
</pallas_src>

<mosaic_0001>
module attributes {stable_mosaic.version = 11 : i64} {
  func.func @kernel(%arg0: i32, %arg1: memref<18x1792xbf16, #tpu.memory_space<vmem>>, %arg2: memref<18x896xf32, #tpu.memory_space<vmem>>, %arg3: memref<1792x192xbf16, #tpu.memory_space<vmem>>, %arg4: memref<1x192xf32, #tpu.memory_space<vmem>>, %arg5: memref<1792x192xbf16, #tpu.memory_space<vmem>>, %arg6: memref<1x192xf32, #tpu.memory_space<vmem>>, %arg7: memref<4x18x18xbf16, #tpu.memory_space<vmem>>, %arg8: memref<3x192x192xbf16, #tpu.memory_space<vmem>>, %arg9: memref<1x192xf32, #tpu.memory_space<vmem>>, %arg10: memref<3x192x192xbf16, #tpu.memory_space<vmem>>, %arg11: memref<1x192xf32, #tpu.memory_space<vmem>>, %arg12: memref<192x896xbf16, #tpu.memory_space<vmem>>, %arg13: memref<192x896xbf16, #tpu.memory_space<vmem>>, %arg14: memref<1x896xf32, #tpu.memory_space<vmem>>, %arg15: memref<18x896xf32, #tpu.memory_space<vmem>>, %arg16: memref<18x192xbf16, #tpu.memory_space<vmem>>, %arg17: memref<18x192xbf16, #tpu.memory_space<vmem>>) attributes {dimension_semantics = [#tpu.dimension_semantics<arbitrary>], iteration_bounds = array<i64: 2>, scalar_prefetch = 0 : i64, scratch_operands = 2 : i64, tpu.core_type = #tpu.core_type<tc>, window_params = [{pipeline_mode = #tpu.pipeline_mode<synchronous>, transform_indices = @transform_0, window_bounds = array<i64: 18, 1792>}, {transform_indices = @transform_1, window_bounds = array<i64: 18, 896>}, {pipeline_mode = #tpu.pipeline_mode<synchronous>, transform_indices = @transform_2, window_bounds = array<i64: 1792, 192>}, {pipeline_mode = #tpu.pipeline_mode<synchronous>, transform_indices = @transform_3, window_bounds = array<i64: 1, 192>}, {pipeline_mode = #tpu.pipeline_mode<synchronous>, transform_indices = @transform_4, window_bounds = array<i64: 1792, 192>}, {pipeline_mode = #tpu.pipeline_mode<synchronous>, transform_indices = @transform_5, window_bounds = array<i64: 1, 192>}, {pipeline_mode = #tpu.pipeline_mode<synchronous>, transform_indices = @transform_6, window_bounds = array<i64: 4, 18, 18>}, {pipeline_mode = #tpu.pipeline_mode<synchronous>, transform_indices = @transform_7, window_bounds = array<i64: 3, 192, 192>}, {pipeline_mode = #tpu.pipeline_mode<synchronous>, transform_indices = @transform_8, window_bounds = array<i64: 1, 192>}, {pipeline_mode = #tpu.pipeline_mode<synchronous>, transform_indices = @transform_9, window_bounds = array<i64: 3, 192, 192>}, {pipeline_mode = #tpu.pipeline_mode<synchronous>, transform_indices = @transform_10, window_bounds = array<i64: 1, 192>}, {transform_indices = @transform_11, window_bounds = array<i64: 192, 896>}, {transform_indices = @transform_12, window_bounds = array<i64: 192, 896>}, {transform_indices = @transform_13, window_bounds = array<i64: 1, 896>}, {transform_indices = @transform_14, window_bounds = array<i64: 18, 896>}]} {
    %c0_i32 = arith.constant 0 : i32
    %0 = arith.cmpi eq, %arg0, %c0_i32 : i32
    %1 = arith.extui %0 : i1 to i32
    %c0_i32_0 = arith.constant 0 : i32
    %2 = arith.cmpi ne, %1, %c0_i32_0 : i32
    scf.if %2 {
      %c0_17 = arith.constant 0 : index
      %c0_18 = arith.constant 0 : index
      %20 = vector.load %arg1[%c0_17, %c0_18] : memref<18x1792xbf16, #tpu.memory_space<vmem>>, vector<18x1792xbf16>
      %c0_19 = arith.constant 0 : index
      %c0_20 = arith.constant 0 : index
      %21 = vector.load %arg3[%c0_19, %c0_20] : memref<1792x192xbf16, #tpu.memory_space<vmem>>, vector<1792x192xbf16>
      %cst_21 = arith.constant dense<0.000000e+00> : vector<18x192xf32>
      %22 = tpu.matmul %20, %21, %cst_21 {dimension_numbers = #tpu.dot_dimension_numbers<[1], [0], [0], [1], [0, 0, 1, 1], [], []>} : vector<18x1792xbf16>, vector<1792x192xbf16>, vector<18x192xf32> -> vector<18x192xf32>
      %c0_22 = arith.constant 0 : index
      %c0_23 = arith.constant 0 : index
      %23 = vector.load %arg4[%c0_22, %c0_23] : memref<1x192xf32, #tpu.memory_space<vmem>>, vector<1x192xf32>
      %24 = vector.broadcast %23 : vector<1x192xf32> to vector<18x192xf32>
      %25 = arith.addf %22, %24 : vector<18x192xf32>
      %cst_24 = arith.constant 0.000000e+00 : f32
      %26 = vector.broadcast %cst_24 : f32 to vector<18x192xf32>
      %27 = arith.maximumf %25, %26 : vector<18x192xf32>
      %28 = arith.truncf %27 : vector<18x192xf32> to vector<18x192xbf16>
      %c0_25 = arith.constant 0 : index
      %c0_26 = arith.constant 0 : index
      %29 = vector.load %arg16[%c0_25, %c0_26] : memref<18x192xbf16, #tpu.memory_space<vmem>>, vector<18x192xbf16>
      tpu.vector_store %arg16[%c0_25, %c0_26], %28 {strides = array<i32>} : memref<18x192xbf16, #tpu.memory_space<vmem>>, vector<18x192xbf16>,
      %c0_27 = arith.constant 0 : index
      %c0_28 = arith.constant 0 : index
      %30 = vector.load %arg5[%c0_27, %c0_28] : memref<1792x192xbf16, #tpu.memory_space<vmem>>, vector<1792x192xbf16>
      %cst_29 = arith.constant dense<0.000000e+00> : vector<18x192xf32>
      %31 = tpu.matmul %20, %30, %cst_29 {dimension_numbers = #tpu.dot_dimension_numbers<[1], [0], [0], [1], [0, 0, 1, 1], [], []>} : vector<18x1792xbf16>, vector<1792x192xbf16>, vector<18x192xf32> -> vector<18x192xf32>
      %c0_30 = arith.constant 0 : index
      %c0_31 = arith.constant 0 : index
      %32 = vector.load %arg6[%c0_30, %c0_31] : memref<1x192xf32, #tpu.memory_space<vmem>>, vector<1x192xf32>
      %33 = vector.broadcast %32 : vector<1x192xf32> to vector<18x192xf32>
      %34 = arith.addf %31, %33 : vector<18x192xf32>
      %cst_32 = arith.constant 0.000000e+00 : f32
      %35 = vector.broadcast %cst_32 : f32 to vector<18x192xf32>
      %36 = arith.maximumf %34, %35 : vector<18x192xf32>
      %37 = arith.truncf %36 : vector<18x192xf32> to vector<18x192xbf16>
      %c1 = arith.constant 1 : index
      %c0_33 = arith.constant 0 : index
      %c0_34 = arith.constant 0 : index
      %38 = vector.load %arg8[%c1, %c0_33, %c0_34] : memref<3x192x192xbf16, #tpu.memory_space<vmem>>, vector<1x192x192xbf16>
      %39 = vector.shape_cast %38 : vector<1x192x192xbf16> to vector<192x192xbf16>
      %cst_35 = arith.constant dense<0.000000e+00> : vector<18x192xf32>
      %40 = tpu.matmul %37, %39, %cst_35 {dimension_numbers = #tpu.dot_dimension_numbers<[1], [0], [0], [1], [0, 0, 1, 1], [], []>} : vector<18x192xbf16>, vector<192x192xbf16>, vector<18x192xf32> -> vector<18x192xf32>
      %c0_36 = arith.constant 0 : index
      %c0_37 = arith.constant 0 : index
      %c0_38 = arith.constant 0 : index
      %41 = vector.load %arg7[%c0_36, %c0_37, %c0_38] : memref<4x18x18xbf16, #tpu.memory_space<vmem>>, vector<1x18x18xbf16>
      %42 = vector.shape_cast %41 : vector<1x18x18xbf16> to vector<18x18xbf16>
      %cst_39 = arith.constant dense<0.000000e+00> : vector<18x192xf32>
      %43 = tpu.matmul %42, %37, %cst_39 {dimension_numbers = #tpu.dot_dimension_numbers<[1], [0], [0], [1], [0, 0, 1, 1], [], []>} : vector<18x18xbf16>, vector<18x192xbf16>, vector<18x192xf32> -> vector<18x192xf32>
      %44 = arith.truncf %43 : vector<18x192xf32> to vector<18x192xbf16>
      %c0_40 = arith.constant 0 : index
      %c0_41 = arith.constant 0 : index
      %c0_42 = arith.constant 0 : index
      %45 = vector.load %arg8[%c0_40, %c0_41, %c0_42] : memref<3x192x192xbf16, #tpu.memory_space<vmem>>, vector<1x192x192xbf16>
      %46 = vector.shape_cast %45 : vector<1x192x192xbf16> to vector<192x192xbf16>
      %cst_43 = arith.constant dense<0.000000e+00> : vector<18x192xf32>
      %47 = tpu.matmul %44, %46, %cst_43 {dimension_numbers = #tpu.dot_dimension_numbers<[1], [0], [0], [1], [0, 0, 1, 1], [], []>} : vector<18x192xbf16>, vector<192x192xbf16>, vector<18x192xf32> -> vector<18x192xf32>
      %48 = arith.addf %40, %47 : vector<18x192xf32>
      %c1_44 = arith.constant 1 : index
      %c0_45 = arith.constant 0 : index
      %c0_46 = arith.constant 0 : index
      %49 = vector.load %arg7[%c1_44, %c0_45, %c0_46] : memref<4x18x18xbf16, #tpu.memory_space<vmem>>, vector<1x18x18xbf16>
      %50 = vector.shape_cast %49 : vector<1x18x18xbf16> to vector<18x18xbf16>
      %cst_47 = arith.constant dense<0.000000e+00> : vector<18x192xf32>
      %51 = tpu.matmul %50, %37, %cst_47 {dimension_numbers = #tpu.dot_dimension_numbers<[1], [0], [0], [1], [0, 0, 1, 1], [], []>} : vector<18x18xbf16>, vector<18x192xbf16>, vector<18x192xf32> -> vector<18x192xf32>
      %52 = arith.truncf %51 : vector<18x192xf32> to vector<18x192xbf16>
      %c2 = arith.constant 2 : index
      %c0_48 = arith.constant 0 : index
      %c0_49 = arith.constant 0 : index
      %53 = vector.load %arg8[%c2, %c0_48, %c0_49] : memref<3x192x192xbf16, #tpu.memory_space<vmem>>, vector<1x192x192xbf16>
      %54 = vector.shape_cast %53 : vector<1x192x192xbf16> to vector<192x192xbf16>
      %cst_50 = arith.constant dense<0.000000e+00> : vector<18x192xf32>
      %55 = tpu.matmul %52, %54, %cst_50 {dimension_numbers = #tpu.dot_dimension_numbers<[1], [0], [0], [1], [0, 0, 1, 1], [], []>} : vector<18x192xbf16>, vector<192x192xbf16>, vector<18x192xf32> -> vector<18x192xf32>
      %56 = arith.addf %48, %55 : vector<18x192xf32>
      %c0_51 = arith.constant 0 : index
      %c0_52 = arith.constant 0 : index
      %57 = vector.load %arg9[%c0_51, %c0_52] : memref<1x192xf32, #tpu.memory_space<vmem>>, vector<1x192xf32>
      %58 = vector.broadcast %57 : vector<1x192xf32> to vector<18x192xf32>
      %59 = arith.addf %56, %58 : vector<18x192xf32>
      %cst_53 = arith.constant 0.000000e+00 : f32
      %60 = vector.broadcast %cst_53 : f32 to vector<18x192xf32>
      %61 = arith.maximumf %59, %60 : vector<18x192xf32>
      %62 = arith.truncf %61 : vector<18x192xf32> to vector<18x192xbf16>
      %c1_54 = arith.constant 1 : index
      %c0_55 = arith.constant 0 : index
      %c0_56 = arith.constant 0 : index
      %63 = vector.load %arg10[%c1_54, %c0_55, %c0_56] : memref<3x192x192xbf16, #tpu.memory_space<vmem>>, vector<1x192x192xbf16>
      %64 = vector.shape_cast %63 : vector<1x192x192xbf16> to vector<192x192xbf16>
      %cst_57 = arith.constant dense<0.000000e+00> : vector<18x192xf32>
      %65 = tpu.matmul %62, %64, %cst_57 {dimension_numbers = #tpu.dot_dimension_numbers<[1], [0], [0], [1], [0, 0, 1, 1], [], []>} : vector<18x192xbf16>, vector<192x192xbf16>, vector<18x192xf32> -> vector<18x192xf32>
      %c2_58 = arith.constant 2 : index
      %c0_59 = arith.constant 0 : index
      %c0_60 = arith.constant 0 : index
      %66 = vector.load %arg7[%c2_58, %c0_59, %c0_60] : memref<4x18x18xbf16, #tpu.memory_space<vmem>>, vector<1x18x18xbf16>
      %67 = vector.shape_cast %66 : vector<1x18x18xbf16> to vector<18x18xbf16>
      %cst_61 = arith.constant dense<0.000000e+00> : vector<18x192xf32>
      %68 = tpu.matmul %67, %62, %cst_61 {dimension_numbers = #tpu.dot_dimension_numbers<[1], [0], [0], [1], [0, 0, 1, 1], [], []>} : vector<18x18xbf16>, vector<18x192xbf16>, vector<18x192xf32> -> vector<18x192xf32>
      %69 = arith.truncf %68 : vector<18x192xf32> to vector<18x192xbf16>
      %c0_62 = arith.constant 0 : index
      %c0_63 = arith.constant 0 : index
      %c0_64 = arith.constant 0 : index
      %70 = vector.load %arg10[%c0_62, %c0_63, %c0_64] : memref<3x192x192xbf16, #tpu.memory_space<vmem>>, vector<1x192x192xbf16>
      %71 = vector.shape_cast %70 : vector<1x192x192xbf16> to vector<192x192xbf16>
      %cst_65 = arith.constant dense<0.000000e+00> : vector<18x192xf32>
      %72 = tpu.matmul %69, %71, %cst_65 {dimension_numbers = #tpu.dot_dimension_numbers<[1], [0], [0], [1], [0, 0, 1, 1], [], []>} : vector<18x192xbf16>, vector<192x192xbf16>, vector<18x192xf32> -> vector<18x192xf32>
      %73 = arith.addf %65, %72 : vector<18x192xf32>
      %c3 = arith.constant 3 : index
      %c0_66 = arith.constant 0 : index
      %c0_67 = arith.constant 0 : index
      %74 = vector.load %arg7[%c3, %c0_66, %c0_67] : memref<4x18x18xbf16, #tpu.memory_space<vmem>>, vector<1x18x18xbf16>
      %75 = vector.shape_cast %74 : vector<1x18x18xbf16> to vector<18x18xbf16>
      %cst_68 = arith.constant dense<0.000000e+00> : vector<18x192xf32>
      %76 = tpu.matmul %75, %62, %cst_68 {dimension_numbers = #tpu.dot_dimension_numbers<[1], [0], [0], [1], [0, 0, 1, 1], [], []>} : vector<18x18xbf16>, vector<18x192xbf16>, vector<18x192xf32> -> vector<18x192xf32>
      %77 = arith.truncf %76 : vector<18x192xf32> to vector<18x192xbf16>
      %c2_69 = arith.constant 2 : index
      %c0_70 = arith.constant 0 : index
      %c0_71 = arith.constant 0 : index
      %78 = vector.load %arg10[%c2_69, %c0_70, %c0_71] : memref<3x192x192xbf16, #tpu.memory_space<vmem>>, vector<1x192x192xbf16>
      %79 = vector.shape_cast %78 : vector<1x192x192xbf16> to vector<192x192xbf16>
      %cst_72 = arith.constant dense<0.000000e+00> : vector<18x192xf32>
      %80 = tpu.matmul %77, %79, %cst_72 {dimension_numbers = #tpu.dot_dimension_numbers<[1], [0], [0], [1], [0, 0, 1, 1], [], []>} : vector<18x192xbf16>, vector<192x192xbf16>, vector<18x192xf32> -> vector<18x192xf32>
      %81 = arith.addf %73, %80 : vector<18x192xf32>
      %c0_73 = arith.constant 0 : index
      %c0_74 = arith.constant 0 : index
      %82 = vector.load %arg11[%c0_73, %c0_74] : memref<1x192xf32, #tpu.memory_space<vmem>>, vector<1x192xf32>
      %83 = vector.broadcast %82 : vector<1x192xf32> to vector<18x192xf32>
      %84 = arith.addf %81, %83 : vector<18x192xf32>
      %cst_75 = arith.constant 0.000000e+00 : f32
      %85 = vector.broadcast %cst_75 : f32 to vector<18x192xf32>
      %86 = arith.maximumf %84, %85 : vector<18x192xf32>
      %87 = arith.truncf %86 : vector<18x192xf32> to vector<18x192xbf16>
      %c0_76 = arith.constant 0 : index
      %c0_77 = arith.constant 0 : index
      %88 = vector.load %arg17[%c0_76, %c0_77] : memref<18x192xbf16, #tpu.memory_space<vmem>>, vector<18x192xbf16>
      tpu.vector_store %arg17[%c0_76, %c0_77], %87 {strides = array<i32>} : memref<18x192xbf16, #tpu.memory_space<vmem>>, vector<18x192xbf16>,
    } else {
    }
    %c0 = arith.constant 0 : index
    %c0_1 = arith.constant 0 : index
    %3 = vector.load %arg16[%c0, %c0_1] : memref<18x192xbf16, #tpu.memory_space<vmem>>, vector<18x192xbf16>
    %c0_2 = arith.constant 0 : index
    %c0_3 = arith.constant 0 : index
    %4 = vector.load %arg12[%c0_2, %c0_3] : memref<192x896xbf16, #tpu.memory_space<vmem>>, vector<192x896xbf16>
    %cst = arith.constant dense<0.000000e+00> : vector<18x896xf32>
    %5 = tpu.matmul %3, %4, %cst {dimension_numbers = #tpu.dot_dimension_numbers<[1], [0], [0], [1], [0, 0, 1, 1], [], []>} : vector<18x192xbf16>, vector<192x896xbf16>, vector<18x896xf32> -> vector<18x896xf32>
    %c0_4 = arith.constant 0 : index
    %c0_5 = arith.constant 0 : index
    %6 = vector.load %arg17[%c0_4, %c0_5] : memref<18x192xbf16, #tpu.memory_space<vmem>>, vector<18x192xbf16>
    %c0_6 = arith.constant 0 : index
    %c0_7 = arith.constant 0 : index
    %7 = vector.load %arg13[%c0_6, %c0_7] : memref<192x896xbf16, #tpu.memory_space<vmem>>, vector<192x896xbf16>
    %cst_8 = arith.constant dense<0.000000e+00> : vector<18x896xf32>
    %8 = tpu.matmul %6, %7, %cst_8 {dimension_numbers = #tpu.dot_dimension_numbers<[1], [0], [0], [1], [0, 0, 1, 1], [], []>} : vector<18x192xbf16>, vector<192x896xbf16>, vector<18x896xf32> -> vector<18x896xf32>
    %9 = arith.addf %5, %8 : vector<18x896xf32>
    %c0_9 = arith.constant 0 : index
    %c0_10 = arith.constant 0 : index
    %10 = vector.load %arg14[%c0_9, %c0_10] : memref<1x896xf32, #tpu.memory_space<vmem>>, vector<1x896xf32>
    %11 = vector.broadcast %10 : vector<1x896xf32> to vector<18x896xf32>
    %12 = arith.addf %9, %11 : vector<18x896xf32>
    %cst_11 = arith.constant 2.000000e-01 : f32
    %13 = vector.broadcast %cst_11 : f32 to vector<18x896xf32>
    %14 = arith.mulf %12, %13 : vector<18x896xf32>
    %c0_12 = arith.constant 0 : index
    %c0_13 = arith.constant 0 : index
    %15 = vector.load %arg2[%c0_12, %c0_13] : memref<18x896xf32, #tpu.memory_space<vmem>>, vector<18x896xf32>
    %16 = arith.addf %14, %15 : vector<18x896xf32>
    %cst_14 = arith.constant 0.000000e+00 : f32
    %17 = vector.broadcast %cst_14 : f32 to vector<18x896xf32>
    %18 = arith.maximumf %16, %17 : vector<18x896xf32>
    %c0_15 = arith.constant 0 : index
    %c0_16 = arith.constant 0 : index
    %19 = vector.load %arg15[%c0_15, %c0_16] : memref<18x896xf32, #tpu.memory_space<vmem>>, vector<18x896xf32>
    tpu.vector_store %arg15[%c0_15, %c0_16], %18 {strides = array<i32>} : memref<18x896xf32, #tpu.memory_space<vmem>>, vector<18x896xf32>,
    return
  }
  func.func @transform_0(%arg0: i32) -> (i32, i32) {
    %c0_i32 = arith.constant 0 : i32
    %c0_i32_0 = arith.constant 0 : i32
    %c0_i32_1 = arith.constant 0 : i32
    return %c0_i32, %c0_i32_0 : i32, i32
  }
  func.func @transform_1(%arg0: i32) -> (i32, i32) {
    %c0_i32 = arith.constant 0 : i32
    %c0_i32_0 = arith.constant 0 : i32
    return %c0_i32, %arg0 : i32, i32
  }
  func.func @transform_2(%arg0: i32) -> (i32, i32) {
    %c0_i32 = arith.constant 0 : i32
    %c0_i32_0 = arith.constant 0 : i32
    %c0_i32_1 = arith.constant 0 : i32
    return %c0_i32, %c0_i32_0 : i32, i32
  }
  func.func @transform_3(%arg0: i32) -> (i32, i32) {
    %c0_i32 = arith.constant 0 : i32
    %c0_i32_0 = arith.constant 0 : i32
    %c0_i32_1 = arith.constant 0 : i32
    return %c0_i32, %c0_i32_0 : i32, i32
  }
  func.func @transform_4(%arg0: i32) -> (i32, i32) {
    %c0_i32 = arith.constant 0 : i32
    %c0_i32_0 = arith.constant 0 : i32
    %c0_i32_1 = arith.constant 0 : i32
    return %c0_i32, %c0_i32_0 : i32, i32
  }
  func.func @transform_5(%arg0: i32) -> (i32, i32) {
    %c0_i32 = arith.constant 0 : i32
    %c0_i32_0 = arith.constant 0 : i32
    %c0_i32_1 = arith.constant 0 : i32
    return %c0_i32, %c0_i32_0 : i32, i32
  }
  func.func @transform_6(%arg0: i32) -> (i32, i32, i32) {
    %c0_i32 = arith.constant 0 : i32
    %c0_i32_0 = arith.constant 0 : i32
    %c0_i32_1 = arith.constant 0 : i32
    %c0_i32_2 = arith.constant 0 : i32
    return %c0_i32, %c0_i32_0, %c0_i32_1 : i32, i32, i32
  }
  func.func @transform_7(%arg0: i32) -> (i32, i32, i32) {
    %c0_i32 = arith.constant 0 : i32
    %c0_i32_0 = arith.constant 0 : i32
    %c0_i32_1 = arith.constant 0 : i32
    %c0_i32_2 = arith.constant 0 : i32
    return %c0_i32, %c0_i32_0, %c0_i32_1 : i32, i32, i32
  }
  func.func @transform_8(%arg0: i32) -> (i32, i32) {
    %c0_i32 = arith.constant 0 : i32
    %c0_i32_0 = arith.constant 0 : i32
    %c0_i32_1 = arith.constant 0 : i32
    return %c0_i32, %c0_i32_0 : i32, i32
  }
  func.func @transform_9(%arg0: i32) -> (i32, i32, i32) {
    %c0_i32 = arith.constant 0 : i32
    %c0_i32_0 = arith.constant 0 : i32
    %c0_i32_1 = arith.constant 0 : i32
    %c0_i32_2 = arith.constant 0 : i32
    return %c0_i32, %c0_i32_0, %c0_i32_1 : i32, i32, i32
  }
  func.func @transform_10(%arg0: i32) -> (i32, i32) {
    %c0_i32 = arith.constant 0 : i32
    %c0_i32_0 = arith.constant 0 : i32
    %c0_i32_1 = arith.constant 0 : i32
    return %c0_i32, %c0_i32_0 : i32, i32
  }
  func.func @transform_11(%arg0: i32) -> (i32, i32) {
    %c0_i32 = arith.constant 0 : i32
    %c0_i32_0 = arith.constant 0 : i32
    return %c0_i32, %arg0 : i32, i32
  }
  func.func @transform_12(%arg0: i32) -> (i32, i32) {
    %c0_i32 = arith.constant 0 : i32
    %c0_i32_0 = arith.constant 0 : i32
    return %c0_i32, %arg0 : i32, i32
  }
  func.func @transform_13(%arg0: i32) -> (i32, i32) {
    %c0_i32 = arith.constant 0 : i32
    %c0_i32_0 = arith.constant 0 : i32
    return %c0_i32, %arg0 : i32, i32
  }
  func.func @transform_14(%arg0: i32) -> (i32, i32) {
    %c0_i32 = arith.constant 0 : i32
    %c0_i32_0 = arith.constant 0 : i32
    return %c0_i32, %arg0 : i32, i32
  }
}

</mosaic_0001>

<bundles_post_ra>
// kernel: block8_forward.1
= control target key start
LH: loop header
LB: loop body
LE: loop exit
PB: predicated region body
PF: predicated region fallthrough
CT: control target
= control target key end

     0   :  { %s13643_s0 = inlined_call_operand.vmem [shape: bf16[18,1792], index: 0, kind: input, shape index: {}]   ;;  %s13644_s1 = inlined_call_operand.vmem [shape: f32[18,1792], index: 1, kind: input, shape index: {}]   ;;  %s13645_s2 = inlined_call_operand.vmem [shape: bf16[1792,192], index: 2, kind: input, shape index: {}]   ;;  %s13646_s3 = inlined_call_operand.vmem [shape: f32[1,192], index: 3, kind: input, shape index: {}]   ;;  %s13647_s4 = inlined_call_operand.vmem [shape: bf16[1792,192], index: 4, kind: input, shape index: {}]   ;;  %s13648_s5 = inlined_call_operand.vmem [shape: f32[1,192], index: 5, kind: input, shape index: {}]   ;;  %s13649_s6 = inlined_call_operand.vmem [shape: bf16[4,18,18], index: 6, kind: input, shape index: {}]   ;;  %s13650_s7 = inlined_call_operand.vmem [shape: bf16[3,192,192], index: 7, kind: input, shape index: {}]   ;;  %s13651_s8 = inlined_call_operand.vmem [shape: f32[1,192], index: 8, kind: input, shape index: {}]   ;;  %s13652_s9 = inlined_call_operand.vmem [shape: bf16[3,192,192], index: 9, kind: input, shape index: {}]   ;;  %s13653_s10 = inlined_call_operand.vmem [shape: f32[1,192], index: 10, kind: input, shape index: {}]   ;;  %s13654_s11 = inlined_call_operand.vmem [shape: bf16[192,1792], index: 11, kind: input, shape index: {}]   ;;  %s13655_s12 = inlined_call_operand.vmem [shape: bf16[192,1792], index: 12, kind: input, shape index: {}]   ;;  %s13656_s13 = inlined_call_operand.vmem [shape: f32[1,1792], index: 13, kind: input, shape index: {}]   ;;  %s13657_s14 = inlined_call_operand.vmem [shape: f32[18,1792], index: 14, kind: output, shape index: {}]  }
   0x1   :  { %13661 = sst [smem:[#allocation11_spill]] %s13644_s1 }
   0x2   :  { %13662 = sst [smem:[#allocation12_spill]] %s13654_s11 }
   0x3   :  { %13663 = sst [smem:[#allocation13_spill]] %s13655_s12 }
   0x4   :  { %s10487_s29 = smov 0   ;;  %s10489_s30 = smov 0  }
   0x5   :  { %s10491_s15 = smov 0  }
   0x6 LB: > { %13664 = sst [smem:[#allocation8_spill]] %s10404_s30  ;;  %s10503_s16 = sadd.s32 4294967295, %s10408_s15   ;;  %s10408_s15 = sphi %s10491_s15, %s13677_s15   ;;  %s10404_s30 = sphi %s10489_s30, %s13679_s30   ;;  %s10400_s29 = sphi %s10487_s29, %s13678_s29  }
   0x7   : > { %s10506_s17 = sadd.s32 1, %s10408_s15   ;;  %s52_s19 = sadd.s32 1, %s10404_s30 }
   0x8   : > { %13665 = sst [smem:[#allocation9_spill]] %s10506_s17  ;;  %s49_s18 = ssub.s32 %s10408_s15, %s10506_s17 }
   0x9   : > { %p50_p0 = scmp.eq.s32.totalorder %s49_s18, 0  ;;  %p59_p1 = scmp.ne.s32.totalorder %s10404_s30, %s10400_s29 }
   0xa   : > { %p60_p2 = scmp.eq.s32.totalorder %s10408_s15, 0  ;;  %p356_p3 = scmp.eq.s32.totalorder %s10503_s16, 1 }
   0xb   : > { %s10516_s20 = scalar_select %p50_p0, %s10404_s30, %s52_s19  }
   0xc   : > { %p10518_p4 = por %p60_p2, %p59_p1  ;;  %p10522_p5 = por %p356_p3, %p59_p1 }
   0xd   : > { %13666 = sst [smem:[#allocation10_spill]] %s10516_s20  ;;  %p8090_p6 = scmp.ge.s32.totalorder %s10408_s15, 2 }
   0xf   : > { %408 = sbr.rel (%p8090_p6) target bundleno = 162 (0xa2), region = 56 }
  0x14   : > { %411 = sbr.rel (!%p10518_p4) target bundleno = 40 (0x28), region = 60  ;;  %s413_s23 = sand.u32 (%p10518_p4), 1, %s10404_s30  }
  0x15   : > { %s9150_s24 = smul.u32 (%p10518_p4), 56, %s10408_s15  ;;  %s13669_s1 = sld [smem:[#allocation11_spill]] (%p10518_p4) }
  0x16   : > { %s9160_s25 = smul.u32 (%p10518_p4), 168, %s413_s23 }
  0x18   : > { %s10539_s18 = scalar_lea.vmem (%p10518_p4), [#allocation4], %s9160_s25 }
  0x1b   : > { %s10534_s28 = scalar_lea.vmem %s13669_s1, %s9150_s24 }
  0x1c   : > { %v431_v0 = vld [vmem:[%s10534_s28] sm:$0xff]  ;;  %v433_v1 = vld [vmem:[%s10534_s28 + $0x8] sm:$0xff]  ;;  %v435_v2 = vld [vmem:[%s10534_s28 + $0x10] sm:$0xff] }
  0x1d   : > { %432 = vst [vmem:[%s10539_s18] sm:$0xff] %v431_v0  ;;  %434 = vst [vmem:[%s10539_s18 + $0x8] sm:$0xff] %v433_v1  ;;  %v437_v3 = vld [vmem:[%s10534_s28 + $0x18] sm:$0xff]  ;;  %v439_v4 = vld [vmem:[%s10534_s28 + $0x20] sm:$0xff] }
  0x1e   : > { %436 = vst [vmem:[%s10539_s18 + $0x10] sm:$0xff] %v435_v2  ;;  %v441_v5 = vld [vmem:[%s10534_s28 + $0x28] sm:$0xff]  ;;  %438 = vst [vmem:[%s10539_s18 + $0x18] sm:$0xff] %v437_v3  ;;  %v443_v6 = vld [vmem:[%s10534_s28 + $0x30] sm:$0xff] }
  0x1f   : > { %440 = vst [vmem:[%s10539_s18 + $0x20] sm:$0xff] %v439_v4  ;;  %442 = vst [vmem:[%s10539_s18 + $0x28] sm:$0xff] %v441_v5  ;;  %v445_v7 = vld [vmem:[%s10534_s28 + $0x70] sm:$0xff]  ;;  %v447_v8 = vld [vmem:[%s10534_s28 + $0x78] sm:$0xff] }
  0x20   : > { %444 = vst [vmem:[%s10539_s18 + $0x30] sm:$0xff] %v443_v6  ;;  %446 = vst [vmem:[%s10539_s18 + $0x38] sm:$0xff] %v445_v7  ;;  %v449_v9 = vld [vmem:[%s10534_s28 + $0x80] sm:$0xff]  ;;  %v451_v10 = vld [vmem:[%s10534_s28 + $0x88] sm:$0xff] }
  0x21   : > { %448 = vst [vmem:[%s10539_s18 + $0x40] sm:$0xff] %v447_v8  ;;  %v453_v11 = vld [vmem:[%s10534_s28 + $0x90] sm:$0xff]  ;;  %450 = vst [vmem:[%s10539_s18 + $0x48] sm:$0xff] %v449_v9  ;;  %v455_v12 = vld [vmem:[%s10534_s28 + $0x98] sm:$0xff] }
  0x22   : > { %452 = vst [vmem:[%s10539_s18 + $0x50] sm:$0xff] %v451_v10  ;;  %454 = vst [vmem:[%s10539_s18 + $0x58] sm:$0xff] %v453_v11  ;;  %v457_v13 = vld [vmem:[%s10534_s28 + $0xa0] sm:$0xff]  ;;  %v461_v15 = vld [vmem:[%s10534_s28 + $0xe8] sm:$0xff] }
  0x23   : > { %v459_v14 = vld [vmem:[%s10534_s28 + $0xe0] sm:$0xff]  ;;  %456 = vst [vmem:[%s10539_s18 + $0x60] sm:$0xff] %v455_v12  ;;  %458 = vst [vmem:[%s10539_s18 + $0x68] sm:$0xff] %v457_v13  ;;  %v463_v16 = vld [vmem:[%s10534_s28 + $0xf0] sm:$0xff] }
  0x24   : > { %460 = vst [vmem:[%s10539_s18 + $0x70] sm:$0xff] %v459_v14  ;;  %v465_v17 = vld [vmem:[%s10534_s28 + $0xf8] sm:$0xff]  ;;  %462 = vst [vmem:[%s10539_s18 + $0x78] sm:$0xff] %v461_v15  ;;  %v467_v18 = vld [vmem:[%s10534_s28 + $0x100] sm:$0xff] }
  0x25   : > { %464 = vst [vmem:[%s10539_s18 + $0x80] sm:$0xff] %v463_v16  ;;  %466 = vst [vmem:[%s10539_s18 + $0x88] sm:$0xff] %v465_v17  ;;  %v469_v19 = vld [vmem:[%s10534_s28 + $0x108] sm:$0xff]  ;;  %v471_v20 = vld [vmem:[%s10534_s28 + $0x110] sm:$0xff] }
  0x26   : > { %468 = vst [vmem:[%s10539_s18 + $0x90] sm:$0xff] %v467_v18  ;;  %470 = vst [vmem:[%s10539_s18 + $0x98] sm:$0xff] %v469_v19 }
  0x27   : > { %472 = vst [vmem:[%s10539_s18 + $0xa0] sm:$0xff] %v471_v20 }
  0x28 PF: > { %478 = sbr.rel (!%p10518_p4) target bundleno = 101 (0x65), region = 83  ;;  %s480_s19 = sand.u32 (%p10518_p4), 1, %s10404_s30  }
  0x29   : > { %s9151_s23 = smul.u32 (%p10518_p4), 28, %s10408_s15  ;;  %s13670_s11 = sld [smem:[#allocation12_spill]] (%p10518_p4) }
  0x2a   : > { %s9161_s24 = smul.u32 (%p10518_p4), 672, %s480_s19 }
  0x2c   : > { %s10592_s28 = scalar_lea.vmem (%p10518_p4), [#allocation5], %s9161_s24 }
  0x2f   : > { %s10587_s27 = scalar_lea.vmem %s13670_s11, %s9151_s23 }
  0x30   : > { %v500_v21 = vld [vmem:[%s10587_s27] sm:$0xff]  ;;  %v502_v22 = vld [vmem:[%s10587_s27 + $0x8] sm:$0xff]  ;;  %v504_v23 = vld [vmem:[%s10587_s27 + $0x10] sm:$0xff] }
  0x31   : > { %501 = vst [vmem:[%s10592_s28] sm:$0xff] %v500_v21  ;;  %503 = vst [vmem:[%s10592_s28 + $0x8] sm:$0xff] %v502_v22  ;;  %v506_v24 = vld [vmem:[%s10587_s27 + $0x38] sm:$0xff]  ;;  %v508_v25 = vld [vmem:[%s10587_s27 + $0x40] sm:$0xff] }
  0x32   : > { %505 = vst [vmem:[%s10592_s28 + $0x10] sm:$0xff] %v504_v23  ;;  %v510_v26 = vld [vmem:[%s10587_s27 + $0x48] sm:$0xff]  ;;  %507 = vst [vmem:[%s10592_s28 + $0x1c] sm:$0xff] %v506_v24  ;;  %v512_v27 = vld [vmem:[%s10587_s27 + $0x70] sm:$0xff] }
  0x33   : > { %509 = vst [vmem:[%s10592_s28 + $0x24] sm:$0xff] %v508_v25  ;;  %511 = vst [vmem:[%s10592_s28 + $0x2c] sm:$0xff] %v510_v26  ;;  %v514_v28 = vld [vmem:[%s10587_s27 + $0x78] sm:$0xff]  ;;  %v516_v29 = vld [vmem:[%s10587_s27 + $0x80] sm:$0xff] }
  0x34   : > { %513 = vst [vmem:[%s10592_s28 + $0x38] sm:$0xff] %v512_v27  ;;  %515 = vst [vmem:[%s10592_s28 + $0x40] sm:$0xff] %v514_v28  ;;  %v518_v30 = vld [vmem:[%s10587_s27 + $0xa8] sm:$0xff]  ;;  %v520_v31 = vld [vmem:[%s10587_s27 + $0xb0] sm:$0xff] }
  0x35   : > { %517 = vst [vmem:[%s10592_s28 + $0x48] sm:$0xff] %v516_v29  ;;  %v522_v32 = vld [vmem:[%s10587_s27 + $0xb8] sm:$0xff]  ;;  %519 = vst [vmem:[%s10592_s28 + $0x54] sm:$0xff] %v518_v30  ;;  %v524_v33 = vld [vmem:[%s10587_s27 + $0xe0] sm:$0xff] }
  0x36   : > { %521 = vst [vmem:[%s10592_s28 + $0x5c] sm:$0xff] %v520_v31  ;;  %523 = vst [vmem:[%s10592_s28 + $0x64] sm:$0xff] %v522_v32  ;;  %v526_v34 = vld [vmem:[%s10587_s27 + $0xe8] sm:$0xff]  ;;  %v528_v35 = vld [vmem:[%s10587_s27 + $0xf0] sm:$0xff] }
  0x37   : > { %525 = vst [vmem:[%s10592_s28 + $0x70] sm:$0xff] %v524_v33  ;;  %527 = vst [vmem:[%s10592_s28 + $0x78] sm:$0xff] %v526_v34  ;;  %v530_v36 = vld [vmem:[%s10587_s27 + $0x118] sm:$0xff]  ;;  %v532_v37 = vld [vmem:[%s10587_s27 + $0x120] sm:$0xff] }
  0x38   : > { %529 = vst [vmem:[%s10592_s28 + $0x80] sm:$0xff] %v528_v35  ;;  %v534_v38 = vld [vmem:[%s10587_s27 + $0x128] sm:$0xff]  ;;  %531 = vst [vmem:[%s10592_s28 + $0x8c] sm:$0xff] %v530_v36  ;;  %v536_v39 = vld [vmem:[%s10587_s27 + $0x150] sm:$0xff] }
  0x39   : > { %533 = vst [vmem:[%s10592_s28 + $0x94] sm:$0xff] %v532_v37  ;;  %535 = vst [vmem:[%s10592_s28 + $0x9c] sm:$0xff] %v534_v38  ;;  %v538_v40 = vld [vmem:[%s10587_s27 + $0x158] sm:$0xff]  ;;  %v540_v41 = vld [vmem:[%s10587_s27 + $0x160] sm:$0xff] }
  0x3a   : > { %537 = vst [vmem:[%s10592_s28 + $0xa8] sm:$0xff] %v536_v39  ;;  %539 = vst [vmem:[%s10592_s28 + $0xb0] sm:$0xff] %v538_v40  ;;  %v542_v42 = vld [vmem:[%s10587_s27 + $0x188] sm:$0xff]  ;;  %v544_v43 = vld [vmem:[%s10587_s27 + $0x190] sm:$0xff] }
  0x3b   : > { %541 = vst [vmem:[%s10592_s28 + $0xb8] sm:$0xff] %v540_v41  ;;  %v546_v44 = vld [vmem:[%s10587_s27 + $0x198] sm:$0xff]  ;;  %543 = vst [vmem:[%s10592_s28 + $0xc4] sm:$0xff] %v542_v42  ;;  %v548_v45 = vld [vmem:[%s10587_s27 + $0x1c0] sm:$0xff] }
  0x3c   : > { %545 = vst [vmem:[%s10592_s28 + $0xcc] sm:$0xff] %v544_v43  ;;  %547 = vst [vmem:[%s10592_s28 + $0xd4] sm:$0xff] %v546_v44  ;;  %v550_v46 = vld [vmem:[%s10587_s27 + $0x1c8] sm:$0xff]  ;;  %v552_v47 = vld [vmem:[%s10587_s27 + $0x1d0] sm:$0xff] }
  0x3d   : > { %549 = vst [vmem:[%s10592_s28 + $0xe0] sm:$0xff] %v548_v45  ;;  %551 = vst [vmem:[%s10592_s28 + $0xe8] sm:$0xff] %v550_v46  ;;  %v554_v48 = vld [vmem:[%s10587_s27 + $0x1f8] sm:$0xff]  ;;  %v556_v49 = vld [vmem:[%s10587_s27 + $0x200] sm:$0xff] }
  0x3e   : > { %553 = vst [vmem:[%s10592_s28 + $0xf0] sm:$0xff] %v552_v47  ;;  %v558_v50 = vld [vmem:[%s10587_s27 + $0x208] sm:$0xff]  ;;  %555 = vst [vmem:[%s10592_s28 + $0xfc] sm:$0xff] %v554_v48  ;;  %v560_v51 = vld [vmem:[%s10587_s27 + $0x230] sm:$0xff] }
  0x3f   : > { %557 = vst [vmem:[%s10592_s28 + $0x104] sm:$0xff] %v556_v49  ;;  %559 = vst [vmem:[%s10592_s28 + $0x10c] sm:$0xff] %v558_v50  ;;  %v562_v52 = vld [vmem:[%s10587_s27 + $0x238] sm:$0xff]  ;;  %v564_v53 = vld [vmem:[%s10587_s27 + $0x240] sm:$0xff] }
  0x40   : > { %561 = vst [vmem:[%s10592_s28 + $0x118] sm:$0xff] %v560_v51  ;;  %563 = vst [vmem:[%s10592_s28 + $0x120] sm:$0xff] %v562_v52  ;;  %v566_v54 = vld [vmem:[%s10587_s27 + $0x268] sm:$0xff]  ;;  %v568_v55 = vld [vmem:[%s10587_s27 + $0x270] sm:$0xff] }
  0x41   : > { %565 = vst [vmem:[%s10592_s28 + $0x128] sm:$0xff] %v564_v53  ;;  %v570_v56 = vld [vmem:[%s10587_s27 + $0x278] sm:$0xff]  ;;  %567 = vst [vmem:[%s10592_s28 + $0x134] sm:$0xff] %v566_v54  ;;  %v572_v57 = vld [vmem:[%s10587_s27 + $0x2a0] sm:$0xff] }
  0x42   : > { %569 = vst [vmem:[%s10592_s28 + $0x13c] sm:$0xff] %v568_v55  ;;  %571 = vst [vmem:[%s10592_s28 + $0x144] sm:$0xff] %v570_v56  ;;  %v574_v58 = vld [vmem:[%s10587_s27 + $0x2a8] sm:$0xff]  ;;  %v576_v59 = vld [vmem:[%s10587_s27 + $0x2b0] sm:$0xff] }
  0x43   : > { %573 = vst [vmem:[%s10592_s28 + $0x150] sm:$0xff] %v572_v57  ;;  %575 = vst [vmem:[%s10592_s28 + $0x158] sm:$0xff] %v574_v58  ;;  %v578_v60 = vld [vmem:[%s10587_s27 + $0x2d8] sm:$0xff]  ;;  %v580_v61 = vld [vmem:[%s10587_s27 + $0x2e0] sm:$0xff] }
  0x44   : > { %577 = vst [vmem:[%s10592_s28 + $0x160] sm:$0xff] %v576_v59  ;;  %v582_v62 = vld [vmem:[%s10587_s27 + $0x2e8] sm:$0xff]  ;;  %579 = vst [vmem:[%s10592_s28 + $0x16c] sm:$0xff] %v578_v60  ;;  %v584_v63 = vld [vmem:[%s10587_s27 + $0x310] sm:$0xff] }
  0x45   : > { %581 = vst [vmem:[%s10592_s28 + $0x174] sm:$0xff] %v580_v61  ;;  %583 = vst [vmem:[%s10592_s28 + $0x17c] sm:$0xff] %v582_v62  ;;  %v586_v0 = vld [vmem:[%s10587_s27 + $0x318] sm:$0xff]  ;;  %v588_v1 = vld [vmem:[%s10587_s27 + $0x320] sm:$0xff] }
  0x46   : > { %585 = vst [vmem:[%s10592_s28 + $0x188] sm:$0xff] %v584_v63  ;;  %587 = vst [vmem:[%s10592_s28 + $0x190] sm:$0xff] %v586_v0  ;;  %v590_v2 = vld [vmem:[%s10587_s27 + $0x348] sm:$0xff]  ;;  %v592_v3 = vld [vmem:[%s10587_s27 + $0x350] sm:$0xff] }
  0x47   : > { %589 = vst [vmem:[%s10592_s28 + $0x198] sm:$0xff] %v588_v1  ;;  %v594_v4 = vld [vmem:[%s10587_s27 + $0x358] sm:$0xff]  ;;  %591 = vst [vmem:[%s10592_s28 + $0x1a4] sm:$0xff] %v590_v2  ;;  %v596_v5 = vld [vmem:[%s10587_s27 + $0x380] sm:$0xff] }
  0x48   : > { %593 = vst [vmem:[%s10592_s28 + $0x1ac] sm:$0xff] %v592_v3  ;;  %595 = vst [vmem:[%s10592_s28 + $0x1b4] sm:$0xff] %v594_v4  ;;  %v598_v6 = vld [vmem:[%s10587_s27 + $0x388] sm:$0xff]  ;;  %v600_v7 = vld [vmem:[%s10587_s27 + $0x390] sm:$0xff] }
  0x49   : > { %597 = vst [vmem:[%s10592_s28 + $0x1c0] sm:$0xff] %v596_v5  ;;  %599 = vst [vmem:[%s10592_s28 + $0x1c8] sm:$0xff] %v598_v6  ;;  %v602_v8 = vld [vmem:[%s10587_s27 + $0x3b8] sm:$0xff]  ;;  %v604_v9 = vld [vmem:[%s10587_s27 + $0x3c0] sm:$0xff] }
  0x4a   : > { %601 = vst [vmem:[%s10592_s28 + $0x1d0] sm:$0xff] %v600_v7  ;;  %v606_v10 = vld [vmem:[%s10587_s27 + $0x3c8] sm:$0xff]  ;;  %603 = vst [vmem:[%s10592_s28 + $0x1dc] sm:$0xff] %v602_v8  ;;  %v608_v11 = vld [vmem:[%s10587_s27 + $0x3f0] sm:$0xff] }
  0x4b   : > { %605 = vst [vmem:[%s10592_s28 + $0x1e4] sm:$0xff] %v604_v9  ;;  %607 = vst [vmem:[%s10592_s28 + $0x1ec] sm:$0xff] %v606_v10  ;;  %v610_v12 = vld [vmem:[%s10587_s27 + $0x3f8] sm:$0xff]  ;;  %v612_v13 = vld [vmem:[%s10587_s27 + $0x400] sm:$0xff] }
  0x4c   : > { %609 = vst [vmem:[%s10592_s28 + $0x1f8] sm:$0xff] %v608_v11  ;;  %611 = vst [vmem:[%s10592_s28 + $0x200] sm:$0xff] %v610_v12  ;;  %v614_v14 = vld [vmem:[%s10587_s27 + $0x428] sm:$0xff]  ;;  %v616_v15 = vld [vmem:[%s10587_s27 + $0x430] sm:$0xff] }
  0x4d   : > { %613 = vst [vmem:[%s10592_s28 + $0x208] sm:$0xff] %v612_v13  ;;  %v618_v16 = vld [vmem:[%s10587_s27 + $0x438] sm:$0xff]  ;;  %615 = vst [vmem:[%s10592_s28 + $0x214] sm:$0xff] %v614_v14  ;;  %v620_v17 = vld [vmem:[%s10587_s27 + $0x460] sm:$0xff] }
  0x4e   : > { %617 = vst [vmem:[%s10592_s28 + $0x21c] sm:$0xff] %v616_v15  ;;  %619 = vst [vmem:[%s10592_s28 + $0x224] sm:$0xff] %v618_v16  ;;  %v622_v18 = vld [vmem:[%s10587_s27 + $0x468] sm:$0xff]  ;;  %v624_v19 = vld [vmem:[%s10587_s27 + $0x470] sm:$0xff] }
  0x4f   : > { %621 = vst [vmem:[%s10592_s28 + $0x230] sm:$0xff] %v620_v17  ;;  %623 = vst [vmem:[%s10592_s28 + $0x238] sm:$0xff] %v622_v18  ;;  %v626_v20 = vld [vmem:[%s10587_s27 + $0x498] sm:$0xff]  ;;  %v628_v21 = vld [vmem:[%s10587_s27 + $0x4a0] sm:$0xff] }
  0x50   : > { %625 = vst [vmem:[%s10592_s28 + $0x240] sm:$0xff] %v624_v19  ;;  %v630_v22 = vld [vmem:[%s10587_s27 + $0x4a8] sm:$0xff]  ;;  %627 = vst [vmem:[%s10592_s28 + $0x24c] sm:$0xff] %v626_v20  ;;  %v632_v23 = vld [vmem:[%s10587_s27 + $0x4d0] sm:$0xff] }
  0x51   : > { %629 = vst [vmem:[%s10592_s28 + $0x254] sm:$0xff] %v628_v21  ;;  %631 = vst [vmem:[%s10592_s28 + $0x25c] sm:$0xff] %v630_v22  ;;  %v634_v24 = vld [vmem:[%s10587_s27 + $0x4d8] sm:$0xff]  ;;  %v636_v25 = vld [vmem:[%s10587_s27 + $0x4e0] sm:$0xff] }
  0x52   : > { %633 = vst [vmem:[%s10592_s28 + $0x268] sm:$0xff] %v632_v23  ;;  %635 = vst [vmem:[%s10592_s28 + $0x270] sm:$0xff] %v634_v24  ;;  %v638_v26 = vld [vmem:[%s10587_s27 + $0x508] sm:$0xff]  ;;  %v640_v27 = vld [vmem:[%s10587_s27 + $0x510] sm:$0xff] }
  0x53   : > { %637 = vst [vmem:[%s10592_s28 + $0x278] sm:$0xff] %v636_v25  ;;  %v642_v28 = vld [vmem:[%s10587_s27 + $0x518] sm:$0xff]  ;;  %639 = vst [vmem:[%s10592_s28 + $0x284] sm:$0xff] %v638_v26  ;;  %v8095_v30 = vld [vmem:[%s10587_s27 + $0x50] sm:$0xf] }
  0x54   : > { %641 = vst [vmem:[%s10592_s28 + $0x28c] sm:$0xff] %v640_v27  ;;  %643 = vst [vmem:[%s10592_s28 + $0x294] sm:$0xff] %v642_v28  ;;  %v8093_v29 = vld [vmem:[%s10587_s27 + $0x18] sm:$0xf]  ;;  %v8097_v31 = vld [vmem:[%s10587_s27 + $0x88] sm:$0xf] }
  0x55   : > { %8094 = vst [vmem:[%s10592_s28 + $0x18] sm:$0xf] %v8093_v29  ;;  %8096 = vst [vmem:[%s10592_s28 + $0x34] sm:$0xf] %v8095_v30  ;;  %v8099_v32 = vld [vmem:[%s10587_s27 + $0xc0] sm:$0xf] }
  0x56   : > { %8098 = vst [vmem:[%s10592_s28 + $0x50] sm:$0xf] %v8097_v31  ;;  %v8101_v33 = vld [vmem:[%s10587_s27 + $0xf8] sm:$0xf]  ;;  %v8103_v34 = vld [vmem:[%s10587_s27 + $0x130] sm:$0xf] }
  0x57   : > { %8100 = vst [vmem:[%s10592_s28 + $0x6c] sm:$0xf] %v8099_v32  ;;  %8102 = vst [vmem:[%s10592_s28 + $0x88] sm:$0xf] %v8101_v33  ;;  %v8105_v35 = vld [vmem:[%s10587_s27 + $0x168] sm:$0xf] }
  0x58   : > { %8104 = vst [vmem:[%s10592_s28 + $0xa4] sm:$0xf] %v8103_v34  ;;  %v8107_v36 = vld [vmem:[%s10587_s27 + $0x1a0] sm:$0xf]  ;;  %v8109_v37 = vld [vmem:[%s10587_s27 + $0x1d8] sm:$0xf] }
  0x59   : > { %8106 = vst [vmem:[%s10592_s28 + $0xc0] sm:$0xf] %v8105_v35  ;;  %8108 = vst [vmem:[%s10592_s28 + $0xdc] sm:$0xf] %v8107_v36  ;;  %v8111_v38 = vld [vmem:[%s10587_s27 + $0x210] sm:$0xf] }
  0x5a   : > { %8110 = vst [vmem:[%s10592_s28 + $0xf8] sm:$0xf] %v8109_v37  ;;  %v8113_v39 = vld [vmem:[%s10587_s27 + $0x248] sm:$0xf]  ;;  %v8115_v40 = vld [vmem:[%s10587_s27 + $0x280] sm:$0xf] }
  0x5b   : > { %8112 = vst [vmem:[%s10592_s28 + $0x114] sm:$0xf] %v8111_v38  ;;  %8114 = vst [vmem:[%s10592_s28 + $0x130] sm:$0xf] %v8113_v39  ;;  %v8117_v41 = vld [vmem:[%s10587_s27 + $0x2b8] sm:$0xf] }
  0x5c   : > { %8116 = vst [vmem:[%s10592_s28 + $0x14c] sm:$0xf] %v8115_v40  ;;  %v8119_v42 = vld [vmem:[%s10587_s27 + $0x2f0] sm:$0xf]  ;;  %v8121_v43 = vld [vmem:[%s10587_s27 + $0x328] sm:$0xf] }
  0x5d   : > { %8118 = vst [vmem:[%s10592_s28 + $0x168] sm:$0xf] %v8117_v41  ;;  %8120 = vst [vmem:[%s10592_s28 + $0x184] sm:$0xf] %v8119_v42  ;;  %v8123_v44 = vld [vmem:[%s10587_s27 + $0x360] sm:$0xf] }
  0x5e   : > { %8122 = vst [vmem:[%s10592_s28 + $0x1a0] sm:$0xf] %v8121_v43  ;;  %v8125_v45 = vld [vmem:[%s10587_s27 + $0x398] sm:$0xf]  ;;  %v8127_v46 = vld [vmem:[%s10587_s27 + $0x3d0] sm:$0xf] }
  0x5f   : > { %8124 = vst [vmem:[%s10592_s28 + $0x1bc] sm:$0xf] %v8123_v44  ;;  %8126 = vst [vmem:[%s10592_s28 + $0x1d8] sm:$0xf] %v8125_v45  ;;  %v8129_v47 = vld [vmem:[%s10587_s27 + $0x408] sm:$0xf] }
  0x60   : > { %8128 = vst [vmem:[%s10592_s28 + $0x1f4] sm:$0xf] %v8127_v46  ;;  %v8131_v48 = vld [vmem:[%s10587_s27 + $0x440] sm:$0xf]  ;;  %v8133_v49 = vld [vmem:[%s10587_s27 + $0x478] sm:$0xf] }
  0x61   : > { %8130 = vst [vmem:[%s10592_s28 + $0x210] sm:$0xf] %v8129_v47  ;;  %8132 = vst [vmem:[%s10592_s28 + $0x22c] sm:$0xf] %v8131_v48  ;;  %v8135_v50 = vld [vmem:[%s10587_s27 + $0x4b0] sm:$0xf] }
  0x62   : > { %8134 = vst [vmem:[%s10592_s28 + $0x248] sm:$0xf] %v8133_v49  ;;  %v8137_v51 = vld [vmem:[%s10587_s27 + $0x4e8] sm:$0xf]  ;;  %v8139_v52 = vld [vmem:[%s10587_s27 + $0x520] sm:$0xf] }
  0x63   : > { %8136 = vst [vmem:[%s10592_s28 + $0x264] sm:$0xf] %v8135_v50  ;;  %8138 = vst [vmem:[%s10592_s28 + $0x280] sm:$0xf] %v8137_v51 }
  0x64   : > { %8140 = vst [vmem:[%s10592_s28 + $0x29c] sm:$0xf] %v8139_v52 }
  0x65 PF: > { %705 = sbr.rel (!%p10518_p4) target bundleno = 162 (0xa2), region = 109  ;;  %s707_s18 = sand.u32 (%p10518_p4), 1, %s10404_s30  }
  0x66   : > { %s9152_s19 = smul.u32 (%p10518_p4), 28, %s10408_s15  ;;  %s13671_s12 = sld [smem:[#allocation13_spill]] (%p10518_p4) }
  0x67   : > { %s9162_s23 = smul.u32 (%p10518_p4), 672, %s707_s18 }
  0x69   : > { %s10795_s21 = scalar_lea.vmem (%p10518_p4), [#allocation6], %s9162_s23 }
  0x6c   : > { %s10790_s26 = scalar_lea.vmem %s13671_s12, %s9152_s19 }
  0x6d   : > { %v727_v53 = vld [vmem:[%s10790_s26] sm:$0xff]  ;;  %v729_v54 = vld [vmem:[%s10790_s26 + $0x8] sm:$0xff]  ;;  %v731_v55 = vld [vmem:[%s10790_s26 + $0x10] sm:$0xff] }
  0x6e   : > { %728 = vst [vmem:[%s10795_s21] sm:$0xff] %v727_v53  ;;  %730 = vst [vmem:[%s10795_s21 + $0x8] sm:$0xff] %v729_v54  ;;  %v733_v56 = vld [vmem:[%s10790_s26 + $0x38] sm:$0xff]  ;;  %v735_v57 = vld [vmem:[%s10790_s26 + $0x40] sm:$0xff] }
  0x6f   : > { %732 = vst [vmem:[%s10795_s21 + $0x10] sm:$0xff] %v731_v55  ;;  %v737_v58 = vld [vmem:[%s10790_s26 + $0x48] sm:$0xff]  ;;  %734 = vst [vmem:[%s10795_s21 + $0x1c] sm:$0xff] %v733_v56  ;;  %v739_v59 = vld [vmem:[%s10790_s26 + $0x70] sm:$0xff] }
  0x70   : > { %736 = vst [vmem:[%s10795_s21 + $0x24] sm:$0xff] %v735_v57  ;;  %738 = vst [vmem:[%s10795_s21 + $0x2c] sm:$0xff] %v737_v58  ;;  %v741_v60 = vld [vmem:[%s10790_s26 + $0x78] sm:$0xff]  ;;  %v743_v61 = vld [vmem:[%s10790_s26 + $0x80] sm:$0xff] }
  0x71   : > { %740 = vst [vmem:[%s10795_s21 + $0x38] sm:$0xff] %v739_v59  ;;  %742 = vst [vmem:[%s10795_s21 + $0x40] sm:$0xff] %v741_v60  ;;  %v745_v62 = vld [vmem:[%s10790_s26 + $0xa8] sm:$0xff]  ;;  %v747_v63 = vld [vmem:[%s10790_s26 + $0xb0] sm:$0xff] }
  0x72   : > { %744 = vst [vmem:[%s10795_s21 + $0x48] sm:$0xff] %v743_v61  ;;  %v749_v0 = vld [vmem:[%s10790_s26 + $0xb8] sm:$0xff]  ;;  %746 = vst [vmem:[%s10795_s21 + $0x54] sm:$0xff] %v745_v62  ;;  %v751_v1 = vld [vmem:[%s10790_s26 + $0xe0] sm:$0xff] }
  0x73   : > { %748 = vst [vmem:[%s10795_s21 + $0x5c] sm:$0xff] %v747_v63  ;;  %750 = vst [vmem:[%s10795_s21 + $0x64] sm:$0xff] %v749_v0  ;;  %v753_v2 = vld [vmem:[%s10790_s26 + $0xe8] sm:$0xff]  ;;  %v755_v3 = vld [vmem:[%s10790_s26 + $0xf0] sm:$0xff] }
  0x74   : > { %752 = vst [vmem:[%s10795_s21 + $0x70] sm:$0xff] %v751_v1  ;;  %754 = vst [vmem:[%s10795_s21 + $0x78] sm:$0xff] %v753_v2  ;;  %v757_v4 = vld [vmem:[%s10790_s26 + $0x118] sm:$0xff]  ;;  %v759_v5 = vld [vmem:[%s10790_s26 + $0x120] sm:$0xff] }
  0x75   : > { %756 = vst [vmem:[%s10795_s21 + $0x80] sm:$0xff] %v755_v3  ;;  %v761_v6 = vld [vmem:[%s10790_s26 + $0x128] sm:$0xff]  ;;  %758 = vst [vmem:[%s10795_s21 + $0x8c] sm:$0xff] %v757_v4  ;;  %v763_v7 = vld [vmem:[%s10790_s26 + $0x150] sm:$0xff] }
  0x76   : > { %760 = vst [vmem:[%s10795_s21 + $0x94] sm:$0xff] %v759_v5  ;;  %762 = vst [vmem:[%s10795_s21 + $0x9c] sm:$0xff] %v761_v6  ;;  %v765_v8 = vld [vmem:[%s10790_s26 + $0x158] sm:$0xff]  ;;  %v767_v9 = vld [vmem:[%s10790_s26 + $0x160] sm:$0xff] }
  0x77   : > { %764 = vst [vmem:[%s10795_s21 + $0xa8] sm:$0xff] %v763_v7  ;;  %766 = vst [vmem:[%s10795_s21 + $0xb0] sm:$0xff] %v765_v8  ;;  %v769_v10 = vld [vmem:[%s10790_s26 + $0x188] sm:$0xff]  ;;  %v771_v11 = vld [vmem:[%s10790_s26 + $0x190] sm:$0xff] }
  0x78   : > { %768 = vst [vmem:[%s10795_s21 + $0xb8] sm:$0xff] %v767_v9  ;;  %v773_v12 = vld [vmem:[%s10790_s26 + $0x198] sm:$0xff]  ;;  %770 = vst [vmem:[%s10795_s21 + $0xc4] sm:$0xff] %v769_v10  ;;  %v775_v13 = vld [vmem:[%s10790_s26 + $0x1c0] sm:$0xff] }
  0x79   : > { %772 = vst [vmem:[%s10795_s21 + $0xcc] sm:$0xff] %v771_v11  ;;  %774 = vst [vmem:[%s10795_s21 + $0xd4] sm:$0xff] %v773_v12  ;;  %v777_v14 = vld [vmem:[%s10790_s26 + $0x1c8] sm:$0xff]  ;;  %v779_v15 = vld [vmem:[%s10790_s26 + $0x1d0] sm:$0xff] }
  0x7a   : > { %776 = vst [vmem:[%s10795_s21 + $0xe0] sm:$0xff] %v775_v13  ;;  %778 = vst [vmem:[%s10795_s21 + $0xe8] sm:$0xff] %v777_v14  ;;  %v781_v16 = vld [vmem:[%s10790_s26 + $0x1f8] sm:$0xff]  ;;  %v783_v17 = vld [vmem:[%s10790_s26 + $0x200] sm:$0xff] }
  0x7b   : > { %780 = vst [vmem:[%s10795_s21 + $0xf0] sm:$0xff] %v779_v15  ;;  %v785_v18 = vld [vmem:[%s10790_s26 + $0x208] sm:$0xff]  ;;  %782 = vst [vmem:[%s10795_s21 + $0xfc] sm:$0xff] %v781_v16  ;;  %v787_v19 = vld [vmem:[%s10790_s26 + $0x230] sm:$0xff] }
  0x7c   : > { %784 = vst [vmem:[%s10795_s21 + $0x104] sm:$0xff] %v783_v17  ;;  %786 = vst [vmem:[%s10795_s21 + $0x10c] sm:$0xff] %v785_v18  ;;  %v789_v20 = vld [vmem:[%s10790_s26 + $0x238] sm:$0xff]  ;;  %v791_v21 = vld [vmem:[%s10790_s26 + $0x240] sm:$0xff] }
  0x7d   : > { %788 = vst [vmem:[%s10795_s21 + $0x118] sm:$0xff] %v787_v19  ;;  %790 = vst [vmem:[%s10795_s21 + $0x120] sm:$0xff] %v789_v20  ;;  %v793_v22 = vld [vmem:[%s10790_s26 + $0x268] sm:$0xff]  ;;  %v795_v23 = vld [vmem:[%s10790_s26 + $0x270] sm:$0xff] }
  0x7e   : > { %792 = vst [vmem:[%s10795_s21 + $0x128] sm:$0xff] %v791_v21  ;;  %v797_v24 = vld [vmem:[%s10790_s26 + $0x278] sm:$0xff]  ;;  %794 = vst [vmem:[%s10795_s21 + $0x134] sm:$0xff] %v793_v22  ;;  %v799_v25 = vld [vmem:[%s10790_s26 + $0x2a0] sm:$0xff] }
  0x7f   : > { %796 = vst [vmem:[%s10795_s21 + $0x13c] sm:$0xff] %v795_v23  ;;  %798 = vst [vmem:[%s10795_s21 + $0x144] sm:$0xff] %v797_v24  ;;  %v801_v26 = vld [vmem:[%s10790_s26 + $0x2a8] sm:$0xff]  ;;  %v803_v27 = vld [vmem:[%s10790_s26 + $0x2b0] sm:$0xff] }
  0x80   : > { %800 = vst [vmem:[%s10795_s21 + $0x150] sm:$0xff] %v799_v25  ;;  %802 = vst [vmem:[%s10795_s21 + $0x158] sm:$0xff] %v801_v26  ;;  %v805_v28 = vld [vmem:[%s10790_s26 + $0x2d8] sm:$0xff]  ;;  %v807_v29 = vld [vmem:[%s10790_s26 + $0x2e0] sm:$0xff] }
  0x81   : > { %804 = vst [vmem:[%s10795_s21 + $0x160] sm:$0xff] %v803_v27  ;;  %v809_v30 = vld [vmem:[%s10790_s26 + $0x2e8] sm:$0xff]  ;;  %806 = vst [vmem:[%s10795_s21 + $0x16c] sm:$0xff] %v805_v28  ;;  %v811_v31 = vld [vmem:[%s10790_s26 + $0x310] sm:$0xff] }
  0x82   : > { %808 = vst [vmem:[%s10795_s21 + $0x174] sm:$0xff] %v807_v29  ;;  %810 = vst [vmem:[%s10795_s21 + $0x17c] sm:$0xff] %v809_v30  ;;  %v813_v32 = vld [vmem:[%s10790_s26 + $0x318] sm:$0xff]  ;;  %v815_v33 = vld [vmem:[%s10790_s26 + $0x320] sm:$0xff] }
  0x83   : > { %812 = vst [vmem:[%s10795_s21 + $0x188] sm:$0xff] %v811_v31  ;;  %814 = vst [vmem:[%s10795_s21 + $0x190] sm:$0xff] %v813_v32  ;;  %v817_v34 = vld [vmem:[%s10790_s26 + $0x348] sm:$0xff]  ;;  %v819_v35 = vld [vmem:[%s10790_s26 + $0x350] sm:$0xff] }
  0x84   : > { %816 = vst [vmem:[%s10795_s21 + $0x198] sm:$0xff] %v815_v33  ;;  %v821_v36 = vld [vmem:[%s10790_s26 + $0x358] sm:$0xff]  ;;  %818 = vst [vmem:[%s10795_s21 + $0x1a4] sm:$0xff] %v817_v34  ;;  %v823_v37 = vld [vmem:[%s10790_s26 + $0x380] sm:$0xff] }
  0x85   : > { %820 = vst [vmem:[%s10795_s21 + $0x1ac] sm:$0xff] %v819_v35  ;;  %822 = vst [vmem:[%s10795_s21 + $0x1b4] sm:$0xff] %v821_v36  ;;  %v825_v38 = vld [vmem:[%s10790_s26 + $0x388] sm:$0xff]  ;;  %v827_v39 = vld [vmem:[%s10790_s26 + $0x390] sm:$0xff] }
  0x86   : > { %824 = vst [vmem:[%s10795_s21 + $0x1c0] sm:$0xff] %v823_v37  ;;  %826 = vst [vmem:[%s10795_s21 + $0x1c8] sm:$0xff] %v825_v38  ;;  %v829_v40 = vld [vmem:[%s10790_s26 + $0x3b8] sm:$0xff]  ;;  %v831_v41 = vld [vmem:[%s10790_s26 + $0x3c0] sm:$0xff] }
  0x87   : > { %828 = vst [vmem:[%s10795_s21 + $0x1d0] sm:$0xff] %v827_v39  ;;  %v833_v42 = vld [vmem:[%s10790_s26 + $0x3c8] sm:$0xff]  ;;  %830 = vst [vmem:[%s10795_s21 + $0x1dc] sm:$0xff] %v829_v40  ;;  %v835_v43 = vld [vmem:[%s10790_s26 + $0x3f0] sm:$0xff] }
  0x88   : > { %832 = vst [vmem:[%s10795_s21 + $0x1e4] sm:$0xff] %v831_v41  ;;  %834 = vst [vmem:[%s10795_s21 + $0x1ec] sm:$0xff] %v833_v42  ;;  %v837_v44 = vld [vmem:[%s10790_s26 + $0x3f8] sm:$0xff]  ;;  %v839_v45 = vld [vmem:[%s10790_s26 + $0x400] sm:$0xff] }
  0x89   : > { %836 = vst [vmem:[%s10795_s21 + $0x1f8] sm:$0xff] %v835_v43  ;;  %838 = vst [vmem:[%s10795_s21 + $0x200] sm:$0xff] %v837_v44  ;;  %v841_v46 = vld [vmem:[%s10790_s26 + $0x428] sm:$0xff]  ;;  %v843_v47 = vld [vmem:[%s10790_s26 + $0x430] sm:$0xff] }
  0x8a   : > { %840 = vst [vmem:[%s10795_s21 + $0x208] sm:$0xff] %v839_v45  ;;  %v845_v48 = vld [vmem:[%s10790_s26 + $0x438] sm:$0xff]  ;;  %842 = vst [vmem:[%s10795_s21 + $0x214] sm:$0xff] %v841_v46  ;;  %v847_v49 = vld [vmem:[%s10790_s26 + $0x460] sm:$0xff] }
  0x8b   : > { %844 = vst [vmem:[%s10795_s21 + $0x21c] sm:$0xff] %v843_v47  ;;  %846 = vst [vmem:[%s10795_s21 + $0x224] sm:$0xff] %v845_v48  ;;  %v849_v50 = vld [vmem:[%s10790_s26 + $0x468] sm:$0xff]  ;;  %v851_v51 = vld [vmem:[%s10790_s26 + $0x470] sm:$0xff] }
  0x8c   : > { %848 = vst [vmem:[%s10795_s21 + $0x230] sm:$0xff] %v847_v49  ;;  %850 = vst [vmem:[%s10795_s21 + $0x238] sm:$0xff] %v849_v50  ;;  %v853_v52 = vld [vmem:[%s10790_s26 + $0x498] sm:$0xff]  ;;  %v855_v53 = vld [vmem:[%s10790_s26 + $0x4a0] sm:$0xff] }
  0x8d   : > { %852 = vst [vmem:[%s10795_s21 + $0x240] sm:$0xff] %v851_v51  ;;  %v857_v54 = vld [vmem:[%s10790_s26 + $0x4a8] sm:$0xff]  ;;  %854 = vst [vmem:[%s10795_s21 + $0x24c] sm:$0xff] %v853_v52  ;;  %v859_v55 = vld [vmem:[%s10790_s26 + $0x4d0] sm:$0xff] }
  0x8e   : > { %856 = vst [vmem:[%s10795_s21 + $0x254] sm:$0xff] %v855_v53  ;;  %858 = vst [vmem:[%s10795_s21 + $0x25c] sm:$0xff] %v857_v54  ;;  %v861_v56 = vld [vmem:[%s10790_s26 + $0x4d8] sm:$0xff]  ;;  %v863_v57 = vld [vmem:[%s10790_s26 + $0x4e0] sm:$0xff] }
  0x8f   : > { %860 = vst [vmem:[%s10795_s21 + $0x268] sm:$0xff] %v859_v55  ;;  %862 = vst [vmem:[%s10795_s21 + $0x270] sm:$0xff] %v861_v56  ;;  %v865_v58 = vld [vmem:[%s10790_s26 + $0x508] sm:$0xff]  ;;  %v867_v59 = vld [vmem:[%s10790_s26 + $0x510] sm:$0xff] }
  0x90   : > { %864 = vst [vmem:[%s10795_s21 + $0x278] sm:$0xff] %v863_v57  ;;  %v869_v60 = vld [vmem:[%s10790_s26 + $0x518] sm:$0xff]  ;;  %866 = vst [vmem:[%s10795_s21 + $0x284] sm:$0xff] %v865_v58  ;;  %v8144_v62 = vld [vmem:[%s10790_s26 + $0x50] sm:$0xf] }
  0x91   : > { %868 = vst [vmem:[%s10795_s21 + $0x28c] sm:$0xff] %v867_v59  ;;  %870 = vst [vmem:[%s10795_s21 + $0x294] sm:$0xff] %v869_v60  ;;  %v8142_v61 = vld [vmem:[%s10790_s26 + $0x18] sm:$0xf]  ;;  %v8146_v63 = vld [vmem:[%s10790_s26 + $0x88] sm:$0xf] }
  0x92   : > { %8143 = vst [vmem:[%s10795_s21 + $0x18] sm:$0xf] %v8142_v61  ;;  %8145 = vst [vmem:[%s10795_s21 + $0x34] sm:$0xf] %v8144_v62  ;;  %v8148_v0 = vld [vmem:[%s10790_s26 + $0xc0] sm:$0xf] }
  0x93   : > { %8147 = vst [vmem:[%s10795_s21 + $0x50] sm:$0xf] %v8146_v63  ;;  %v8150_v1 = vld [vmem:[%s10790_s26 + $0xf8] sm:$0xf]  ;;  %v8152_v2 = vld [vmem:[%s10790_s26 + $0x130] sm:$0xf] }
  0x94   : > { %8149 = vst [vmem:[%s10795_s21 + $0x6c] sm:$0xf] %v8148_v0  ;;  %8151 = vst [vmem:[%s10795_s21 + $0x88] sm:$0xf] %v8150_v1  ;;  %v8154_v3 = vld [vmem:[%s10790_s26 + $0x168] sm:$0xf] }
  0x95   : > { %8153 = vst [vmem:[%s10795_s21 + $0xa4] sm:$0xf] %v8152_v2  ;;  %v8156_v4 = vld [vmem:[%s10790_s26 + $0x1a0] sm:$0xf]  ;;  %v8158_v5 = vld [vmem:[%s10790_s26 + $0x1d8] sm:$0xf] }
  0x96   : > { %8155 = vst [vmem:[%s10795_s21 + $0xc0] sm:$0xf] %v8154_v3  ;;  %8157 = vst [vmem:[%s10795_s21 + $0xdc] sm:$0xf] %v8156_v4  ;;  %v8160_v6 = vld [vmem:[%s10790_s26 + $0x210] sm:$0xf] }
  0x97   : > { %8159 = vst [vmem:[%s10795_s21 + $0xf8] sm:$0xf] %v8158_v5  ;;  %v8162_v7 = vld [vmem:[%s10790_s26 + $0x248] sm:$0xf]  ;;  %v8164_v8 = vld [vmem:[%s10790_s26 + $0x280] sm:$0xf] }
  0x98   : > { %8161 = vst [vmem:[%s10795_s21 + $0x114] sm:$0xf] %v8160_v6  ;;  %8163 = vst [vmem:[%s10795_s21 + $0x130] sm:$0xf] %v8162_v7  ;;  %v8166_v9 = vld [vmem:[%s10790_s26 + $0x2b8] sm:$0xf] }
  0x99   : > { %8165 = vst [vmem:[%s10795_s21 + $0x14c] sm:$0xf] %v8164_v8  ;;  %v8168_v10 = vld [vmem:[%s10790_s26 + $0x2f0] sm:$0xf]  ;;  %v8170_v11 = vld [vmem:[%s10790_s26 + $0x328] sm:$0xf] }
  0x9a   : > { %8167 = vst [vmem:[%s10795_s21 + $0x168] sm:$0xf] %v8166_v9  ;;  %8169 = vst [vmem:[%s10795_s21 + $0x184] sm:$0xf] %v8168_v10  ;;  %v8172_v12 = vld [vmem:[%s10790_s26 + $0x360] sm:$0xf] }
  0x9b   : > { %8171 = vst [vmem:[%s10795_s21 + $0x1a0] sm:$0xf] %v8170_v11  ;;  %v8174_v13 = vld [vmem:[%s10790_s26 + $0x398] sm:$0xf]  ;;  %v8176_v14 = vld [vmem:[%s10790_s26 + $0x3d0] sm:$0xf] }
  0x9c   : > { %8173 = vst [vmem:[%s10795_s21 + $0x1bc] sm:$0xf] %v8172_v12  ;;  %8175 = vst [vmem:[%s10795_s21 + $0x1d8] sm:$0xf] %v8174_v13  ;;  %v8178_v15 = vld [vmem:[%s10790_s26 + $0x408] sm:$0xf] }
  0x9d   : > { %8177 = vst [vmem:[%s10795_s21 + $0x1f4] sm:$0xf] %v8176_v14  ;;  %v8180_v16 = vld [vmem:[%s10790_s26 + $0x440] sm:$0xf]  ;;  %v8182_v17 = vld [vmem:[%s10790_s26 + $0x478] sm:$0xf] }
  0x9e   : > { %8179 = vst [vmem:[%s10795_s21 + $0x210] sm:$0xf] %v8178_v15  ;;  %8181 = vst [vmem:[%s10795_s21 + $0x22c] sm:$0xf] %v8180_v16  ;;  %v8184_v18 = vld [vmem:[%s10790_s26 + $0x4b0] sm:$0xf] }
  0x9f   : > { %8183 = vst [vmem:[%s10795_s21 + $0x248] sm:$0xf] %v8182_v17  ;;  %v8186_v19 = vld [vmem:[%s10790_s26 + $0x4e8] sm:$0xf]  ;;  %v8188_v20 = vld [vmem:[%s10790_s26 + $0x520] sm:$0xf] }
  0xa0   : > { %8185 = vst [vmem:[%s10795_s21 + $0x264] sm:$0xf] %v8184_v18  ;;  %8187 = vst [vmem:[%s10795_s21 + $0x280] sm:$0xf] %v8186_v19 }
  0xa1   : > { %8189 = vst [vmem:[%s10795_s21 + $0x29c] sm:$0xf] %v8188_v20 }
  0xa2 PF: > { %p8190_p7 = scmp.ge.s32.totalorder %s10408_s15, 1  ;;  %p939_p8 = scmp.lt.s32.totalorder %s10408_s15, 3 }
  0xa4   : > { %p940_p9 = pnand %p8190_p7, %p939_p8 }
  0xa5   : > { %s946_s27 = sand.u32 (!%p940_p9), 1, %s10400_s29   ;;  %s1019_s28 = smul.u32 (!%p940_p9), 7, %s10503_s16 }
  0xa6   : > { %943 = sbr.rel (%p940_p9) target bundleno = 2376 (0x948), region = 139  ;;  %p8191_p11 = scmp.ne.s32.totalorder (!%p940_p9), %s10503_s16, 0 }
  0xa7   : > { %s9163_s18 = smul.u32 (!%p940_p9), 168, %s946_s27  ;;  %p1020_p10 = scmp.lt.s32.totalorder (!%p940_p9), %s1019_s28, 13 }
  0xa8   : > { %s9164_s19 = smul.u32 (!%p940_p9), 672, %s946_s27 }
  0xa9   : > { %s10996_s26 = scalar_lea.vmem (!%p940_p9), [#allocation4], %s9163_s18  ;;  %s11002_s1 = scalar_lea.vmem (!%p940_p9), [#allocation7], %s9163_s18 }
  0xaa   : > { %s10998_s21 = scalar_lea.vmem (!%p940_p9), [#allocation5], %s9164_s19  ;;  %s11000_s15 = scalar_lea.vmem (!%p940_p9), [#allocation6], %s9164_s19 }
  0xab   : > { %s13681_s28 = smov (!%p1020_p10, %s1019_s28), 13  ;;  %1029 = sbr.rel (%p8191_p11) target bundleno = 1961 (0x7a9), region = 155 }
  0xb0   : > { %v9191_v21 = vld [vmem:[%s13645_s2 + $0x74] ss:$8 sps:$4 sm:$0xff]   ;;  %v9195_v23 = vld [vmem:[%s13645_s2 + $0x70] ss:$8 sps:$4 sm:$0xff]   ;;  %v9197_v25 = vld [vmem:[%s13645_s2 + $0x64] ss:$8 sps:$4 sm:$0xff]  }
  0xb1   : > { %v9193_v22 = vld [vmem:[%s13645_s2 + $0x174] ss:$8 sps:$4 sm:$0xff]   ;;  %2526 = vmatprep.subr.bf16.mxu0 %v9191_v21  ;;  %v9196_v24 = vld [vmem:[%s13645_s2 + $0x170] ss:$8 sps:$4 sm:$0xff]   ;;  %v9199_v26 = vld [vmem:[%s13645_s2 + $0x164] ss:$8 sps:$4 sm:$0xff]  }
  0xb2   : > { %2577 = vmatprep.subr.bf16.mxu1 %v9193_v22  ;;  %2527 = vmatpush1.bf16.msra.mxu0 %v9195_v23  ;;  %v9201_v27 = vld [vmem:[%s13645_s2 + $0x60] ss:$8 sps:$4 sm:$0xff]   ;;  %v9203_v29 = vld [vmem:[%s13645_s2 + $0x54] ss:$8 sps:$4 sm:$0xff]   ;;  %v9207_v31 = vld [vmem:[%s13645_s2 + $0x50] ss:$8 sps:$4 sm:$0xff]  }
  0xb3   : > { %2578 = vmatpush1.bf16.msra.mxu1 %v9196_v24  ;;  %2528 = vmatprep.subr.bf16.mxu0 %v9197_v25  ;;  %v9202_v28 = vld [vmem:[%s13645_s2 + $0x160] ss:$8 sps:$4 sm:$0xff]   ;;  %v9205_v30 = vld [vmem:[%s13645_s2 + $0x154] ss:$8 sps:$4 sm:$0xff]   ;;  %v9208_v32 = vld [vmem:[%s13645_s2 + $0x150] ss:$8 sps:$4 sm:$0xff]  }
  0xb4   : > { %2579 = vmatprep.subr.bf16.mxu1 %v9199_v26  ;;  %v9209_v33 = vld [vmem:[%s13645_s2 + $0x44] ss:$8 sps:$4 sm:$0xff]   ;;  %v9213_v35 = vld [vmem:[%s13645_s2 + $0x40] ss:$8 sps:$4 sm:$0xff]   ;;  %v9215_v37 = vld [vmem:[%s13645_s2 + $0x34] ss:$8 sps:$4 sm:$0xff]  }
  0xb5   : > { %v9211_v34 = vld [vmem:[%s13645_s2 + $0x144] ss:$8 sps:$4 sm:$0xff]   ;;  %v9214_v36 = vld [vmem:[%s13645_s2 + $0x140] ss:$8 sps:$4 sm:$0xff]   ;;  %v9217_v38 = vld [vmem:[%s13645_s2 + $0x134] ss:$8 sps:$4 sm:$0xff]  }
  0xb6   : > { %2529 = vmatpush1.bf16.msra.mxu0 %v9201_v27  ;;  %v9219_v39 = vld [vmem:[%s13645_s2 + $0x30] ss:$8 sps:$4 sm:$0xff]   ;;  %v9221_v41 = vld [vmem:[%s13645_s2 + $0x24] ss:$8 sps:$4 sm:$0xff]   ;;  %v9225_v43 = vld [vmem:[%s13645_s2 + $0x20] ss:$8 sps:$4 sm:$0xff]  }
  0xb7   : > { %2580 = vmatpush1.bf16.msra.mxu1 %v9202_v28  ;;  %2530 = vmatprep.subr.bf16.mxu0 %v9203_v29  ;;  %v9220_v40 = vld [vmem:[%s13645_s2 + $0x130] ss:$8 sps:$4 sm:$0xff]   ;;  %v9223_v42 = vld [vmem:[%s13645_s2 + $0x124] ss:$8 sps:$4 sm:$0xff]   ;;  %v9226_v44 = vld [vmem:[%s13645_s2 + $0x120] ss:$8 sps:$4 sm:$0xff]  }
  0xb8   : > { %2581 = vmatprep.subr.bf16.mxu1 %v9205_v30  ;;  %v9227_v45 = vld [vmem:[%s13645_s2 + $0x14] ss:$8 sps:$4 sm:$0xff]   ;;  %v9231_v47 = vld [vmem:[%s13645_s2 + $0x10] ss:$8 sps:$4 sm:$0xff]   ;;  %v9233_v49 = vld [vmem:[%s13645_s2 + $0x4] ss:$8 sps:$4 sm:$0xff]  }
  0xb9   : > { %v9229_v46 = vld [vmem:[%s13645_s2 + $0x114] ss:$8 sps:$4 sm:$0xff]   ;;  %v9232_v48 = vld [vmem:[%s13645_s2 + $0x110] ss:$8 sps:$4 sm:$0xff]   ;;  %v9235_v50 = vld [vmem:[%s13645_s2 + $0x104] ss:$8 sps:$4 sm:$0xff]  }
  0xba   : > { %2531 = vmatpush1.bf16.msra.mxu0 %v9207_v31  ;;  %v9237_v51 = vld [vmem:[%s13645_s2] ss:$8 sps:$4 sm:$0xff]   ;;  %v9239_v53 = vld [vmem:[%s13645_s2 + $0xf4] ss:$8 sps:$4 sm:$0xff]   ;;  %v9243_v55 = vld [vmem:[%s13645_s2 + $0xf0] ss:$8 sps:$4 sm:$0xff]  }
  0xbb   : > { %2582 = vmatpush1.bf16.msra.mxu1 %v9208_v32  ;;  %2532 = vmatprep.subr.bf16.mxu0 %v9209_v33  ;;  %v9238_v52 = vld [vmem:[%s13645_s2 + $0x100] ss:$8 sps:$4 sm:$0xff]   ;;  %v9241_v54 = vld [vmem:[%s13645_s2 + $0x1f4] ss:$8 sps:$4 sm:$0xff]   ;;  %v9244_v56 = vld [vmem:[%s13645_s2 + $0x1f0] ss:$8 sps:$4 sm:$0xff]  }
  0xbc   : > { %2583 = vmatprep.subr.bf16.mxu1 %v9211_v34  ;;  %v9245_v57 = vld [vmem:[%s13645_s2 + $0xe4] ss:$8 sps:$4 sm:$0xff]   ;;  %v9249_v59 = vld [vmem:[%s13645_s2 + $0xe0] ss:$8 sps:$4 sm:$0xff]   ;;  %v9251_v61 = vld [vmem:[%s13645_s2 + $0xd4] ss:$8 sps:$4 sm:$0xff]  }
  0xbd   : > { %v9247_v58 = vld [vmem:[%s13645_s2 + $0x1e4] ss:$8 sps:$4 sm:$0xff]   ;;  %v9250_v60 = vld [vmem:[%s13645_s2 + $0x1e0] ss:$8 sps:$4 sm:$0xff]   ;;  %v9253_v62 = vld [vmem:[%s13645_s2 + $0x1d4] ss:$8 sps:$4 sm:$0xff]  }
  0xbe   : > { %2533 = vmatpush1.bf16.msra.mxu0 %v9213_v35  ;;  %v9255_v63 = vld [vmem:[%s13645_s2 + $0xd0] ss:$8 sps:$4 sm:$0xff]   ;;  %v9257_v1 = vld [vmem:[%s13645_s2 + $0xc4] ss:$8 sps:$4 sm:$0xff]   ;;  %v9261_v3 = vld [vmem:[%s13645_s2 + $0xc0] ss:$8 sps:$4 sm:$0xff]  }
  0xbf   : > { %2584 = vmatpush1.bf16.msra.mxu1 %v9214_v36  ;;  %2534 = vmatprep.subr.bf16.mxu0 %v9215_v37  ;;  %v9256_v0 = vld [vmem:[%s13645_s2 + $0x1d0] ss:$8 sps:$4 sm:$0xff]   ;;  %v9259_v2 = vld [vmem:[%s13645_s2 + $0x1c4] ss:$8 sps:$4 sm:$0xff]   ;;  %v9262_v4 = vld [vmem:[%s13645_s2 + $0x1c0] ss:$8 sps:$4 sm:$0xff]  }
  0xc0   : > { %2585 = vmatprep.subr.bf16.mxu1 %v9217_v38  ;;  %v9263_v5 = vld [vmem:[%s13645_s2 + $0xb4] ss:$8 sps:$4 sm:$0xff]   ;;  %v9292_v8 = vld [vmem:[%s13643_s0 + $0xc] ss:$56 sps:$4 sm:$0xff]   ;;  %v9267_v9 = vld [vmem:[%s13645_s2 + $0xb0] ss:$8 sps:$4 sm:$0xff]  }
  0xc1   : > { %v9289_v6 = vld [vmem:[%s13643_s0 + $0x4] ss:$56 sps:$4 sm:$0xff]   ;;  %v9268_v10 = vld [vmem:[%s13645_s2 + $0x1b0] ss:$8 sps:$4 sm:$0xff]   ;;  %2609 = vmatprep.mubr.bf16.mxu1 %v9292_v8  ;;  %v9273_v13 = vld [vmem:[%s13645_s2 + $0xa0] ss:$8 sps:$4 sm:$0xff]  }
  0xc2   : > { %2535 = vmatpush1.bf16.msra.mxu0 %v9219_v39  ;;  %v9265_v7 = vld [vmem:[%s13645_s2 + $0x1b4] ss:$8 sps:$4 sm:$0xff]   ;;  %2558 = vmatprep.mubr.bf16.mxu0 %v9289_v6  ;;  %v9269_v11 = vld [vmem:[%s13645_s2 + $0xa4] ss:$8 sps:$4 sm:$0xff]   ;;  %v9274_v14 = vld [vmem:[%s13645_s2 + $0x1a0] ss:$8 sps:$4 sm:$0xff]  }
  0xc3   : > { %2586 = vmatpush1.bf16.msra.mxu1 %v9220_v40  ;;  %2536 = vmatprep.subr.bf16.mxu0 %v9221_v41  ;;  %v9271_v12 = vld [vmem:[%s13645_s2 + $0x1a4] ss:$8 sps:$4 sm:$0xff]   ;;  %v9275_v15 = vld [vmem:[%s13645_s2 + $0x94] ss:$8 sps:$4 sm:$0xff]   ;;  %v9279_v17 = vld [vmem:[%s13645_s2 + $0x90] ss:$8 sps:$4 sm:$0xff]  }
  0xc4   : > { %2587 = vmatprep.subr.bf16.mxu1 %v9223_v42  ;;  %v9277_v16 = vld [vmem:[%s13645_s2 + $0x194] ss:$8 sps:$4 sm:$0xff]   ;;  %v9280_v18 = vld [vmem:[%s13645_s2 + $0x190] ss:$8 sps:$4 sm:$0xff]   ;;  %v9281_v19 = vld [vmem:[%s13645_s2 + $0x84] ss:$8 sps:$4 sm:$0xff]  }
  0xc5   : > { %v9283_v20 = vld [vmem:[%s13645_s2 + $0x184] ss:$8 sps:$4 sm:$0xff]   ;;  %v9285_v21 = vld [vmem:[%s13645_s2 + $0x80] ss:$8 sps:$4 sm:$0xff]   ;;  %v9295_v23 = vld [vmem:[%s13645_s2 + $0x274] ss:$8 sps:$4 sm:$0xff]  }
  0xc6   : > { %2537 = vmatpush1.bf16.msra.mxu0 %v9225_v43  ;;  %v9286_v22 = vld [vmem:[%s13645_s2 + $0x180] ss:$8 sps:$4 sm:$0xff]   ;;  %v9298_v24 = vld [vmem:[%s13645_s2 + $0x374] ss:$8 sps:$4 sm:$0xff]   ;;  %v9293_v27 = vld [vmem:[%s13645_s2 + $0x270] ss:$8 sps:$4 sm:$0xff]  }
  0xc7   : > { %2588 = vmatpush1.bf16.msra.mxu1 %v9226_v44  ;;  %2538 = vmatprep.subr.bf16.mxu0 %v9227_v45  ;;  %v9287_v25 = vld [vmem:[%s13643_s0] ss:$56 sps:$4 sm:$0xff]   ;;  %v9301_v29 = vld [vmem:[%s13645_s2 + $0x264] ss:$8 sps:$4 sm:$0xff]   ;;  %v9307_v33 = vld [vmem:[%s13645_s2 + $0x254] ss:$8 sps:$4 sm:$0xff]  }
  0xc8   : > { %2589 = vmatprep.subr.bf16.mxu1 %v9229_v46  ;;  %v9290_v26 = vld [vmem:[%s13643_s0 + $0x8] ss:$56 sps:$4 sm:$0xff]   ;;  %v9296_v28 = vld [vmem:[%s13645_s2 + $0x370] ss:$8 sps:$4 sm:$0xff]   ;;  %v9304_v30 = vld [vmem:[%s13645_s2 + $0x364] ss:$8 sps:$4 sm:$0xff]  }
  0xc9   : > { %v9299_v31 = vld [vmem:[%s13645_s2 + $0x260] ss:$8 sps:$4 sm:$0xff]   ;;  %v9310_v34 = vld [vmem:[%s13645_s2 + $0x354] ss:$8 sps:$4 sm:$0xff]   ;;  %v9305_v35 = vld [vmem:[%s13645_s2 + $0x250] ss:$8 sps:$4 sm:$0xff]  }
  0xca   : > { %2539 = vmatpush1.bf16.msra.mxu0 %v9231_v47  ;;  %v9302_v32 = vld [vmem:[%s13645_s2 + $0x360] ss:$8 sps:$4 sm:$0xff]   ;;  %v9308_v36 = vld [vmem:[%s13645_s2 + $0x350] ss:$8 sps:$4 sm:$0xff]   ;;  %v9313_v37 = vld [vmem:[%s13645_s2 + $0x244] ss:$8 sps:$4 sm:$0xff]  }
  0xcb   : > { %2590 = vmatpush1.bf16.msra.mxu1 %v9232_v48  ;;  %2540 = vmatprep.subr.bf16.mxu0 %v9233_v49  ;;  %v9316_v38 = vld [vmem:[%s13645_s2 + $0x344] ss:$8 sps:$4 sm:$0xff]   ;;  %v9311_v39 = vld [vmem:[%s13645_s2 + $0x240] ss:$8 sps:$4 sm:$0xff]   ;;  %v9319_v41 = vld [vmem:[%s13645_s2 + $0x234] ss:$8 sps:$4 sm:$0xff]  }
  0xcc   : > { %2591 = vmatprep.subr.bf16.mxu1 %v9235_v50  ;;  %v9314_v40 = vld [vmem:[%s13645_s2 + $0x340] ss:$8 sps:$4 sm:$0xff]   ;;  %v9322_v42 = vld [vmem:[%s13645_s2 + $0x334] ss:$8 sps:$4 sm:$0xff]   ;;  %v9317_v43 = vld [vmem:[%s13645_s2 + $0x230] ss:$8 sps:$4 sm:$0xff]  }
  0xcd   : > { %v9320_v44 = vld [vmem:[%s13645_s2 + $0x330] ss:$8 sps:$4 sm:$0xff]   ;;  %v9325_v47 = vld [vmem:[%s13645_s2 + $0x224] ss:$8 sps:$4 sm:$0xff]   ;;  %v9350_v8 = vld [vmem:[%s13645_s2 + $0x3e0] ss:$8 sps:$4 sm:$0xff]  }
  0xce   : > { %2541 = vmatpush1.bf16.msra.mxu0 %v9237_v51  ;;  %v1044_v45 = vld [vmem:[%s13643_s0 + $0x70] sm:$0x11]  ;;  %v1045_v46 = vld [vmem:[%s13643_s0 + $0x78] sm:$0x11]  ;;  %v9328_v48 = vld [vmem:[%s13645_s2 + $0x324] ss:$8 sps:$4 sm:$0xff]  }
  0xcf   : > { %2592 = vmatpush1.bf16.msra.mxu1 %v9238_v52  ;;  %2542 = vmatprep.subr.bf16.mxu0 %v9239_v53  ;;  %v11281_v49 = vcombine.high %v1044_v45, %v1044_v45  ;;  %v11283_v50 = vcombine.high %v1045_v46, %v1045_v46  ;;  %v11285_v51 = vcombine.low %v1044_v45, %v1044_v45  ;;  %v9323_v53 = vld [vmem:[%s13645_s2 + $0x220] ss:$8 sps:$4 sm:$0xff]   ;;  %v9352_v6 = vld [vmem:[%s13645_s2 + $0x3e4] ss:$8 sps:$4 sm:$0xff]   ;;  %vm2909_vm0 = vcmask 1043456  }
  0xd0   : > { %2593 = vmatprep.subr.bf16.mxu1 %v9241_v54  ;;  %v11287_v52 = vcombine.low %v1045_v46, %v1045_v46  ;;  %v9326_v54 = vld [vmem:[%s13645_s2 + $0x320] ss:$8 sps:$4 sm:$0xff]   ;;  %vm2910_vm1 = vcmask 523268   ;;  %vm2914_vm3 = vcmask 1040384   ;;  %vm2915_vm4 = vcmask 520196  }
  0xd1   : > { %v9405_v45 = vld [vmem:[%s13645_s2 + $0x460] ss:$8 sps:$4 sm:$0xff]   ;;  %vm12588_vm2 = vmor %vm2910_vm1, %vm2909_vm0  ;;  %vm4677_vm6 = vcmask 146432   ;;  %vm4889_vm7 = vcmask 523264  }
  0xd2   : > { %2543 = vmatpush2.bf16.msra.mxu0 %v9243_v55  ;;  %v9331_v55 = vld [vmem:[%s13645_s2 + $0x214] ss:$8 sps:$4 sm:$0xff]   ;;  %v9408_v46 = vld [vmem:[%s13645_s2 + $0x560] ss:$8 sps:$4 sm:$0xff]   ;;  %vm12601_vm5 = vmor %vm2915_vm4, %vm2914_vm3 }
  0xd3   : > { %2594 = vmatpush2.bf16.msra.mxu1 %v9244_v56  ;;  %2544 = vmatprep.subr.bf16.mxu0 %v9245_v57  ;;  %v9334_v56 = vld [vmem:[%s13645_s2 + $0x314] ss:$8 sps:$4 sm:$0xff]   ;;  %v9329_v57 = vld [vmem:[%s13645_s2 + $0x210] ss:$8 sps:$4 sm:$0xff]  }
  0xd4   : > { %2595 = vmatprep.subr.bf16.mxu1 %v9247_v58  ;;  %v9332_v58 = vld [vmem:[%s13645_s2 + $0x310] ss:$8 sps:$4 sm:$0xff]  }
  0xd6   : > { %2545 = vmatpush2.bf16.msra.mxu0 %v9249_v59  ;;  %v9337_v59 = vld [vmem:[%s13645_s2 + $0x204] ss:$8 sps:$4 sm:$0xff]  }
  0xd7   : > { %2596 = vmatpush2.bf16.msra.mxu1 %v9250_v60  ;;  %2546 = vmatprep.subr.bf16.mxu0 %v9251_v61  ;;  %v9340_v60 = vld [vmem:[%s13645_s2 + $0x304] ss:$8 sps:$4 sm:$0xff]  }
  0xd8   : > { %2597 = vmatprep.subr.bf16.mxu1 %v9253_v62  ;;  %v9395_v61 = vld [vmem:[%s13643_s0 + $0x14] ss:$56 sps:$4 sm:$0xff]  }
  0xd9   : > { %v9398_v62 = vld [vmem:[%s13643_s0 + $0x1c] ss:$56 sps:$4 sm:$0xff]  }
  0xda   : > { %2547 = vmatpush2.bf16.msra.mxu0 %v9255_v63  ;;  %v9335_v63 = vld [vmem:[%s13645_s2 + $0x200] ss:$8 sps:$4 sm:$0xff]  }
  0xdb   : > { %2598 = vmatpush2.bf16.msra.mxu1 %v9256_v0  ;;  %2548 = vmatprep.subr.bf16.mxu0 %v9257_v1  ;;  %v9338_v0 = vld [vmem:[%s13645_s2 + $0x300] ss:$8 sps:$4 sm:$0xff]   ;;  %v9343_v1 = vld [vmem:[%s13645_s2 + $0x2f4] ss:$8 sps:$4 sm:$0xff]  }
  0xdc   : > { %2599 = vmatprep.subr.bf16.mxu1 %v9259_v2  ;;  %v9346_v2 = vld [vmem:[%s13645_s2 + $0x3f4] ss:$8 sps:$4 sm:$0xff]  }
  0xde   : > { %2549 = vmatpush2.bf16.msra.mxu0 %v9261_v3  ;;  %v9341_v3 = vld [vmem:[%s13645_s2 + $0x2f0] ss:$8 sps:$4 sm:$0xff]  }
  0xdf   : > { %2600 = vmatpush2.bf16.msra.mxu1 %v9262_v4  ;;  %2550 = vmatprep.subr.bf16.mxu0 %v9263_v5  ;;  %v9344_v4 = vld [vmem:[%s13645_s2 + $0x3f0] ss:$8 sps:$4 sm:$0xff]   ;;  %v9349_v5 = vld [vmem:[%s13645_s2 + $0x2e4] ss:$8 sps:$4 sm:$0xff]  }
  0xe0   : > { %2601 = vmatprep.subr.bf16.mxu1 %v9265_v7  ;;  %v9347_v7 = vld [vmem:[%s13645_s2 + $0x2e0] ss:$8 sps:$4 sm:$0xff]  }
  0xe2   : > { %2551 = vmatpush2.bf16.msra.mxu0 %v9267_v9  ;;  %v9355_v9 = vld [vmem:[%s13645_s2 + $0x2d4] ss:$8 sps:$4 sm:$0xff]  }
  0xe3   : > { %2602 = vmatpush2.bf16.msra.mxu1 %v9268_v10  ;;  %2552 = vmatprep.subr.bf16.mxu0 %v9269_v11  ;;  %v9358_v10 = vld [vmem:[%s13645_s2 + $0x3d4] ss:$8 sps:$4 sm:$0xff]   ;;  %v9353_v11 = vld [vmem:[%s13645_s2 + $0x2d0] ss:$8 sps:$4 sm:$0xff]  }
  0xe4   : > { %2603 = vmatprep.subr.bf16.mxu1 %v9271_v12  ;;  %v9356_v12 = vld [vmem:[%s13645_s2 + $0x3d0] ss:$8 sps:$4 sm:$0xff]  }
  0xe6   : > { %2553 = vmatpush2.bf16.msra.mxu0 %v9273_v13  ;;  %v9361_v13 = vld [vmem:[%s13645_s2 + $0x2c4] ss:$8 sps:$4 sm:$0xff]  }
  0xe7   : > { %2604 = vmatpush2.bf16.msra.mxu1 %v9274_v14  ;;  %2554 = vmatprep.subr.bf16.mxu0 %v9275_v15  ;;  %v9364_v14 = vld [vmem:[%s13645_s2 + $0x3c4] ss:$8 sps:$4 sm:$0xff]   ;;  %v9359_v15 = vld [vmem:[%s13645_s2 + $0x2c0] ss:$8 sps:$4 sm:$0xff]  }
  0xe8   : > { %2605 = vmatprep.subr.bf16.mxu1 %v9277_v16  ;;  %v9362_v16 = vld [vmem:[%s13645_s2 + $0x3c0] ss:$8 sps:$4 sm:$0xff]  }
  0xea   : > { %2555 = vmatpush2.bf16.msra.mxu0 %v9279_v17  ;;  %v9367_v17 = vld [vmem:[%s13645_s2 + $0x2b4] ss:$8 sps:$4 sm:$0xff]  }
  0xeb   : > { %2606 = vmatpush2.bf16.msra.mxu1 %v9280_v18  ;;  %2556 = vmatprep.subr.bf16.mxu0 %v9281_v19  ;;  %v9370_v18 = vld [vmem:[%s13645_s2 + $0x3b4] ss:$8 sps:$4 sm:$0xff]   ;;  %v9365_v19 = vld [vmem:[%s13645_s2 + $0x2b0] ss:$8 sps:$4 sm:$0xff]  }
  0xec   : > { %2607 = vmatprep.subr.bf16.mxu1 %v9283_v20  ;;  %v9368_v20 = vld [vmem:[%s13645_s2 + $0x3b0] ss:$8 sps:$4 sm:$0xff]  }
  0xee   : > { %2557 = vmatpush2.bf16.msra.mxu0 %v9285_v21  ;;  %v9376_v21 = vld [vmem:[%s13645_s2 + $0x2a4] ss:$8 sps:$4 sm:$0xff]  }
  0xef   : > { %2608 = vmatpush2.bf16.msra.mxu1 %v9286_v22  ;;  %2628 = vmatprep.subr.bf16.mxu0 %v9295_v23  ;;  %v9379_v22 = vld [vmem:[%s13645_s2 + $0x3a4] ss:$8 sps:$4 sm:$0xff]   ;;  %v9374_v23 = vld [vmem:[%s13645_s2 + $0x2a0] ss:$8 sps:$4 sm:$0xff]  }
  0xf0   : > { %2679 = vmatprep.subr.bf16.mxu1 %v9298_v24  ;;  %v9377_v24 = vld [vmem:[%s13645_s2 + $0x3a0] ss:$8 sps:$4 sm:$0xff]  }
  0xf1   : > { %2559 = vmatmul.mubr.bf16.vlgmr.msra.gmra.mxu0 %v9287_v25  ;;  %v9383_v25 = vld [vmem:[%s13645_s2 + $0x294] ss:$8 sps:$4 sm:$0xff]  }
  0xf2   : > { %2610 = vmatmul.mubr.bf16.vlgmr.msra.gmra.mxu1 %v9290_v26  ;;  %2629 = vmatpush1.bf16.msra.mxu0 %v9293_v27  ;;  %v9386_v26 = vld [vmem:[%s13645_s2 + $0x394] ss:$8 sps:$4 sm:$0xff]   ;;  %v9381_v27 = vld [vmem:[%s13645_s2 + $0x290] ss:$8 sps:$4 sm:$0xff]  }
  0xf3   : > { %2680 = vmatpush1.bf16.msra.mxu1 %v9296_v28  ;;  %2630 = vmatprep.subr.bf16.mxu0 %v9301_v29  ;;  %v9384_v28 = vld [vmem:[%s13645_s2 + $0x390] ss:$8 sps:$4 sm:$0xff]   ;;  %v9389_v29 = vld [vmem:[%s13645_s2 + $0x284] ss:$8 sps:$4 sm:$0xff]  }
  0xf4   : > { %2681 = vmatprep.subr.bf16.mxu1 %v9304_v30  ;;  %2568 = vmatprep.mubr.bf16.mxu0 %v11281_v49  ;;  %v9392_v30 = vld [vmem:[%s13645_s2 + $0x384] ss:$8 sps:$4 sm:$0xff]  }
  0xf5   : > { %2619 = vmatprep.mubr.bf16.mxu1 %v11283_v50 }
  0xf6   : > { %2631 = vmatpush1.bf16.msra.mxu0 %v9299_v31  ;;  %v9387_v31 = vld [vmem:[%s13645_s2 + $0x280] ss:$8 sps:$4 sm:$0xff]  }
  0xf7   : > { %2682 = vmatpush1.bf16.msra.mxu1 %v9302_v32  ;;  %2632 = vmatprep.subr.bf16.mxu0 %v9307_v33  ;;  %v9390_v32 = vld [vmem:[%s13645_s2 + $0x380] ss:$8 sps:$4 sm:$0xff]   ;;  %v9401_v33 = vld [vmem:[%s13645_s2 + $0x474] ss:$8 sps:$4 sm:$0xff]  }
  0xf8   : > { %2683 = vmatprep.subr.bf16.mxu1 %v9310_v34  ;;  %v9393_v34 = vld [vmem:[%s13643_s0 + $0x10] ss:$56 sps:$4 sm:$0xff]  }
  0xf9   : > { %2569 = vmatmul.mubr.bf16.gmra.mxu0 %v11285_v51 }
  0xfa   : > { %2633 = vmatpush1.bf16.msra.mxu0 %v9305_v35  ;;  %2620 = vmatmul.mubr.bf16.gmra.mxu1 %v11287_v52  ;;  %v9396_v35 = vld [vmem:[%s13643_s0 + $0x18] ss:$56 sps:$4 sm:$0xff]  }
  0xfb   : > { %2684 = vmatpush1.bf16.msra.mxu1 %v9308_v36  ;;  %2634 = vmatprep.subr.bf16.mxu0 %v9313_v37  ;;  %v9404_v36 = vld [vmem:[%s13645_s2 + $0x574] ss:$8 sps:$4 sm:$0xff]   ;;  %v9399_v37 = vld [vmem:[%s13645_s2 + $0x470] ss:$8 sps:$4 sm:$0xff]  }
  0xfc   : > { %2685 = vmatprep.subr.bf16.mxu1 %v9316_v38  ;;  %2660 = vmatprep.mubr.bf16.mxu0 %v9395_v61  ;;  %v9402_v38 = vld [vmem:[%s13645_s2 + $0x570] ss:$8 sps:$4 sm:$0xff]   ;;  %v9421_v61 = vld [vmem:[%s13645_s2 + $0x440] ss:$8 sps:$4 sm:$0xff]  }
  0xfd   : > { %2711 = vmatprep.mubr.bf16.mxu1 %v9398_v62  ;;  %v9424_v62 = vld [vmem:[%s13645_s2 + $0x540] ss:$8 sps:$4 sm:$0xff]  }
  0xfe   : > { %2635 = vmatpush1.bf16.msra.mxu0 %v9311_v39  ;;  %v1046_v39 = vld [vmem:[%s13643_s0 + $0x80] sm:$0x11] }
  0xff   : > { %2686 = vmatpush1.bf16.msra.mxu1 %v9314_v40  ;;  %2636 = vmatprep.subr.bf16.mxu0 %v9319_v41  ;;  %v1047_v40 = vld [vmem:[%s13643_s0 + $0x88] sm:$0x11] }
 0x100   : > { %2687 = vmatprep.subr.bf16.mxu1 %v9322_v42  ;;  %v9407_v41 = vld [vmem:[%s13645_s2 + $0x464] ss:$8 sps:$4 sm:$0xff]  }
 0x101   : > { %v9410_v42 = vld [vmem:[%s13645_s2 + $0x564] ss:$8 sps:$4 sm:$0xff]  }
 0x102   : > { %2637 = vmatpush1.bf16.msra.mxu0 %v9317_v43  ;;  %v11455_v43 = vcombine.high %v1046_v39, %v1046_v39 }
 0x103   : > { %2688 = vmatpush1.bf16.msra.mxu1 %v9320_v44  ;;  %2638 = vmatprep.subr.bf16.mxu0 %v9325_v47  ;;  %v11457_v44 = vcombine.high %v1047_v40, %v1047_v40  ;;  %v9415_v47 = vld [vmem:[%s13645_s2 + $0x454] ss:$8 sps:$4 sm:$0xff]  }
 0x104   : > { %2689 = vmatprep.subr.bf16.mxu1 %v9328_v48  ;;  %v9418_v48 = vld [vmem:[%s13645_s2 + $0x554] ss:$8 sps:$4 sm:$0xff]  }
 0x106   : > { %2639 = vmatpush1.bf16.msra.mxu0 %v9323_v53  ;;  %v11473_v53 = vcombine.low %v1046_v39, %v1046_v39  ;;  %v9489_v39 = vld [vmem:[%s13645_s2 + $0x494] ss:$8 sps:$4 sm:$0xff]  }
 0x107   : > { %2690 = vmatpush1.bf16.msra.mxu1 %v9326_v54  ;;  %2640 = vmatprep.subr.bf16.mxu0 %v9331_v55  ;;  %v9413_v54 = vld [vmem:[%s13645_s2 + $0x450] ss:$8 sps:$4 sm:$0xff]  }
 0x108   : > { %2691 = vmatprep.subr.bf16.mxu1 %v9334_v56  ;;  %v9416_v55 = vld [vmem:[%s13645_s2 + $0x550] ss:$8 sps:$4 sm:$0xff]   ;;  %v11481_v56 = vcombine.low %v1047_v40, %v1047_v40  ;;  %v9492_v40 = vld [vmem:[%s13645_s2 + $0x594] ss:$8 sps:$4 sm:$0xff]  }
 0x10a   : > { %2641 = vmatpush1.bf16.msra.mxu0 %v9329_v57  ;;  %v9423_v57 = vld [vmem:[%s13645_s2 + $0x444] ss:$8 sps:$4 sm:$0xff]  }
 0x10b   : > { %2692 = vmatpush1.bf16.msra.mxu1 %v9332_v58  ;;  %2642 = vmatprep.subr.bf16.mxu0 %v9337_v59  ;;  %v9426_v58 = vld [vmem:[%s13645_s2 + $0x544] ss:$8 sps:$4 sm:$0xff]  }
 0x10c   : > { %2693 = vmatprep.subr.bf16.mxu1 %v9340_v60  ;;  %v9501_v59 = vld [vmem:[%s13643_s0 + $0x24] ss:$56 sps:$4 sm:$0xff]  }
 0x10d   : > { %v9504_v60 = vld [vmem:[%s13643_s0 + $0x2c] ss:$56 sps:$4 sm:$0xff]  }
 0x10e   : > { %2643 = vmatpush1.bf16.msra.mxu0 %v9335_v63  ;;  %v9429_v63 = vld [vmem:[%s13645_s2 + $0x434] ss:$8 sps:$4 sm:$0xff]  }
 0x10f   : > { %2694 = vmatpush1.bf16.msra.mxu1 %v9338_v0  ;;  %2644 = vmatprep.subr.bf16.mxu0 %v9343_v1  ;;  %v9432_v0 = vld [vmem:[%s13645_s2 + $0x534] ss:$8 sps:$4 sm:$0xff]   ;;  %v9427_v1 = vld [vmem:[%s13645_s2 + $0x430] ss:$8 sps:$4 sm:$0xff]  }
 0x110   : > { %2695 = vmatprep.subr.bf16.mxu1 %v9346_v2  ;;  %v9430_v2 = vld [vmem:[%s13645_s2 + $0x530] ss:$8 sps:$4 sm:$0xff]  }
 0x112   : > { %2645 = vmatpush2.bf16.msra.mxu0 %v9341_v3  ;;  %v9435_v3 = vld [vmem:[%s13645_s2 + $0x424] ss:$8 sps:$4 sm:$0xff]  }
 0x113   : > { %2696 = vmatpush2.bf16.msra.mxu1 %v9344_v4  ;;  %2646 = vmatprep.subr.bf16.mxu0 %v9349_v5  ;;  %v9438_v4 = vld [vmem:[%s13645_s2 + $0x524] ss:$8 sps:$4 sm:$0xff]   ;;  %v9433_v5 = vld [vmem:[%s13645_s2 + $0x420] ss:$8 sps:$4 sm:$0xff]  }
 0x114   : > { %2697 = vmatprep.subr.bf16.mxu1 %v9352_v6  ;;  %v9436_v6 = vld [vmem:[%s13645_s2 + $0x520] ss:$8 sps:$4 sm:$0xff]  }
 0x116   : > { %2647 = vmatpush2.bf16.msra.mxu0 %v9347_v7  ;;  %v9441_v7 = vld [vmem:[%s13645_s2 + $0x414] ss:$8 sps:$4 sm:$0xff]  }
 0x117   : > { %2698 = vmatpush2.bf16.msra.mxu1 %v9350_v8  ;;  %2648 = vmatprep.subr.bf16.mxu0 %v9355_v9  ;;  %v9444_v8 = vld [vmem:[%s13645_s2 + $0x514] ss:$8 sps:$4 sm:$0xff]   ;;  %v9439_v9 = vld [vmem:[%s13645_s2 + $0x410] ss:$8 sps:$4 sm:$0xff]  }
 0x118   : > { %2699 = vmatprep.subr.bf16.mxu1 %v9358_v10  ;;  %v9442_v10 = vld [vmem:[%s13645_s2 + $0x510] ss:$8 sps:$4 sm:$0xff]  }
 0x11a   : > { %2649 = vmatpush2.bf16.msra.mxu0 %v9353_v11  ;;  %v9447_v11 = vld [vmem:[%s13645_s2 + $0x404] ss:$8 sps:$4 sm:$0xff]  }
 0x11b   : > { %2700 = vmatpush2.bf16.msra.mxu1 %v9356_v12  ;;  %2650 = vmatprep.subr.bf16.mxu0 %v9361_v13  ;;  %v9450_v12 = vld [vmem:[%s13645_s2 + $0x504] ss:$8 sps:$4 sm:$0xff]   ;;  %v9445_v13 = vld [vmem:[%s13645_s2 + $0x400] ss:$8 sps:$4 sm:$0xff]  }
 0x11c   : > { %2701 = vmatprep.subr.bf16.mxu1 %v9364_v14  ;;  %v9448_v14 = vld [vmem:[%s13645_s2 + $0x500] ss:$8 sps:$4 sm:$0xff]  }
 0x11e   : > { %2651 = vmatpush2.bf16.msra.mxu0 %v9359_v15  ;;  %v9453_v15 = vld [vmem:[%s13645_s2 + $0x4f4] ss:$8 sps:$4 sm:$0xff]  }
 0x11f   : > { %2702 = vmatpush2.bf16.msra.mxu1 %v9362_v16  ;;  %2652 = vmatprep.subr.bf16.mxu0 %v9367_v17  ;;  %v9456_v16 = vld [vmem:[%s13645_s2 + $0x5f4] ss:$8 sps:$4 sm:$0xff]   ;;  %v9451_v17 = vld [vmem:[%s13645_s2 + $0x4f0] ss:$8 sps:$4 sm:$0xff]  }
 0x120   : > { %2703 = vmatprep.subr.bf16.mxu1 %v9370_v18  ;;  %v9454_v18 = vld [vmem:[%s13645_s2 + $0x5f0] ss:$8 sps:$4 sm:$0xff]  }
 0x122   : > { %2653 = vmatpush2.bf16.msra.mxu0 %v9365_v19  ;;  %v9459_v19 = vld [vmem:[%s13645_s2 + $0x4e4] ss:$8 sps:$4 sm:$0xff]  }
 0x123   : > { %2704 = vmatpush2.bf16.msra.mxu1 %v9368_v20  ;;  %2654 = vmatprep.subr.bf16.mxu0 %v9376_v21  ;;  %v9462_v20 = vld [vmem:[%s13645_s2 + $0x5e4] ss:$8 sps:$4 sm:$0xff]   ;;  %v9457_v21 = vld [vmem:[%s13645_s2 + $0x4e0] ss:$8 sps:$4 sm:$0xff]  }
 0x124   : > { %2705 = vmatprep.subr.bf16.mxu1 %v9379_v22  ;;  %v9460_v22 = vld [vmem:[%s13645_s2 + $0x5e0] ss:$8 sps:$4 sm:$0xff]  }
 0x126   : > { %2655 = vmatpush2.bf16.msra.mxu0 %v9374_v23  ;;  %v9465_v23 = vld [vmem:[%s13645_s2 + $0x4d4] ss:$8 sps:$4 sm:$0xff]  }
 0x127   : > { %2706 = vmatpush2.bf16.msra.mxu1 %v9377_v24  ;;  %2656 = vmatprep.subr.bf16.mxu0 %v9383_v25  ;;  %v9468_v24 = vld [vmem:[%s13645_s2 + $0x5d4] ss:$8 sps:$4 sm:$0xff]   ;;  %v9463_v25 = vld [vmem:[%s13645_s2 + $0x4d0] ss:$8 sps:$4 sm:$0xff]  }
 0x128   : > { %2707 = vmatprep.subr.bf16.mxu1 %v9386_v26  ;;  %v9466_v26 = vld [vmem:[%s13645_s2 + $0x5d0] ss:$8 sps:$4 sm:$0xff]  }
 0x12a   : > { %2657 = vmatpush2.bf16.msra.mxu0 %v9381_v27  ;;  %v9471_v27 = vld [vmem:[%s13645_s2 + $0x4c4] ss:$8 sps:$4 sm:$0xff]  }
 0x12b   : > { %2708 = vmatpush2.bf16.msra.mxu1 %v9384_v28  ;;  %2658 = vmatprep.subr.bf16.mxu0 %v9389_v29  ;;  %v9474_v28 = vld [vmem:[%s13645_s2 + $0x5c4] ss:$8 sps:$4 sm:$0xff]   ;;  %v9469_v29 = vld [vmem:[%s13645_s2 + $0x4c0] ss:$8 sps:$4 sm:$0xff]  }
 0x12c   : > { %2709 = vmatprep.subr.bf16.mxu1 %v9392_v30  ;;  %v9472_v30 = vld [vmem:[%s13645_s2 + $0x5c0] ss:$8 sps:$4 sm:$0xff]  }
 0x12e   : > { %2659 = vmatpush2.bf16.msra.mxu0 %v9387_v31  ;;  %v9477_v31 = vld [vmem:[%s13645_s2 + $0x4b4] ss:$8 sps:$4 sm:$0xff]  }
 0x12f   : > { %2710 = vmatpush2.bf16.msra.mxu1 %v9390_v32  ;;  %2730 = vmatprep.subr.bf16.mxu0 %v9401_v33  ;;  %v9480_v32 = vld [vmem:[%s13645_s2 + $0x5b4] ss:$8 sps:$4 sm:$0xff]   ;;  %v9475_v33 = vld [vmem:[%s13645_s2 + $0x4b0] ss:$8 sps:$4 sm:$0xff]  }
 0x130   : > { %2781 = vmatprep.subr.bf16.mxu1 %v9404_v36  ;;  %v9486_v36 = vld [vmem:[%s13645_s2 + $0x5a4] ss:$8 sps:$4 sm:$0xff]  }
 0x131   : > { %2661 = vmatmul.mubr.bf16.vlgmr.msra.gmra.mxu0 %v9393_v34  ;;  %v9478_v34 = vld [vmem:[%s13645_s2 + $0x5b0] ss:$8 sps:$4 sm:$0xff]  }
 0x132   : > { %2712 = vmatmul.mubr.bf16.vlgmr.msra.gmra.mxu1 %v9396_v35  ;;  %2731 = vmatpush1.bf16.msra.mxu0 %v9399_v37  ;;  %v9483_v35 = vld [vmem:[%s13645_s2 + $0x4a4] ss:$8 sps:$4 sm:$0xff]   ;;  %v9481_v37 = vld [vmem:[%s13645_s2 + $0x4a0] ss:$8 sps:$4 sm:$0xff]  }
 0x133   : > { %2782 = vmatpush1.bf16.msra.mxu1 %v9402_v38  ;;  %2732 = vmatprep.subr.bf16.mxu0 %v9407_v41  ;;  %v9484_v38 = vld [vmem:[%s13645_s2 + $0x5a0] ss:$8 sps:$4 sm:$0xff]   ;;  %v9487_v41 = vld [vmem:[%s13645_s2 + $0x490] ss:$8 sps:$4 sm:$0xff]  }
 0x134   : > { %2783 = vmatprep.subr.bf16.mxu1 %v9410_v42  ;;  %2670 = vmatprep.mubr.bf16.mxu0 %v11455_v43  ;;  %v9490_v42 = vld [vmem:[%s13645_s2 + $0x590] ss:$8 sps:$4 sm:$0xff]  }
 0x135   : > { %2721 = vmatprep.mubr.bf16.mxu1 %v11457_v44 }
 0x136   : > { %2733 = vmatpush1.bf16.msra.mxu0 %v9405_v45  ;;  %v9495_v45 = vld [vmem:[%s13645_s2 + $0x484] ss:$8 sps:$4 sm:$0xff]  }
 0x137   : > { %2784 = vmatpush1.bf16.msra.mxu1 %v9408_v46  ;;  %2734 = vmatprep.subr.bf16.mxu0 %v9415_v47  ;;  %v9498_v46 = vld [vmem:[%s13645_s2 + $0x584] ss:$8 sps:$4 sm:$0xff]   ;;  %v9493_v47 = vld [vmem:[%s13645_s2 + $0x480] ss:$8 sps:$4 sm:$0xff]  }
 0x138   : > { %2785 = vmatprep.subr.bf16.mxu1 %v9418_v48  ;;  %v9496_v48 = vld [vmem:[%s13645_s2 + $0x580] ss:$8 sps:$4 sm:$0xff]  }
 0x139   : > { %2671 = vmatmul.mubr.bf16.gmra.mxu0 %v11473_v53 }
 0x13a   : > { %2722 = vmatmul.mubr.bf16.gmra.mxu1 %v11481_v56  ;;  %2735 = vmatpush1.bf16.msra.mxu0 %v9413_v54  ;;  %v9507_v54 = vld [vmem:[%s13645_s2 + $0x674] ss:$8 sps:$4 sm:$0xff]  }
 0x13b   : > { %2786 = vmatpush1.bf16.msra.mxu1 %v9416_v55  ;;  %2736 = vmatprep.subr.bf16.mxu0 %v9423_v57  ;;  %v9499_v55 = vld [vmem:[%s13643_s0 + $0x20] ss:$56 sps:$4 sm:$0xff]  }
 0x13c   : > { %2787 = vmatprep.subr.bf16.mxu1 %v9426_v58  ;;  %2762 = vmatprep.mubr.bf16.mxu0 %v9501_v59  ;;  %v9502_v57 = vld [vmem:[%s13643_s0 + $0x28] ss:$56 sps:$4 sm:$0xff]   ;;  %v9510_v58 = vld [vmem:[%s13647_s4 + $0x74] ss:$8 sps:$4 sm:$0xff]   ;;  %v9505_v59 = vld [vmem:[%s13645_s2 + $0x670] ss:$8 sps:$4 sm:$0xff]  }
 0x13d   : > { %2813 = vmatprep.mubr.bf16.mxu1 %v9504_v60  ;;  %v9508_v60 = vld [vmem:[%s13647_s4 + $0x70] ss:$8 sps:$4 sm:$0xff]  }
 0x13e   : > { %2737 = vmatpush1.bf16.msra.mxu0 %v9421_v61  ;;  %v1048_v61 = vld [vmem:[%s13643_s0 + $0x90] sm:$0x11] }
 0x13f   : > { %2788 = vmatpush1.bf16.msra.mxu1 %v9424_v62  ;;  %2738 = vmatprep.subr.bf16.mxu0 %v9429_v63  ;;  %v1049_v62 = vld [vmem:[%s13643_s0 + $0x98] sm:$0x11]  ;;  %v9513_v63 = vld [vmem:[%s13645_s2 + $0x664] ss:$8 sps:$4 sm:$0xff]  }
 0x140   : > { %2789 = vmatprep.subr.bf16.mxu1 %v9432_v0  ;;  %v9516_v0 = vld [vmem:[%s13647_s4 + $0x64] ss:$8 sps:$4 sm:$0xff]  }
 0x142   : > { %2739 = vmatpush1.bf16.msra.mxu0 %v9427_v1  ;;  %v11677_v1 = vcombine.high %v1048_v61, %v1048_v61 }
 0x143   : > { %2790 = vmatpush1.bf16.msra.mxu1 %v9430_v2  ;;  %2740 = vmatprep.subr.bf16.mxu0 %v9435_v3  ;;  %v11679_v2 = vcombine.high %v1049_v62, %v1049_v62  ;;  %v9511_v3 = vld [vmem:[%s13645_s2 + $0x660] ss:$8 sps:$4 sm:$0xff]  }
 0x144   : > { %2791 = vmatprep.subr.bf16.mxu1 %v9438_v4  ;;  %v9514_v4 = vld [vmem:[%s13647_s4 + $0x60] ss:$8 sps:$4 sm:$0xff]  }
 0x146   : > { %2741 = vmatpush1.bf16.msra.mxu0 %v9433_v5  ;;  %v9521_v5 = vld [vmem:[%s13645_s2 + $0x654] ss:$8 sps:$4 sm:$0xff]  }
 0x147   : > { %2792 = vmatpush1.bf16.msra.mxu1 %v9436_v6  ;;  %2742 = vmatprep.subr.bf16.mxu0 %v9441_v7  ;;  %v9524_v6 = vld [vmem:[%s13647_s4 + $0x54] ss:$8 sps:$4 sm:$0xff]   ;;  %v11695_v7 = vcombine.low %v1048_v61, %v1048_v61  ;;  %v9589_v61 = vld [vmem:[%s13645_s2 + $0x6a4] ss:$8 sps:$4 sm:$0xff]  }
 0x148   : > { %2793 = vmatprep.subr.bf16.mxu1 %v9444_v8  ;;  %v9519_v8 = vld [vmem:[%s13645_s2 + $0x650] ss:$8 sps:$4 sm:$0xff]  }
 0x14a   : > { %2743 = vmatpush1.bf16.msra.mxu0 %v9439_v9  ;;  %v9522_v9 = vld [vmem:[%s13647_s4 + $0x50] ss:$8 sps:$4 sm:$0xff]  }
 0x14b   : > { %2794 = vmatpush1.bf16.msra.mxu1 %v9442_v10  ;;  %2744 = vmatprep.subr.bf16.mxu0 %v9447_v11  ;;  %v11703_v10 = vcombine.low %v1049_v62, %v1049_v62  ;;  %v9529_v11 = vld [vmem:[%s13645_s2 + $0x644] ss:$8 sps:$4 sm:$0xff]  }
 0x14c   : > { %2795 = vmatprep.subr.bf16.mxu1 %v9450_v12  ;;  %v9532_v12 = vld [vmem:[%s13647_s4 + $0x44] ss:$8 sps:$4 sm:$0xff]  }
 0x14d   : > { %v9592_v62 = vld [vmem:[%s13647_s4 + $0xa4] ss:$8 sps:$4 sm:$0xff]  }
 0x14e   : > { %2745 = vmatpush1.bf16.msra.mxu0 %v9445_v13  ;;  %v9607_v13 = vld [vmem:[%s13643_s0 + $0x34] ss:$56 sps:$4 sm:$0xff]  }
 0x14f   : > { %2796 = vmatpush1.bf16.msra.mxu1 %v9448_v14  ;;  %2746 = vmatprep.subr.bf16.mxu0 %v9453_v15  ;;  %v9527_v14 = vld [vmem:[%s13645_s2 + $0x640] ss:$8 sps:$4 sm:$0xff]  }
 0x150   : > { %2797 = vmatprep.subr.bf16.mxu1 %v9456_v16  ;;  %v9530_v15 = vld [vmem:[%s13647_s4 + $0x40] ss:$8 sps:$4 sm:$0xff]   ;;  %v9535_v16 = vld [vmem:[%s13645_s2 + $0x634] ss:$8 sps:$4 sm:$0xff]  }
 0x152   : > { %2747 = vmatpush2.bf16.msra.mxu0 %v9451_v17  ;;  %v9538_v17 = vld [vmem:[%s13647_s4 + $0x34] ss:$8 sps:$4 sm:$0xff]  }
 0x153   : > { %2798 = vmatpush2.bf16.msra.mxu1 %v9454_v18  ;;  %2748 = vmatprep.subr.bf16.mxu0 %v9459_v19  ;;  %v10122_v18 = vld [vmem:[%s13643_s0 + $0x4] ss:$56 sps:$4 sm:$0xff]   ;;  %v9533_v19 = vld [vmem:[%s13645_s2 + $0x630] ss:$8 sps:$4 sm:$0xff]  }
 0x154   : > { %2799 = vmatprep.subr.bf16.mxu1 %v9462_v20  ;;  %v9536_v20 = vld [vmem:[%s13647_s4 + $0x30] ss:$8 sps:$4 sm:$0xff]  }
 0x156   : > { %2749 = vmatpush2.bf16.msra.mxu0 %v9457_v21  ;;  %v9541_v21 = vld [vmem:[%s13645_s2 + $0x624] ss:$8 sps:$4 sm:$0xff]  }
 0x157   : > { %2800 = vmatpush2.bf16.msra.mxu1 %v9460_v22  ;;  %2750 = vmatprep.subr.bf16.mxu0 %v9465_v23  ;;  %v9544_v22 = vld [vmem:[%s13647_s4 + $0x24] ss:$8 sps:$4 sm:$0xff]   ;;  %v9539_v23 = vld [vmem:[%s13645_s2 + $0x620] ss:$8 sps:$4 sm:$0xff]  }
 0x158   : > { %2801 = vmatprep.subr.bf16.mxu1 %v9468_v24  ;;  %v9542_v24 = vld [vmem:[%s13647_s4 + $0x20] ss:$8 sps:$4 sm:$0xff]  }
 0x15a   : > { %2751 = vmatpush2.bf16.msra.mxu0 %v9463_v25  ;;  %v9547_v25 = vld [vmem:[%s13645_s2 + $0x614] ss:$8 sps:$4 sm:$0xff]  }
 0x15b   : > { %2802 = vmatpush2.bf16.msra.mxu1 %v9466_v26  ;;  %2752 = vmatprep.subr.bf16.mxu0 %v9471_v27  ;;  %v9550_v26 = vld [vmem:[%s13647_s4 + $0x14] ss:$8 sps:$4 sm:$0xff]   ;;  %v9545_v27 = vld [vmem:[%s13645_s2 + $0x610] ss:$8 sps:$4 sm:$0xff]  }
 0x15c   : > { %2803 = vmatprep.subr.bf16.mxu1 %v9474_v28  ;;  %v9548_v28 = vld [vmem:[%s13647_s4 + $0x10] ss:$8 sps:$4 sm:$0xff]  }
 0x15e   : > { %2753 = vmatpush2.bf16.msra.mxu0 %v9469_v29  ;;  %v9553_v29 = vld [vmem:[%s13645_s2 + $0x604] ss:$8 sps:$4 sm:$0xff]  }
 0x15f   : > { %2804 = vmatpush2.bf16.msra.mxu1 %v9472_v30  ;;  %2754 = vmatprep.subr.bf16.mxu0 %v9477_v31  ;;  %v9556_v30 = vld [vmem:[%s13647_s4 + $0x4] ss:$8 sps:$4 sm:$0xff]   ;;  %v9551_v31 = vld [vmem:[%s13645_s2 + $0x600] ss:$8 sps:$4 sm:$0xff]  }
 0x160   : > { %2805 = vmatprep.subr.bf16.mxu1 %v9480_v32  ;;  %v9554_v32 = vld [vmem:[%s13647_s4] ss:$8 sps:$4 sm:$0xff]  }
 0x162   : > { %2755 = vmatpush2.bf16.msra.mxu0 %v9475_v33  ;;  %v9559_v33 = vld [vmem:[%s13645_s2 + $0x6f4] ss:$8 sps:$4 sm:$0xff]  }
 0x163   : > { %2806 = vmatpush2.bf16.msra.mxu1 %v9478_v34  ;;  %2756 = vmatprep.subr.bf16.mxu0 %v9483_v35  ;;  %v9562_v34 = vld [vmem:[%s13647_s4 + $0xf4] ss:$8 sps:$4 sm:$0xff]   ;;  %v9557_v35 = vld [vmem:[%s13645_s2 + $0x6f0] ss:$8 sps:$4 sm:$0xff]  }
 0x164   : > { %2807 = vmatprep.subr.bf16.mxu1 %v9486_v36  ;;  %v9560_v36 = vld [vmem:[%s13647_s4 + $0xf0] ss:$8 sps:$4 sm:$0xff]  }
 0x166   : > { %2757 = vmatpush2.bf16.msra.mxu0 %v9481_v37  ;;  %v9565_v37 = vld [vmem:[%s13645_s2 + $0x6e4] ss:$8 sps:$4 sm:$0xff]  }
 0x167   : > { %2808 = vmatpush2.bf16.msra.mxu1 %v9484_v38  ;;  %2758 = vmatprep.subr.bf16.mxu0 %v9489_v39  ;;  %v9568_v38 = vld [vmem:[%s13647_s4 + $0xe4] ss:$8 sps:$4 sm:$0xff]   ;;  %v9563_v39 = vld [vmem:[%s13645_s2 + $0x6e0] ss:$8 sps:$4 sm:$0xff]  }
 0x168   : > { %2809 = vmatprep.subr.bf16.mxu1 %v9492_v40  ;;  %v9566_v40 = vld [vmem:[%s13647_s4 + $0xe0] ss:$8 sps:$4 sm:$0xff]  }
 0x16a   : > { %2759 = vmatpush2.bf16.msra.mxu0 %v9487_v41  ;;  %v9571_v41 = vld [vmem:[%s13645_s2 + $0x6d4] ss:$8 sps:$4 sm:$0xff]  }
 0x16b   : > { %2810 = vmatpush2.bf16.msra.mxu1 %v9490_v42  ;;  %2760 = vmatprep.subr.bf16.mxu0 %v9495_v45  ;;  %v9574_v42 = vld [vmem:[%s13647_s4 + $0xd4] ss:$8 sps:$4 sm:$0xff]   ;;  %v9569_v45 = vld [vmem:[%s13645_s2 + $0x6d0] ss:$8 sps:$4 sm:$0xff]  }
 0x16c   : > { %2811 = vmatprep.subr.bf16.mxu1 %v9498_v46  ;;  %v9572_v46 = vld [vmem:[%s13647_s4 + $0xd0] ss:$8 sps:$4 sm:$0xff]  }
 0x16e   : > { %2761 = vmatpush2.bf16.msra.mxu0 %v9493_v47  ;;  %v9577_v47 = vld [vmem:[%s13645_s2 + $0x6c4] ss:$8 sps:$4 sm:$0xff]  }
 0x16f   : > { %2812 = vmatpush2.bf16.msra.mxu1 %v9496_v48  ;;  %2832 = vmatprep.subr.bf16.mxu0 %v9507_v54  ;;  %v9580_v48 = vld [vmem:[%s13647_s4 + $0xc4] ss:$8 sps:$4 sm:$0xff]   ;;  %v9575_v54 = vld [vmem:[%s13645_s2 + $0x6c0] ss:$8 sps:$4 sm:$0xff]  }
 0x170   : > { %4274 = vmatprep.subr.bf16.mxu1 %v9510_v58  ;;  %v9586_v58 = vld [vmem:[%s13647_s4 + $0xb4] ss:$8 sps:$4 sm:$0xff]  }
 0x171   : > { %2763 = vmatmul.mubr.bf16.vlgmr.msra.gmra.mxu0 %v9499_v55  ;;  %v9578_v55 = vld [vmem:[%s13647_s4 + $0xc0] ss:$8 sps:$4 sm:$0xff]  }
 0x172   : > { %2814 = vmatmul.mubr.bf16.vlgmr.msra.gmra.mxu1 %v9502_v57  ;;  %2833 = vmatpush1.bf16.msra.mxu0 %v9505_v59  ;;  %v9583_v57 = vld [vmem:[%s13645_s2 + $0x6b4] ss:$8 sps:$4 sm:$0xff]   ;;  %v9581_v59 = vld [vmem:[%s13645_s2 + $0x6b0] ss:$8 sps:$4 sm:$0xff]  }
 0x173   : > { %4275 = vmatpush1.bf16.msra.mxu1 %v9508_v60  ;;  %2834 = vmatprep.subr.bf16.mxu0 %v9513_v63  ;;  %v9584_v60 = vld [vmem:[%s13647_s4 + $0xb0] ss:$8 sps:$4 sm:$0xff]   ;;  %v9587_v63 = vld [vmem:[%s13645_s2 + $0x6a0] ss:$8 sps:$4 sm:$0xff]  }
 0x174   : > { %4276 = vmatprep.subr.bf16.mxu1 %v9516_v0  ;;  %2772 = vmatprep.mubr.bf16.mxu0 %v11677_v1  ;;  %v9590_v0 = vld [vmem:[%s13647_s4 + $0xa0] ss:$8 sps:$4 sm:$0xff]  }
 0x175   : > { %2823 = vmatprep.mubr.bf16.mxu1 %v11679_v2 }
 0x176   : > { %2835 = vmatpush1.bf16.msra.mxu0 %v9511_v3  ;;  %v9595_v3 = vld [vmem:[%s13645_s2 + $0x694] ss:$8 sps:$4 sm:$0xff]  }
 0x177   : > { %4277 = vmatpush1.bf16.msra.mxu1 %v9514_v4  ;;  %2836 = vmatprep.subr.bf16.mxu0 %v9521_v5  ;;  %v1277_v4 = vlaneseq  ;;  %v9598_v5 = vld [vmem:[%s13647_s4 + $0x94] ss:$8 sps:$4 sm:$0xff]  }
 0x178   : > { %4278 = vmatprep.subr.bf16.mxu1 %v9524_v6  ;;  %v9593_v6 = vld [vmem:[%s13645_s2 + $0x690] ss:$8 sps:$4 sm:$0xff]  }
 0x179   : > { %2773 = vmatmul.mubr.bf16.gmra.mxu0 %v11695_v7 }
 0x17a   : > { %2824 = vmatmul.mubr.bf16.gmra.mxu1 %v11703_v10  ;;  %2837 = vmatpush1.bf16.msra.mxu0 %v9519_v8  ;;  %v9596_v8 = vld [vmem:[%s13647_s4 + $0x90] ss:$8 sps:$4 sm:$0xff]  }
 0x17b   : > { %4279 = vmatpush1.bf16.msra.mxu1 %v9522_v9  ;;  %2838 = vmatprep.subr.bf16.mxu0 %v9529_v11  ;;  %v9601_v9 = vld [vmem:[%s13645_s2 + $0x684] ss:$8 sps:$4 sm:$0xff]   ;;  %v1278_v11 = vshrl.u32 %v1277_v4, 7 }
 0x17c   : > { %4280 = vmatprep.subr.bf16.mxu1 %v9532_v12  ;;  %2864 = vmatprep.mubr.bf16.mxu0 %v9607_v13  ;;  %v9604_v12 = vld [vmem:[%s13647_s4 + $0x84] ss:$8 sps:$4 sm:$0xff]   ;;  %v9599_v13 = vld [vmem:[%s13645_s2 + $0x680] ss:$8 sps:$4 sm:$0xff]  }
 0x17d   : > { %4306 = vmatprep.mubr.bf16.mxu1 %v10122_v18  ;;  %v9613_v18 = vld [vmem:[%s13647_s4 + $0x274] ss:$8 sps:$4 sm:$0xff]   ;;  %v10124_v4 = vld [vmem:[%s13643_s0 + $0xc] ss:$56 sps:$4 sm:$0xff]  }
 0x17e   : > { %2839 = vmatpush1.bf16.msra.mxu0 %v9527_v14  ;;  %v9602_v14 = vld [vmem:[%s13647_s4 + $0x80] ss:$8 sps:$4 sm:$0xff]  }
 0x17f   : > { %4281 = vmatpush1.bf16.msra.mxu1 %v9530_v15  ;;  %2840 = vmatprep.subr.bf16.mxu0 %v9535_v16  ;;  %v1275_v15 = vld [vmem:[%s13646_s3] sm:$0x3]  ;;  %v11872_v16 = vsub.s32 0, %v1278_v11 }
 0x180   : > { %4282 = vmatprep.subr.bf16.mxu1 %v9538_v17  ;;  %v9610_v17 = vld [vmem:[%s13647_s4 + $0x174] ss:$8 sps:$4 sm:$0xff]  }
 0x182   : > { %2841 = vmatpush1.bf16.msra.mxu0 %v9533_v19  ;;  %v9605_v19 = vld [vmem:[%s13643_s0 + $0x30] ss:$56 sps:$4 sm:$0xff]  }
 0x183   : > { %4283 = vmatpush1.bf16.msra.mxu1 %v9536_v20  ;;  %2842 = vmatprep.subr.bf16.mxu0 %v9541_v21  ;;  %v9608_v20 = vld [vmem:[%s13647_s4 + $0x170] ss:$8 sps:$4 sm:$0xff]   ;;  %v11886_v21 = vsub.s32 1, %v1278_v11  ;;  %v9640_v11 = vld [vmem:[%s13647_s4 + $0x120] ss:$8 sps:$4 sm:$0xff]  }
 0x184   : > { %4284 = vmatprep.subr.bf16.mxu1 %v9544_v22  ;;  %v9611_v22 = vld [vmem:[%s13647_s4 + $0x270] ss:$8 sps:$4 sm:$0xff]  }
 0x186   : > { %2843 = vmatpush1.bf16.msra.mxu0 %v9539_v23  ;;  %v1050_v23 = vld [vmem:[%s13643_s0 + $0xa0] sm:$0x11] }
 0x187   : > { %4285 = vmatpush1.bf16.msra.mxu1 %v9542_v24  ;;  %2844 = vmatprep.subr.bf16.mxu0 %v9547_v25  ;;  %v11895_v24 = vrot.slane %v1275_v15, %v11872_v16  ;;  %v9616_v25 = vld [vmem:[%s13647_s4 + $0x164] ss:$8 sps:$4 sm:$0xff]  }
 0x188   : > { %4286 = vmatprep.subr.bf16.mxu1 %v9550_v26  ;;  %v9619_v26 = vld [vmem:[%s13647_s4 + $0x264] ss:$8 sps:$4 sm:$0xff]  }
 0x18a   : > { %2845 = vmatpush1.bf16.msra.mxu0 %v9545_v27  ;;  %v11904_v27 = vrot.slane %v1275_v15, %v11886_v21 }
 0x18b   : > { %4287 = vmatpush1.bf16.msra.mxu1 %v9548_v28  ;;  %2846 = vmatprep.subr.bf16.mxu0 %v9553_v29  ;;  %v11906_v28 = vcombine.high %v1050_v23, %v1050_v23 }
 0x18c   : > { %4288 = vmatprep.subr.bf16.mxu1 %v9556_v30 }
 0x18e   : > { %2847 = vmatpush1.bf16.msra.mxu0 %v9551_v31  ;;  %v10123_v31 = vld [vmem:[%s13643_s0] ss:$56 sps:$4 sm:$0xff]  }
 0x18f   : > { %4289 = vmatpush1.bf16.msra.mxu1 %v9554_v32  ;;  %2848 = vmatprep.subr.bf16.mxu0 %v9559_v33  ;;  %v9614_v32 = vld [vmem:[%s13647_s4 + $0x160] ss:$8 sps:$4 sm:$0xff]  }
 0x190   : > { %4290 = vmatprep.subr.bf16.mxu1 %v9562_v34  ;;  %v9617_v33 = vld [vmem:[%s13647_s4 + $0x260] ss:$8 sps:$4 sm:$0xff]  }
 0x192   : > { %2849 = vmatpush2.bf16.msra.mxu0 %v9557_v35  ;;  %v9624_v35 = vld [vmem:[%s13647_s4 + $0x154] ss:$8 sps:$4 sm:$0xff]  }
 0x193   : > { %4291 = vmatpush2.bf16.msra.mxu1 %v9560_v36  ;;  %2850 = vmatprep.subr.bf16.mxu0 %v9565_v37 }
 0x194   : > { %4292 = vmatprep.subr.bf16.mxu1 %v9568_v38  ;;  %v9627_v38 = vld [vmem:[%s13647_s4 + $0x254] ss:$8 sps:$4 sm:$0xff]  }
 0x196   : > { %2851 = vmatpush2.bf16.msra.mxu0 %v9563_v39 }
 0x197   : > { %4293 = vmatpush2.bf16.msra.mxu1 %v9566_v40  ;;  %2852 = vmatprep.subr.bf16.mxu0 %v9571_v41 }
 0x198   : > { %4294 = vmatprep.subr.bf16.mxu1 %v9574_v42 }
 0x19a   : > { %2853 = vmatpush2.bf16.msra.mxu0 %v9569_v45  ;;  %v11929_v45 = vcombine.low %v1050_v23, %v1050_v23 }
 0x19b   : > { %4295 = vmatpush2.bf16.msra.mxu1 %v9572_v46  ;;  %2854 = vmatprep.subr.bf16.mxu0 %v9577_v47  ;;  %v9622_v46 = vld [vmem:[%s13647_s4 + $0x150] ss:$8 sps:$4 sm:$0xff]  }
 0x19c   : > { %4296 = vmatprep.subr.bf16.mxu1 %v9580_v48  ;;  %v9625_v47 = vld [vmem:[%s13647_s4 + $0x250] ss:$8 sps:$4 sm:$0xff]  }
 0x19e   : > { %2855 = vmatpush2.bf16.msra.mxu0 %v9575_v54 }
 0x19f   : > { %4297 = vmatpush2.bf16.msra.mxu1 %v9578_v55  ;;  %2856 = vmatprep.subr.bf16.mxu0 %v9583_v57  ;;  %v9633_v57 = vld [vmem:[%s13647_s4 + $0x244] ss:$8 sps:$4 sm:$0xff]  }
 0x1a0   : > { %4298 = vmatprep.subr.bf16.mxu1 %v9586_v58 }
 0x1a2   : > { %2857 = vmatpush2.bf16.msra.mxu0 %v9581_v59 }
 0x1a3   : > { %4299 = vmatpush2.bf16.msra.mxu1 %v9584_v60  ;;  %2858 = vmatprep.subr.bf16.mxu0 %v9589_v61  ;;  %v9628_v61 = vld [vmem:[%s13647_s4 + $0x140] ss:$8 sps:$4 sm:$0xff]  }
 0x1a4   : > { %4300 = vmatprep.subr.bf16.mxu1 %v9592_v62  ;;  %v9631_v62 = vld [vmem:[%s13647_s4 + $0x240] ss:$8 sps:$4 sm:$0xff]  }
 0x1a6   : > { %2859 = vmatpush2.bf16.msra.mxu0 %v9587_v63 }
 0x1a7   : > { %4301 = vmatpush2.bf16.msra.mxu1 %v9590_v0  ;;  %2860 = vmatprep.subr.bf16.mxu0 %v9595_v3  ;;  %v9636_v0 = vld [vmem:[%s13647_s4 + $0x134] ss:$8 sps:$4 sm:$0xff]  }
 0x1a8   : > { %4302 = vmatprep.subr.bf16.mxu1 %v9598_v5  ;;  %v9639_v3 = vld [vmem:[%s13647_s4 + $0x234] ss:$8 sps:$4 sm:$0xff]   ;;  %v9634_v5 = vld [vmem:[%s13647_s4 + $0x130] ss:$8 sps:$4 sm:$0xff]  }
 0x1aa   : > { %2861 = vmatpush2.bf16.msra.mxu0 %v9593_v6  ;;  %v9637_v6 = vld [vmem:[%s13647_s4 + $0x230] ss:$8 sps:$4 sm:$0xff]  }
 0x1ab   : > { %4303 = vmatpush2.bf16.msra.mxu1 %v9596_v8  ;;  %2862 = vmatprep.subr.bf16.mxu0 %v9601_v9  ;;  %v9642_v8 = vld [vmem:[%s13647_s4 + $0x124] ss:$8 sps:$4 sm:$0xff]  }
 0x1ac   : > { %4304 = vmatprep.subr.bf16.mxu1 %v9604_v12  ;;  %v9645_v9 = vld [vmem:[%s13647_s4 + $0x224] ss:$8 sps:$4 sm:$0xff]   ;;  %v9643_v12 = vld [vmem:[%s13647_s4 + $0x220] ss:$8 sps:$4 sm:$0xff]  }
 0x1ae   : > { %2863 = vmatpush2.bf16.msra.mxu0 %v9599_v13  ;;  %v9648_v13 = vld [vmem:[%s13647_s4 + $0x114] ss:$8 sps:$4 sm:$0xff]  }
 0x1af   : > { %4305 = vmatpush2.bf16.msra.mxu1 %v9602_v14  ;;  %4325 = vmatprep.subr.bf16.mxu0 %v9610_v17  ;;  %v9651_v14 = vld [vmem:[%s13647_s4 + $0x214] ss:$8 sps:$4 sm:$0xff]  }
 0x1b0   : > { %4376 = vmatprep.subr.bf16.mxu1 %v9613_v18  ;;  %v9646_v18 = vld [vmem:[%s13647_s4 + $0x110] ss:$8 sps:$4 sm:$0xff]  }
 0x1b1   : > { %v2560_v29 = vpop.f32.mrf.mxu0  ;;  %2865 = vmatmul.mubr.bf16.vlgmr.msra.gmra.mxu0 %v9605_v19  ;;  %v9649_v19 = vld [vmem:[%s13647_s4 + $0x210] ss:$8 sps:$4 sm:$0xff]  }
 0x1b2   : > { %v2611_v30 = vpop.f32.mrf.mxu1  ;;  %4307 = vmatmul.mubr.bf16.vlgmr.msra.gmra.mxu1 %v10123_v31  ;;  %v2561_v34 = vadd.f32 %v2560_v29, %v11895_v24  ;;  %4326 = vmatpush1.bf16.msra.mxu0 %v9608_v20 }
 0x1b3   : > { %4377 = vmatpush1.bf16.msra.mxu1 %v9611_v22  ;;  %v2562_v36 = vpop.f32.mrf.mxu0  ;;  %4327 = vmatprep.subr.bf16.mxu0 %v9616_v25  ;;  %v9654_v22 = vld [vmem:[%s13647_s4 + $0x104] ss:$8 sps:$4 sm:$0xff]  }
 0x1b4   : > { %v2613_v37 = vpop.f32.mrf.mxu1  ;;  %4378 = vmatprep.subr.bf16.mxu1 %v9619_v26  ;;  %v11924_v39 = vadd.f32 %v2611_v30, %v2561_v34  ;;  %v2563_v40 = vadd.f32 %v2562_v36, %v11904_v27  ;;  %2874 = vmatprep.mubr.bf16.mxu0 %v11906_v28  ;;  %v9657_v26 = vld [vmem:[%s13647_s4 + $0x204] ss:$8 sps:$4 sm:$0xff]  }
 0x1b5   : > { %4316 = vmatprep.mubr.bf16.mxu1 %v11281_v49  ;;  %v2564_v41 = vpop.f32.mrf.mxu0  ;;  %v9630_v49 = vld [vmem:[%s13647_s4 + $0x144] ss:$8 sps:$4 sm:$0xff]  }
 0x1b6   : > { %v2615_v42 = vpop.f32.mrf.mxu1  ;;  %v11937_v48 = vadd.f32 %v2613_v37, %v2563_v40  ;;  %v2565_v54 = vadd.f32 %v2564_v41, %v11895_v24  ;;  %4328 = vmatpush1.bf16.msra.mxu0 %v9614_v32  ;;  %v9652_v32 = vld [vmem:[%s13647_s4 + $0x100] ss:$8 sps:$4 sm:$0xff]   ;;  %v9663_v37 = vld [vmem:[%s13647_s4 + $0x2f4] ss:$8 sps:$4 sm:$0xff]   ;;  %v9661_v40 = vld [vmem:[%s13647_s4 + $0x2f0] ss:$8 sps:$4 sm:$0xff]  }
 0x1b7   : > { %4379 = vmatpush1.bf16.msra.mxu1 %v9617_v33  ;;  %v2566_v55 = vpop.f32.mrf.mxu0  ;;  %4329 = vmatprep.subr.bf16.mxu0 %v9624_v35  ;;  %v9655_v33 = vld [vmem:[%s13647_s4 + $0x200] ss:$8 sps:$4 sm:$0xff]   ;;  %v9666_v41 = vld [vmem:[%s13647_s4 + $0x1e4] ss:$8 sps:$4 sm:$0xff]  }
 0x1b8   : > { %4380 = vmatprep.subr.bf16.mxu1 %v9627_v38  ;;  %v11946_v58 = vadd.f32 %v2615_v42, %v2565_v54  ;;  %v2567_v59 = vadd.f32 %v2566_v55, %v11904_v27  ;;  %v2617_v60 = vpop.f32.mrf.mxu1  ;;  %v9658_v38 = vld [vmem:[%s13647_s4 + $0x1f0] ss:$8 sps:$4 sm:$0xff]   ;;  %v9669_v42 = vld [vmem:[%s13647_s4 + $0x2e4] ss:$8 sps:$4 sm:$0xff]   ;;  %v9672_v54 = vld [vmem:[%s13647_s4 + $0x1d4] ss:$8 sps:$4 sm:$0xff]  }
 0x1b9   : > { %2875 = vmatmul.mubr.bf16.gmra.mxu0 %v11929_v45  ;;  %v2570_v15 = vpop.f32.mrf.mxu0  ;;  %v9670_v55 = vld [vmem:[%s13647_s4 + $0x1d0] ss:$8 sps:$4 sm:$0xff]  }
 0x1ba   : > { %4317 = vmatmul.mubr.bf16.gmra.mxu1 %v11285_v51  ;;  %v11957_v63 = vadd.f32 %v2617_v60, %v2567_v59  ;;  %4330 = vmatpush1.bf16.msra.mxu0 %v9622_v46  ;;  %v10125_v51 = vld [vmem:[%s13643_s0 + $0x14] ss:$56 sps:$4 sm:$0xff]   ;;  %v2621_v17 = vpop.f32.mrf.mxu1  ;;  %v2571_v20 = vadd.f32 %v2570_v15, %v11895_v24  ;;  %v9664_v46 = vld [vmem:[%s13647_s4 + $0x1e0] ss:$8 sps:$4 sm:$0xff]  }
 0x1bb   : > { %4381 = vmatpush1.bf16.msra.mxu1 %v9625_v47  ;;  %4331 = vmatprep.subr.bf16.mxu0 %v9630_v49  ;;  %v2572_v23 = vpop.f32.mrf.mxu0  ;;  %v9667_v47 = vld [vmem:[%s13647_s4 + $0x2e0] ss:$8 sps:$4 sm:$0xff]   ;;  %v9675_v49 = vld [vmem:[%s13647_s4 + $0x2d4] ss:$8 sps:$4 sm:$0xff]   ;;  %v9678_v59 = vld [vmem:[%s13647_s4 + $0x1c4] ss:$8 sps:$4 sm:$0xff]  }
 0x1bc   : > { %4382 = vmatprep.subr.bf16.mxu1 %v9633_v57  ;;  %4357 = vmatprep.mubr.bf16.mxu0 %v10124_v4  ;;  %v2623_v25 = vpop.f32.mrf.mxu1  ;;  %v2573_v29 = vadd.f32 %v2572_v23, %v11904_v27  ;;  %v12009_v30 = vadd.f32 %v2621_v17, %v2571_v20  ;;  %v9660_v27 = vld [vmem:[%s13647_s4 + $0x1f4] ss:$8 sps:$4 sm:$0xff]   ;;  %v9673_v57 = vld [vmem:[%s13647_s4 + $0x2d0] ss:$8 sps:$4 sm:$0xff]   ;;  %v9681_v60 = vld [vmem:[%s13647_s4 + $0x2c4] ss:$8 sps:$4 sm:$0xff]  }
 0x1bd   : > { %4408 = vmatprep.mubr.bf16.mxu1 %v10125_v51  ;;  %v2574_v31 = vpop.f32.mrf.mxu0  ;;  %v9682_v4 = vld [vmem:[%s13647_s4 + $0x1b0] ss:$8 sps:$4 sm:$0xff]   ;;  %v9702_v15 = vld [vmem:[%s13647_s4 + $0x184] ss:$8 sps:$4 sm:$0xff]   ;;  %v9708_v20 = vld [vmem:[%s13647_s4 + $0x374] ss:$8 sps:$4 sm:$0xff]  }
 0x1be   : > { %4332 = vmatpush1.bf16.msra.mxu0 %v9628_v61  ;;  %v2625_v24 = vpop.f32.mrf.mxu1  ;;  %v12017_v34 = vadd.f32 %v2623_v25, %v2573_v29  ;;  %v9676_v61 = vld [vmem:[%s13647_s4 + $0x1c0] ss:$8 sps:$4 sm:$0xff]   ;;  %v9685_v51 = vld [vmem:[%s13647_s4 + $0x2b0] ss:$8 sps:$4 sm:$0xff]   ;;  %v9705_v17 = vld [vmem:[%s13647_s4 + $0x284] ss:$8 sps:$4 sm:$0xff]  }
 0x1bf   : > { %4383 = vmatpush1.bf16.msra.mxu1 %v9631_v62  ;;  %4333 = vmatprep.subr.bf16.mxu0 %v9636_v0  ;;  %v2575_v35 = vpop.f32.mrf.mxu0  ;;  %v9679_v62 = vld [vmem:[%s13647_s4 + $0x2c0] ss:$8 sps:$4 sm:$0xff]   ;;  %v9684_v0 = vld [vmem:[%s13647_s4 + $0x1b4] ss:$8 sps:$4 sm:$0xff]   ;;  %v9706_v23 = vld [vmem:[%s13647_s4 + $0x370] ss:$8 sps:$4 sm:$0xff]  }
 0x1c0   : > { %4384 = vmatprep.subr.bf16.mxu1 %v9639_v3  ;;  %v2626_v36 = vpop.f32.mrf.mxu1  ;;  %v9687_v3 = vld [vmem:[%s13647_s4 + $0x2b4] ss:$8 sps:$4 sm:$0xff]   ;;  %v9709_v25 = vld [vmem:[%s13647_s4 + $0x470] ss:$8 sps:$4 sm:$0xff]   ;;  %v9717_v29 = vld [vmem:[%s13647_s4 + $0x464] ss:$8 sps:$4 sm:$0xff]  }
 0x1c1   : > { %v9712_v31 = vld [vmem:[%s13647_s4 + $0x360] ss:$8 sps:$4 sm:$0xff]   ;;  %v9720_v36 = vld [vmem:[%s13647_s4 + $0x354] ss:$8 sps:$4 sm:$0xff]  }
 0x1c2   : > { %4334 = vmatpush1.bf16.msra.mxu0 %v9634_v5  ;;  %v9690_v5 = vld [vmem:[%s13647_s4 + $0x1a4] ss:$8 sps:$4 sm:$0xff]   ;;  %v9715_v24 = vld [vmem:[%s13647_s4 + $0x460] ss:$8 sps:$4 sm:$0xff]  }
 0x1c3   : > { %4385 = vmatpush1.bf16.msra.mxu1 %v9637_v6  ;;  %4335 = vmatprep.subr.bf16.mxu0 %v9642_v8  ;;  %v9693_v6 = vld [vmem:[%s13647_s4 + $0x2a4] ss:$8 sps:$4 sm:$0xff]   ;;  %v9688_v8 = vld [vmem:[%s13647_s4 + $0x1a0] ss:$8 sps:$4 sm:$0xff]  }
 0x1c4   : > { %4386 = vmatprep.subr.bf16.mxu1 %v9645_v9  ;;  %v9691_v9 = vld [vmem:[%s13647_s4 + $0x2a0] ss:$8 sps:$4 sm:$0xff]  }
 0x1c5   : > { %v10127_v35 = vld [vmem:[%s13643_s0 + $0x10] ss:$56 sps:$4 sm:$0xff]  }
 0x1c6   : > { %4336 = vmatpush1.bf16.msra.mxu0 %v9640_v11  ;;  %v9696_v11 = vld [vmem:[%s13647_s4 + $0x194] ss:$8 sps:$4 sm:$0xff]  }
 0x1c7   : > { %4387 = vmatpush1.bf16.msra.mxu1 %v9643_v12  ;;  %4337 = vmatprep.subr.bf16.mxu0 %v9648_v13  ;;  %v9699_v12 = vld [vmem:[%s13647_s4 + $0x294] ss:$8 sps:$4 sm:$0xff]   ;;  %v9694_v13 = vld [vmem:[%s13647_s4 + $0x190] ss:$8 sps:$4 sm:$0xff]  }
 0x1c8   : > { %4388 = vmatprep.subr.bf16.mxu1 %v9651_v14  ;;  %v9697_v14 = vld [vmem:[%s13647_s4 + $0x290] ss:$8 sps:$4 sm:$0xff]  }
 0x1ca   : > { %4338 = vmatpush1.bf16.msra.mxu0 %v9646_v18  ;;  %v9700_v18 = vld [vmem:[%s13647_s4 + $0x180] ss:$8 sps:$4 sm:$0xff]  }
 0x1cb   : > { %4389 = vmatpush1.bf16.msra.mxu1 %v9649_v19  ;;  %4339 = vmatprep.subr.bf16.mxu0 %v9654_v22  ;;  %v9703_v19 = vld [vmem:[%s13647_s4 + $0x280] ss:$8 sps:$4 sm:$0xff]   ;;  %v9711_v22 = vld [vmem:[%s13647_s4 + $0x474] ss:$8 sps:$4 sm:$0xff]  }
 0x1cc   : > { %4390 = vmatprep.subr.bf16.mxu1 %v9657_v26  ;;  %v9714_v26 = vld [vmem:[%s13647_s4 + $0x364] ss:$8 sps:$4 sm:$0xff]  }
 0x1ce   : > { %4340 = vmatpush1.bf16.msra.mxu0 %v9652_v32 }
 0x1cf   : > { %4391 = vmatpush1.bf16.msra.mxu1 %v9655_v33  ;;  %4341 = vmatprep.subr.bf16.mxu0 %v9660_v27  ;;  %v10126_v27 = vld [vmem:[%s13643_s0 + $0x8] ss:$56 sps:$4 sm:$0xff]  }
 0x1d0   : > { %4392 = vmatprep.subr.bf16.mxu1 %v9663_v37 }
 0x1d2   : > { %4342 = vmatpush2.bf16.msra.mxu0 %v9658_v38  ;;  %v9723_v38 = vld [vmem:[%s13647_s4 + $0x454] ss:$8 sps:$4 sm:$0xff]  }
 0x1d3   : > { %4393 = vmatpush2.bf16.msra.mxu1 %v9661_v40  ;;  %4343 = vmatprep.subr.bf16.mxu0 %v9666_v41 }
 0x1d4   : > { %4394 = vmatprep.subr.bf16.mxu1 %v9669_v42 }
 0x1d6   : > { %4344 = vmatpush2.bf16.msra.mxu0 %v9664_v46 }
 0x1d7   : > { %4395 = vmatpush2.bf16.msra.mxu1 %v9667_v47  ;;  %4345 = vmatprep.subr.bf16.mxu0 %v9672_v54  ;;  %v9721_v47 = vld [vmem:[%s13647_s4 + $0x450] ss:$8 sps:$4 sm:$0xff]  }
 0x1d8   : > { %4396 = vmatprep.subr.bf16.mxu1 %v9675_v49 }
 0x1da   : > { %4346 = vmatpush2.bf16.msra.mxu0 %v9670_v55  ;;  %v9726_v55 = vld [vmem:[%s13647_s4 + $0x344] ss:$8 sps:$4 sm:$0xff]  }
 0x1db   : > { %4397 = vmatpush2.bf16.msra.mxu1 %v9673_v57  ;;  %4347 = vmatprep.subr.bf16.mxu0 %v9678_v59 }
 0x1dc   : > { %4398 = vmatprep.subr.bf16.mxu1 %v9681_v60 }
 0x1de   : > { %4348 = vmatpush2.bf16.msra.mxu0 %v9676_v61 }
 0x1df   : > { %4399 = vmatpush2.bf16.msra.mxu1 %v9679_v62  ;;  %4349 = vmatprep.subr.bf16.mxu0 %v9684_v0  ;;  %v9724_v62 = vld [vmem:[%s13647_s4 + $0x340] ss:$8 sps:$4 sm:$0xff]  }
 0x1e0   : > { %4400 = vmatprep.subr.bf16.mxu1 %v9687_v3  ;;  %v9727_v0 = vld [vmem:[%s13647_s4 + $0x440] ss:$8 sps:$4 sm:$0xff]  }
 0x1e2   : > { %4350 = vmatpush2.bf16.msra.mxu0 %v9682_v4  ;;  %v9732_v4 = vld [vmem:[%s13647_s4 + $0x334] ss:$8 sps:$4 sm:$0xff]  }
 0x1e3   : > { %4401 = vmatpush2.bf16.msra.mxu1 %v9685_v51  ;;  %4351 = vmatprep.subr.bf16.mxu0 %v9690_v5 }
 0x1e4   : > { %4402 = vmatprep.subr.bf16.mxu1 %v9693_v6 }
 0x1e6   : > { %4352 = vmatpush2.bf16.msra.mxu0 %v9688_v8 }
 0x1e7   : > { %4403 = vmatpush2.bf16.msra.mxu1 %v9691_v9  ;;  %4353 = vmatprep.subr.bf16.mxu0 %v9696_v11  ;;  %v9730_v9 = vld [vmem:[%s13647_s4 + $0x330] ss:$8 sps:$4 sm:$0xff]  }
 0x1e8   : > { %4404 = vmatprep.subr.bf16.mxu1 %v9699_v12  ;;  %v9733_v11 = vld [vmem:[%s13647_s4 + $0x430] ss:$8 sps:$4 sm:$0xff]   ;;  %v10129_v12 = vld [vmem:[%s13643_s0 + $0x24] ss:$56 sps:$4 sm:$0xff]  }
 0x1ea   : > { %4354 = vmatpush2.bf16.msra.mxu0 %v9694_v13  ;;  %v9741_v13 = vld [vmem:[%s13647_s4 + $0x424] ss:$8 sps:$4 sm:$0xff]  }
 0x1eb   : > { %4405 = vmatpush2.bf16.msra.mxu1 %v9697_v14  ;;  %4355 = vmatprep.subr.bf16.mxu0 %v9702_v15 }
 0x1ec   : > { %4406 = vmatprep.subr.bf16.mxu1 %v9705_v17 }
 0x1ee   : > { %4356 = vmatpush2.bf16.msra.mxu0 %v9700_v18 }
 0x1ef   : > { %4407 = vmatpush2.bf16.msra.mxu1 %v9703_v19  ;;  %4427 = vmatprep.subr.bf16.mxu0 %v9708_v20  ;;  %v9736_v20 = vld [vmem:[%s13647_s4 + $0x320] ss:$8 sps:$4 sm:$0xff]  }
 0x1f0   : > { %4478 = vmatprep.subr.bf16.mxu1 %v9711_v22  ;;  %v9739_v22 = vld [vmem:[%s13647_s4 + $0x420] ss:$8 sps:$4 sm:$0xff]  }
 0x1f1   : > { %v2662_v32 = vpop.f32.mrf.mxu0  ;;  %4358 = vmatmul.mubr.bf16.vlgmr.msra.gmra.mxu0 %v10126_v27  ;;  %v9756_v27 = vld [vmem:[%s13647_s4 + $0x3f4] ss:$8 sps:$4 sm:$0xff]  }
 0x1f2   : > { %v2713_v33 = vpop.f32.mrf.mxu1  ;;  %4409 = vmatmul.mubr.bf16.vlgmr.msra.gmra.mxu1 %v10127_v35  ;;  %v2663_v37 = vadd.f32 %v2662_v32, %v11924_v39  ;;  %4428 = vmatpush1.bf16.msra.mxu0 %v9706_v23  ;;  %v9718_v39 = vld [vmem:[%s13647_s4 + $0x350] ss:$8 sps:$4 sm:$0xff]   ;;  %v9744_v23 = vld [vmem:[%s13647_s4 + $0x314] ss:$8 sps:$4 sm:$0xff]   ;;  %v9748_v32 = vld [vmem:[%s13647_s4 + $0x300] ss:$8 sps:$4 sm:$0xff]  }
 0x1f3   : > { %4479 = vmatpush1.bf16.msra.mxu1 %v9709_v25  ;;  %v2664_v40 = vpop.f32.mrf.mxu0  ;;  %4429 = vmatprep.subr.bf16.mxu0 %v9714_v26  ;;  %v9747_v25 = vld [vmem:[%s13647_s4 + $0x414] ss:$8 sps:$4 sm:$0xff]   ;;  %v9742_v26 = vld [vmem:[%s13647_s4 + $0x310] ss:$8 sps:$4 sm:$0xff]  }
 0x1f4   : > { %v2715_v41 = vpop.f32.mrf.mxu1  ;;  %4480 = vmatprep.subr.bf16.mxu1 %v9717_v29  ;;  %v12152_v42 = vadd.f32 %v2713_v33, %v2663_v37  ;;  %v2665_v46 = vadd.f32 %v2664_v40, %v11937_v48  ;;  %4367 = vmatprep.mubr.bf16.mxu0 %v11283_v50  ;;  %v9729_v50 = vld [vmem:[%s13647_s4 + $0x444] ss:$8 sps:$4 sm:$0xff]   ;;  %v9745_v29 = vld [vmem:[%s13647_s4 + $0x410] ss:$8 sps:$4 sm:$0xff]   ;;  %v9751_v33 = vld [vmem:[%s13647_s4 + $0x400] ss:$8 sps:$4 sm:$0xff]  }
 0x1f5   : > { %4418 = vmatprep.mubr.bf16.mxu1 %v11455_v43  ;;  %v2666_v54 = vpop.f32.mrf.mxu0  ;;  %v9759_v35 = vld [vmem:[%s13647_s4 + $0x4f4] ss:$8 sps:$4 sm:$0xff]   ;;  %v9757_v37 = vld [vmem:[%s13647_s4 + $0x4f0] ss:$8 sps:$4 sm:$0xff]   ;;  %v9765_v40 = vld [vmem:[%s13647_s4 + $0x4e4] ss:$8 sps:$4 sm:$0xff]  }
 0x1f6   : > { %v2717_v49 = vpop.f32.mrf.mxu1  ;;  %v12169_v48 = vadd.f32 %v2715_v41, %v2665_v46  ;;  %v2667_v57 = vadd.f32 %v2666_v54, %v11946_v58  ;;  %4430 = vmatpush1.bf16.msra.mxu0 %v9712_v31  ;;  %v9750_v31 = vld [vmem:[%s13647_s4 + $0x304] ss:$8 sps:$4 sm:$0xff]   ;;  %v9760_v41 = vld [vmem:[%s13647_s4 + $0x3e0] ss:$8 sps:$4 sm:$0xff]   ;;  %v9766_v54 = vld [vmem:[%s13647_s4 + $0x3d0] ss:$8 sps:$4 sm:$0xff]  }
 0x1f7   : > { %4481 = vmatpush1.bf16.msra.mxu1 %v9715_v24  ;;  %v2668_v59 = vpop.f32.mrf.mxu0  ;;  %4431 = vmatprep.subr.bf16.mxu0 %v9720_v36  ;;  %v9753_v24 = vld [vmem:[%s13647_s4 + $0x404] ss:$8 sps:$4 sm:$0xff]   ;;  %v9754_v36 = vld [vmem:[%s13647_s4 + $0x3f0] ss:$8 sps:$4 sm:$0xff]   ;;  %v9763_v46 = vld [vmem:[%s13647_s4 + $0x4e0] ss:$8 sps:$4 sm:$0xff]  }
 0x1f8   : > { %v2719_v60 = vpop.f32.mrf.mxu1  ;;  %4482 = vmatprep.subr.bf16.mxu1 %v9723_v38  ;;  %v12172_v43 = vadd.f32 %v2717_v49, %v2667_v57  ;;  %v2669_v61 = vadd.f32 %v2668_v59, %v11957_v63  ;;  %v9735_v63 = vld [vmem:[%s13647_s4 + $0x434] ss:$8 sps:$4 sm:$0xff]   ;;  %v9762_v38 = vld [vmem:[%s13647_s4 + $0x3e4] ss:$8 sps:$4 sm:$0xff]   ;;  %v9769_v49 = vld [vmem:[%s13647_s4 + $0x4d0] ss:$8 sps:$4 sm:$0xff]  }
 0x1f9   : > { %v2672_v3 = vpop.f32.mrf.mxu0  ;;  %4368 = vmatmul.mubr.bf16.gmra.mxu0 %v11287_v52  ;;  %v9772_v57 = vld [vmem:[%s13647_s4 + $0x3c0] ss:$8 sps:$4 sm:$0xff]  }
 0x1fa   : > { %v2723_v58 = vpop.f32.mrf.mxu1  ;;  %4419 = vmatmul.mubr.bf16.gmra.mxu1 %v11473_v53  ;;  %v12189_v51 = vadd.f32 %v2719_v60, %v2669_v61  ;;  %v2673_v5 = vadd.f32 %v2672_v3, %v12009_v30  ;;  %4432 = vmatpush1.bf16.msra.mxu0 %v9718_v39  ;;  %v10128_v30 = vld [vmem:[%s13643_s0 + $0x1c] ss:$56 sps:$4 sm:$0xff]   ;;  %v9775_v59 = vld [vmem:[%s13647_s4 + $0x4c0] ss:$8 sps:$4 sm:$0xff]   ;;  %v9786_v3 = vld [vmem:[%s13647_s4 + $0x3a4] ss:$8 sps:$4 sm:$0xff]  }
 0x1fb   : > { %4483 = vmatpush1.bf16.msra.mxu1 %v9721_v47  ;;  %v2674_v6 = vpop.f32.mrf.mxu0  ;;  %4433 = vmatprep.subr.bf16.mxu0 %v9726_v55  ;;  %v9768_v39 = vld [vmem:[%s13647_s4 + $0x3d4] ss:$8 sps:$4 sm:$0xff]   ;;  %v9774_v55 = vld [vmem:[%s13647_s4 + $0x3c4] ss:$8 sps:$4 sm:$0xff]  }
 0x1fc   : > { %v2725_v8 = vpop.f32.mrf.mxu1  ;;  %4484 = vmatprep.subr.bf16.mxu1 %v9729_v50  ;;  %v2675_v52 = vadd.f32 %v2674_v6, %v12017_v34  ;;  %v12193_v53 = vadd.f32 %v2723_v58, %v2673_v5  ;;  %4459 = vmatprep.mubr.bf16.mxu0 %v10128_v30  ;;  %v9738_v34 = vld [vmem:[%s13647_s4 + $0x324] ss:$8 sps:$4 sm:$0xff]   ;;  %v9771_v47 = vld [vmem:[%s13647_s4 + $0x4d4] ss:$8 sps:$4 sm:$0xff]   ;;  %v9796_v30 = vld [vmem:[%s13647_s4 + $0x380] ss:$8 sps:$4 sm:$0xff]  }
 0x1fd   : > { %4510 = vmatprep.mubr.bf16.mxu1 %v10129_v12  ;;  %v2676_v14 = vpop.f32.mrf.mxu0  ;;  %v9777_v50 = vld [vmem:[%s13647_s4 + $0x4c4] ss:$8 sps:$4 sm:$0xff]   ;;  %v9780_v60 = vld [vmem:[%s13647_s4 + $0x3b4] ss:$8 sps:$4 sm:$0xff]   ;;  %v9799_v12 = vld [vmem:[%s13647_s4 + $0x480] ss:$8 sps:$4 sm:$0xff]  }
 0x1fe   : > { %v2727_v15 = vpop.f32.mrf.mxu1  ;;  %v12213_v17 = vadd.f32 %v2725_v8, %v2675_v52  ;;  %4434 = vmatpush1.bf16.msra.mxu0 %v9724_v62  ;;  %v9783_v61 = vld [vmem:[%s13647_s4 + $0x4b4] ss:$8 sps:$4 sm:$0xff]   ;;  %v9778_v62 = vld [vmem:[%s13647_s4 + $0x3b0] ss:$8 sps:$4 sm:$0xff]   ;;  %v9789_v58 = vld [vmem:[%s13647_s4 + $0x4a4] ss:$8 sps:$4 sm:$0xff]  }
 0x1ff   : > { %4485 = vmatpush1.bf16.msra.mxu1 %v9727_v0  ;;  %4435 = vmatprep.subr.bf16.mxu0 %v9732_v4  ;;  %v2677_v18 = vpop.f32.mrf.mxu0  ;;  %v9781_v0 = vld [vmem:[%s13647_s4 + $0x4b0] ss:$8 sps:$4 sm:$0xff]   ;;  %v9784_v4 = vld [vmem:[%s13647_s4 + $0x3a0] ss:$8 sps:$4 sm:$0xff]   ;;  %v9792_v5 = vld [vmem:[%s13647_s4 + $0x394] ss:$8 sps:$4 sm:$0xff]  }
 0x200   : > { %4486 = vmatprep.subr.bf16.mxu1 %v9735_v63  ;;  %v2728_v19 = vpop.f32.mrf.mxu1  ;;  %v9787_v63 = vld [vmem:[%s13647_s4 + $0x4a0] ss:$8 sps:$4 sm:$0xff]   ;;  %v9795_v6 = vld [vmem:[%s13647_s4 + $0x494] ss:$8 sps:$4 sm:$0xff]   ;;  %v9790_v8 = vld [vmem:[%s13647_s4 + $0x390] ss:$8 sps:$4 sm:$0xff]  }
 0x201   : > { %v9793_v52 = vld [vmem:[%s13647_s4 + $0x490] ss:$8 sps:$4 sm:$0xff]   ;;  %v9810_v18 = vld [vmem:[%s13647_s4 + $0x564] ss:$8 sps:$4 sm:$0xff]  }
 0x202   : > { %4436 = vmatpush1.bf16.msra.mxu0 %v9730_v9  ;;  %v9798_v9 = vld [vmem:[%s13647_s4 + $0x384] ss:$8 sps:$4 sm:$0xff]   ;;  %v9802_v14 = vld [vmem:[%s13647_s4 + $0x570] ss:$8 sps:$4 sm:$0xff]  }
 0x203   : > { %4487 = vmatpush1.bf16.msra.mxu1 %v9733_v11  ;;  %4437 = vmatprep.subr.bf16.mxu0 %v9738_v34  ;;  %v9801_v11 = vld [vmem:[%s13647_s4 + $0x484] ss:$8 sps:$4 sm:$0xff]   ;;  %v9804_v34 = vld [vmem:[%s13647_s4 + $0x574] ss:$8 sps:$4 sm:$0xff]   ;;  %v9805_v15 = vld [vmem:[%s13647_s4 + $0x670] ss:$8 sps:$4 sm:$0xff]  }
 0x204   : > { %4488 = vmatprep.subr.bf16.mxu1 %v9741_v13  ;;  %v9807_v13 = vld [vmem:[%s13647_s4 + $0x674] ss:$8 sps:$4 sm:$0xff]   ;;  %v9813_v19 = vld [vmem:[%s13647_s4 + $0x664] ss:$8 sps:$4 sm:$0xff]  }
 0x206   : > { %4438 = vmatpush1.bf16.msra.mxu0 %v9736_v20 }
 0x207   : > { %4489 = vmatpush1.bf16.msra.mxu1 %v9739_v22  ;;  %4439 = vmatprep.subr.bf16.mxu0 %v9744_v23  ;;  %v10130_v23 = vld [vmem:[%s13643_s0 + $0x18] ss:$56 sps:$4 sm:$0xff]  }
 0x208   : > { %4490 = vmatprep.subr.bf16.mxu1 %v9747_v25  ;;  %v10131_v25 = vld [vmem:[%s13643_s0 + $0x20] ss:$56 sps:$4 sm:$0xff]  }
 0x20a   : > { %4440 = vmatpush1.bf16.msra.mxu0 %v9742_v26 }
 0x20b   : > { %4491 = vmatpush1.bf16.msra.mxu1 %v9745_v29  ;;  %4441 = vmatprep.subr.bf16.mxu0 %v9750_v31  ;;  %v9808_v29 = vld [vmem:[%s13647_s4 + $0x560] ss:$8 sps:$4 sm:$0xff]  }
 0x20c   : > { %4492 = vmatprep.subr.bf16.mxu1 %v9753_v24  ;;  %v9811_v31 = vld [vmem:[%s13647_s4 + $0x660] ss:$8 sps:$4 sm:$0xff]  }
 0x20e   : > { %4442 = vmatpush1.bf16.msra.mxu0 %v9748_v32 }
 0x20f   : > { %4493 = vmatpush1.bf16.msra.mxu1 %v9751_v33  ;;  %4443 = vmatprep.subr.bf16.mxu0 %v9756_v27  ;;  %v9819_v33 = vld [vmem:[%s13647_s4 + $0x654] ss:$8 sps:$4 sm:$0xff]  }
 0x210   : > { %4494 = vmatprep.subr.bf16.mxu1 %v9759_v35 }
 0x212   : > { %4444 = vmatpush2.bf16.msra.mxu0 %v9754_v36 }
 0x213   : > { %4495 = vmatpush2.bf16.msra.mxu1 %v9757_v37  ;;  %4445 = vmatprep.subr.bf16.mxu0 %v9762_v38  ;;  %v9814_v38 = vld [vmem:[%s13647_s4 + $0x550] ss:$8 sps:$4 sm:$0xff]  }
 0x214   : > { %4496 = vmatprep.subr.bf16.mxu1 %v9765_v40  ;;  %v9817_v40 = vld [vmem:[%s13647_s4 + $0x650] ss:$8 sps:$4 sm:$0xff]  }
 0x216   : > { %4446 = vmatpush2.bf16.msra.mxu0 %v9760_v41 }
 0x217   : > { %4497 = vmatpush2.bf16.msra.mxu1 %v9763_v46  ;;  %4447 = vmatprep.subr.bf16.mxu0 %v9768_v39 }
 0x218   : > { %4498 = vmatprep.subr.bf16.mxu1 %v9771_v47 }
 0x21a   : > { %4448 = vmatpush2.bf16.msra.mxu0 %v9766_v54 }
 0x21b   : > { %4499 = vmatpush2.bf16.msra.mxu1 %v9769_v49  ;;  %4449 = vmatprep.subr.bf16.mxu0 %v9774_v55  ;;  %v9820_v49 = vld [vmem:[%s13647_s4 + $0x540] ss:$8 sps:$4 sm:$0xff]  }
 0x21c   : > { %4500 = vmatprep.subr.bf16.mxu1 %v9777_v50  ;;  %v9823_v55 = vld [vmem:[%s13647_s4 + $0x640] ss:$8 sps:$4 sm:$0xff]  }
 0x21e   : > { %4450 = vmatpush2.bf16.msra.mxu0 %v9772_v57 }
 0x21f   : > { %4501 = vmatpush2.bf16.msra.mxu1 %v9775_v59  ;;  %4451 = vmatprep.subr.bf16.mxu0 %v9780_v60  ;;  %v10132_v59 = vld [vmem:[%s13643_s0 + $0x2c] ss:$56 sps:$4 sm:$0xff]  }
 0x220   : > { %4502 = vmatprep.subr.bf16.mxu1 %v9783_v61  ;;  %v10133_v60 = vld [vmem:[%s13643_s0 + $0x34] ss:$56 sps:$4 sm:$0xff]  }
 0x222   : > { %4452 = vmatpush2.bf16.msra.mxu0 %v9778_v62 }
 0x223   : > { %4503 = vmatpush2.bf16.msra.mxu1 %v9781_v0  ;;  %4453 = vmatprep.subr.bf16.mxu0 %v9786_v3  ;;  %v9826_v0 = vld [vmem:[%s13647_s4 + $0x530] ss:$8 sps:$4 sm:$0xff]  }
 0x224   : > { %4504 = vmatprep.subr.bf16.mxu1 %v9789_v58  ;;  %v9829_v3 = vld [vmem:[%s13647_s4 + $0x630] ss:$8 sps:$4 sm:$0xff]   ;;  %v9834_v58 = vld [vmem:[%s13647_s4 + $0x524] ss:$8 sps:$4 sm:$0xff]  }
 0x226   : > { %4454 = vmatpush2.bf16.msra.mxu0 %v9784_v4  ;;  %v9837_v4 = vld [vmem:[%s13647_s4 + $0x624] ss:$8 sps:$4 sm:$0xff]  }
 0x227   : > { %4505 = vmatpush2.bf16.msra.mxu1 %v9787_v63  ;;  %4455 = vmatprep.subr.bf16.mxu0 %v9792_v5 }
 0x228   : > { %4506 = vmatprep.subr.bf16.mxu1 %v9795_v6  ;;  %v9832_v6 = vld [vmem:[%s13647_s4 + $0x520] ss:$8 sps:$4 sm:$0xff]  }
 0x22a   : > { %4456 = vmatpush2.bf16.msra.mxu0 %v9790_v8  ;;  %v9835_v8 = vld [vmem:[%s13647_s4 + $0x620] ss:$8 sps:$4 sm:$0xff]  }
 0x22b   : > { %4507 = vmatpush2.bf16.msra.mxu1 %v9793_v52  ;;  %4457 = vmatprep.subr.bf16.mxu0 %v9798_v9  ;;  %v9840_v52 = vld [vmem:[%s13647_s4 + $0x514] ss:$8 sps:$4 sm:$0xff]  }
 0x22c   : > { %4508 = vmatprep.subr.bf16.mxu1 %v9801_v11  ;;  %v9843_v9 = vld [vmem:[%s13647_s4 + $0x614] ss:$8 sps:$4 sm:$0xff]   ;;  %v9838_v11 = vld [vmem:[%s13647_s4 + $0x510] ss:$8 sps:$4 sm:$0xff]  }
 0x22e   : > { %4458 = vmatpush2.bf16.msra.mxu0 %v9796_v30  ;;  %v9841_v30 = vld [vmem:[%s13647_s4 + $0x610] ss:$8 sps:$4 sm:$0xff]  }
 0x22f   : > { %4509 = vmatpush2.bf16.msra.mxu1 %v9799_v12  ;;  %4529 = vmatprep.subr.bf16.mxu0 %v9804_v34  ;;  %v9846_v12 = vld [vmem:[%s13647_s4 + $0x504] ss:$8 sps:$4 sm:$0xff]  }
 0x230   : > { %4580 = vmatprep.subr.bf16.mxu1 %v9807_v13  ;;  %v9849_v34 = vld [vmem:[%s13647_s4 + $0x604] ss:$8 sps:$4 sm:$0xff]   ;;  %v9844_v13 = vld [vmem:[%s13647_s4 + $0x500] ss:$8 sps:$4 sm:$0xff]  }
 0x231   : > { %v2764_v20 = vpop.f32.mrf.mxu0  ;;  %4460 = vmatmul.mubr.bf16.vlgmr.msra.gmra.mxu0 %v10130_v23  ;;  %v9861_v23 = vld [vmem:[%s13647_s4 + $0x6e4] ss:$8 sps:$4 sm:$0xff]  }
 0x232   : > { %v2815_v22 = vpop.f32.mrf.mxu1  ;;  %4511 = vmatmul.mubr.bf16.vlgmr.msra.gmra.mxu1 %v10131_v25  ;;  %v2765_v26 = vadd.f32 %v2764_v20, %v12152_v42  ;;  %4530 = vmatpush1.bf16.msra.mxu0 %v9802_v14  ;;  %v9816_v42 = vld [vmem:[%s13647_s4 + $0x554] ss:$8 sps:$4 sm:$0xff]   ;;  %v9847_v14 = vld [vmem:[%s13647_s4 + $0x600] ss:$8 sps:$4 sm:$0xff]   ;;  %v9853_v20 = vld [vmem:[%s13647_s4 + $0x6f0] ss:$8 sps:$4 sm:$0xff]  }
 0x233   : > { %4581 = vmatpush1.bf16.msra.mxu1 %v9805_v15  ;;  %v12372_v24 = vpop.f32.mrf.mxu0  ;;  %4531 = vmatprep.subr.bf16.mxu0 %v9810_v18  ;;  %v9852_v15 = vld [vmem:[%s13647_s4 + $0x5f4] ss:$8 sps:$4 sm:$0xff]   ;;  %v9856_v25 = vld [vmem:[%s13647_s4 + $0x5e0] ss:$8 sps:$4 sm:$0xff]  }
 0x234   : > { %v12374_v32 = vpop.f32.mrf.mxu1  ;;  %4582 = vmatprep.subr.bf16.mxu1 %v9813_v19  ;;  %v12382_v27 = vadd.f32 %v2815_v22, %v2765_v26  ;;  %4469 = vmatprep.mubr.bf16.mxu0 %v11457_v44  ;;  %v9822_v44 = vld [vmem:[%s13647_s4 + $0x544] ss:$8 sps:$4 sm:$0xff]   ;;  %v9855_v18 = vld [vmem:[%s13647_s4 + $0x6f4] ss:$8 sps:$4 sm:$0xff]   ;;  %v9850_v19 = vld [vmem:[%s13647_s4 + $0x5f0] ss:$8 sps:$4 sm:$0xff]  }
 0x235   : > { %4520 = vmatprep.mubr.bf16.mxu1 %v11677_v1  ;;  %v2768_v35 = vpop.f32.mrf.mxu0  ;;  %v9825_v1 = vld [vmem:[%s13647_s4 + $0x644] ss:$8 sps:$4 sm:$0xff]   ;;  %v9859_v26 = vld [vmem:[%s13647_s4 + $0x6e0] ss:$8 sps:$4 sm:$0xff]  }
 0x236   : > { %v2819_v36 = vpop.f32.mrf.mxu1  ;;  %v2769_v37 = vadd.f32 %v2768_v35, %v12172_v43  ;;  %4532 = vmatpush1.bf16.msra.mxu0 %v9808_v29  ;;  %v9858_v22 = vld [vmem:[%s13647_s4 + $0x5e4] ss:$8 sps:$4 sm:$0xff]   ;;  %v9864_v29 = vld [vmem:[%s13647_s4 + $0x5d4] ss:$8 sps:$4 sm:$0xff]  }
 0x237   : > { %4583 = vmatpush1.bf16.msra.mxu1 %v9811_v31  ;;  %v12393_v41 = vpop.f32.mrf.mxu0  ;;  %4533 = vmatprep.subr.bf16.mxu0 %v9816_v42  ;;  %v9867_v31 = vld [vmem:[%s13647_s4 + $0x6d4] ss:$8 sps:$4 sm:$0xff]   ;;  %v9862_v42 = vld [vmem:[%s13647_s4 + $0x5d0] ss:$8 sps:$4 sm:$0xff]   ;;  %v9870_v35 = vld [vmem:[%s13647_s4 + $0x5c4] ss:$8 sps:$4 sm:$0xff]  }
 0x238   : > { %v12395_v46 = vpop.f32.mrf.mxu1  ;;  %4584 = vmatprep.subr.bf16.mxu1 %v9819_v33  ;;  %v12403_v43 = vadd.f32 %v2819_v36, %v2769_v37  ;;  %v9865_v33 = vld [vmem:[%s13647_s4 + $0x6d0] ss:$8 sps:$4 sm:$0xff]   ;;  %v9873_v36 = vld [vmem:[%s13647_s4 + $0x6c4] ss:$8 sps:$4 sm:$0xff]   ;;  %v9868_v37 = vld [vmem:[%s13647_s4 + $0x5c0] ss:$8 sps:$4 sm:$0xff]  }
 0x239   : > { %v2774_v39 = vpop.f32.mrf.mxu0  ;;  %4470 = vmatmul.mubr.bf16.gmra.mxu0 %v11481_v56  ;;  %v9828_v56 = vld [vmem:[%s13647_s4 + $0x534] ss:$8 sps:$4 sm:$0xff]  }
 0x23a   : > { %v2825_v47 = vpop.f32.mrf.mxu1  ;;  %4521 = vmatmul.mubr.bf16.gmra.mxu1 %v11695_v7  ;;  %v2775_v54 = vadd.f32 %v2774_v39, %v12193_v53  ;;  %4534 = vmatpush1.bf16.msra.mxu0 %v9814_v38  ;;  %v9831_v7 = vld [vmem:[%s13647_s4 + $0x634] ss:$8 sps:$4 sm:$0xff]   ;;  %v9871_v38 = vld [vmem:[%s13647_s4 + $0x6c0] ss:$8 sps:$4 sm:$0xff]   ;;  %v9877_v39 = vld [vmem:[%s13647_s4 + $0x6b0] ss:$8 sps:$4 sm:$0xff]  }
 0x23b   : > { %4585 = vmatpush1.bf16.msra.mxu1 %v9817_v40  ;;  %v12414_v50 = vpop.f32.mrf.mxu0  ;;  %4535 = vmatprep.subr.bf16.mxu0 %v9822_v44  ;;  %v9876_v40 = vld [vmem:[%s13647_s4 + $0x5b4] ss:$8 sps:$4 sm:$0xff]  }
 0x23c   : > { %v12416_v57 = vpop.f32.mrf.mxu1  ;;  %4586 = vmatprep.subr.bf16.mxu1 %v9825_v1  ;;  %v12424_v53 = vadd.f32 %v2825_v47, %v2775_v54  ;;  %4561 = vmatprep.mubr.bf16.mxu0 %v10132_v59  ;;  %v9879_v44 = vld [vmem:[%s13647_s4 + $0x6b4] ss:$8 sps:$4 sm:$0xff]   ;;  %v9874_v1 = vld [vmem:[%s13647_s4 + $0x5b0] ss:$8 sps:$4 sm:$0xff]   ;;  %v9882_v47 = vld [vmem:[%s13647_s4 + $0x5a4] ss:$8 sps:$4 sm:$0xff]  }
 0x23d   : > { %4612 = vmatprep.mubr.bf16.mxu1 %v10133_v60  ;;  %v2778_v61 = vpop.f32.mrf.mxu0  ;;  %v9885_v54 = vld [vmem:[%s13647_s4 + $0x6a4] ss:$8 sps:$4 sm:$0xff]   ;;  %v9886_v59 = vld [vmem:[%s13647_s4 + $0x590] ss:$8 sps:$4 sm:$0xff]  }
 0x23e   : > { %v2829_v62 = vpop.f32.mrf.mxu1  ;;  %4536 = vmatpush1.bf16.msra.mxu0 %v9820_v49  ;;  %v9880_v49 = vld [vmem:[%s13647_s4 + $0x5a0] ss:$8 sps:$4 sm:$0xff]   ;;  %v9889_v60 = vld [vmem:[%s13647_s4 + $0x690] ss:$8 sps:$4 sm:$0xff]   ;;  %v9894_v61 = vld [vmem:[%s13647_s4 + $0x584] ss:$8 sps:$4 sm:$0xff]  }
 0x23f   : > { %4587 = vmatpush1.bf16.msra.mxu1 %v9823_v55  ;;  %4537 = vmatprep.subr.bf16.mxu0 %v9828_v56  ;;  %v2779_v63 = vpop.f32.mrf.mxu0  ;;  %v9883_v55 = vld [vmem:[%s13647_s4 + $0x6a0] ss:$8 sps:$4 sm:$0xff]   ;;  %v9888_v56 = vld [vmem:[%s13647_s4 + $0x594] ss:$8 sps:$4 sm:$0xff]   ;;  %v9897_v62 = vld [vmem:[%s13647_s4 + $0x684] ss:$8 sps:$4 sm:$0xff]  }
 0x240   : > { %4588 = vmatprep.subr.bf16.mxu1 %v9831_v7  ;;  %v2830_v5 = vpop.f32.mrf.mxu1  ;;  %v9891_v7 = vld [vmem:[%s13647_s4 + $0x694] ss:$8 sps:$4 sm:$0xff]  }
 0x242   : > { %4538 = vmatpush1.bf16.msra.mxu0 %v9826_v0  ;;  %v9892_v0 = vld [vmem:[%s13647_s4 + $0x580] ss:$8 sps:$4 sm:$0xff]  }
 0x243   : > { %4589 = vmatpush1.bf16.msra.mxu1 %v9829_v3  ;;  %4539 = vmatprep.subr.bf16.mxu0 %v9834_v58  ;;  %v9895_v3 = vld [vmem:[%s13647_s4 + $0x680] ss:$8 sps:$4 sm:$0xff]   ;;  %v2767_v58 = vadd.f32 %v12372_v24, %v12169_v48 }
 0x244   : > { %4590 = vmatprep.subr.bf16.mxu1 %v9837_v4  ;;  %v2771_v4 = vadd.f32 %v12393_v41, %v12189_v51 }
 0x246   : > { %4540 = vmatpush1.bf16.msra.mxu0 %v9832_v6  ;;  %v10134_v6 = vld [vmem:[%s13643_s0 + $0x28] ss:$56 sps:$4 sm:$0xff]  }
 0x247   : > { %4591 = vmatpush1.bf16.msra.mxu1 %v9835_v8  ;;  %4541 = vmatprep.subr.bf16.mxu0 %v9840_v52  ;;  %v10135_v8 = vld [vmem:[%s13643_s0 + $0x30] ss:$56 sps:$4 sm:$0xff]   ;;  %v2818_v52 = vadd.f32 %v12374_v32, %v2767_v58 }
 0x248   : > { %4592 = vmatprep.subr.bf16.mxu1 %v9843_v9  ;;  %v2822_v9 = vadd.f32 %v12395_v46, %v2771_v4 }
 0x24a   : > { %4542 = vmatpush1.bf16.msra.mxu0 %v9838_v11 }
 0x24b   : > { %4593 = vmatpush1.bf16.msra.mxu1 %v9841_v30  ;;  %4543 = vmatprep.subr.bf16.mxu0 %v9846_v12  ;;  %v2777_v12 = vadd.f32 %v12414_v50, %v12213_v17 }
 0x24c   : > { %4594 = vmatprep.subr.bf16.mxu1 %v9849_v34 }
 0x24d   : > { %v2828_v17 = vadd.f32 %v12416_v57, %v2777_v12 }
 0x24e   : > { %4544 = vmatpush1.bf16.msra.mxu0 %v9844_v13 }
 0x24f   : > { %4595 = vmatpush1.bf16.msra.mxu1 %v9847_v14  ;;  %4545 = vmatprep.subr.bf16.mxu0 %v9852_v15 }
 0x250   : > { %4596 = vmatprep.subr.bf16.mxu1 %v9855_v18 }
 0x252   : > { %4546 = vmatpush2.bf16.msra.mxu0 %v9850_v19 }
 0x253   : > { %4597 = vmatpush2.bf16.msra.mxu1 %v9853_v20  ;;  %4547 = vmatprep.subr.bf16.mxu0 %v9858_v22 }
 0x254   : > { %4598 = vmatprep.subr.bf16.mxu1 %v9861_v23 }
 0x256   : > { %4548 = vmatpush2.bf16.msra.mxu0 %v9856_v25 }
 0x257   : > { %4599 = vmatpush2.bf16.msra.mxu1 %v9859_v26  ;;  %4549 = vmatprep.subr.bf16.mxu0 %v9864_v29 }
 0x258   : > { %4600 = vmatprep.subr.bf16.mxu1 %v9867_v31 }
 0x25a   : > { %4550 = vmatpush2.bf16.msra.mxu0 %v9862_v42 }
 0x25b   : > { %4601 = vmatpush2.bf16.msra.mxu1 %v9865_v33  ;;  %4551 = vmatprep.subr.bf16.mxu0 %v9870_v35  ;;  %v3142_v33 = vld [vmem:[%s13648_s5] sm:$0x3] }
 0x25c   : > { %4602 = vmatprep.subr.bf16.mxu1 %v9873_v36  ;;  %v3147_v35 = vrot.slane %v3142_v33, %v11872_v16  ;;  %v3151_v36 = vrot.slane %v3142_v33, %v11886_v21 }
 0x25e   : > { %4552 = vmatpush2.bf16.msra.mxu0 %v9868_v37 }
 0x25f   : > { %4603 = vmatpush2.bf16.msra.mxu1 %v9871_v38  ;;  %4553 = vmatprep.subr.bf16.mxu0 %v9876_v40 }
 0x260   : > { %4604 = vmatprep.subr.bf16.mxu1 %v9879_v44 }
 0x262   : > { %4554 = vmatpush2.bf16.msra.mxu0 %v9874_v1 }
 0x263   : > { %4605 = vmatpush2.bf16.msra.mxu1 %v9877_v39  ;;  %4555 = vmatprep.subr.bf16.mxu0 %v9882_v47 }
 0x264   : > { %4606 = vmatprep.subr.bf16.mxu1 %v9885_v54 }
 0x266   : > { %4556 = vmatpush2.bf16.msra.mxu0 %v9880_v49 }
 0x267   : > { %4607 = vmatpush2.bf16.msra.mxu1 %v9883_v55  ;;  %4557 = vmatprep.subr.bf16.mxu0 %v9888_v56 }
 0x268   : > { %4608 = vmatprep.subr.bf16.mxu1 %v9891_v7 }
 0x26a   : > { %4558 = vmatpush2.bf16.msra.mxu0 %v9886_v59 }
 0x26b   : > { %4609 = vmatpush2.bf16.msra.mxu1 %v9889_v60  ;;  %4559 = vmatprep.subr.bf16.mxu0 %v9894_v61 }
 0x26c   : > { %4610 = vmatprep.subr.bf16.mxu1 %v9897_v62 }
 0x26e   : > { %4560 = vmatpush2.bf16.msra.mxu0 %v9892_v0 }
 0x26f   : > { %4611 = vmatpush2.bf16.msra.mxu1 %v9895_v3 }
 0x271   : > { %v2866_v63 = vpop.f32.mrf.mxu0  ;;  %4562 = vmatmul.mubr.bf16.vlgmr.msra.gmra.mxu0 %v10134_v6 }
 0x272   : > { %v4308_v5 = vpop.f32.mrf.mxu1  ;;  %4613 = vmatmul.mubr.bf16.vlgmr.msra.gmra.mxu1 %v10135_v8  ;;  %v2867_v48 = vadd.f32 %v2866_v63, %v12382_v27  ;;  %4571 = vmatprep.mubr.bf16.mxu0 %v11679_v2 }
 0x273   : > { %4622 = vmatprep.mubr.bf16.mxu1 %v11906_v28  ;;  %v2868_v51 = vpop.f32.mrf.mxu0  ;;  %v4309_v37 = vadd.f32 %v4308_v5, %v3147_v35 }
 0x274   : > { %v4310_v24 = vpop.f32.mrf.mxu1  ;;  %v2869_v41 = vadd.f32 %v2868_v51, %v2818_v52  ;;  %v2883_v34 = vmax.f32 %v2867_v48, 0.0 }
 0x275   : > { %v2870_v11 = vpop.f32.mrf.mxu0  ;;  %v4311_v44 = vadd.f32 %v4310_v24, %v3151_v36 }
 0x276   : > { %v4312_v30 = vpop.f32.mrf.mxu1  ;;  %v2884_v32 = vmax.f32 %v2869_v41, 0.0  ;;  %v2871_v27 = vadd.f32 %v2870_v11, %v12403_v43 }
 0x277   : > { %v2872_v28 = vpop.f32.mrf.mxu0  ;;  %v4313_v54 = vadd.f32 %v4312_v30, %v3147_v35 }
 0x278   : > { %v4314_v13 = vpop.f32.mrf.mxu1  ;;  %v9153_v14 = vpack.c.bf16 %v2884_v32, %v2883_v34  ;;  %v2873_v15 = vadd.f32 %v2872_v28, %v2822_v9  ;;  %v2885_v43 = vmax.f32 %v2871_v27, 0.0  ;;  %v10410_v32 = vmov 0  }
 0x279   : > { %v2876_v18 = vpop.f32.mrf.mxu0  ;;  %4572 = vmatmul.mubr.bf16.gmra.mxu0 %v11703_v10  ;;  %v4315_v59 = vadd.f32 %v4314_v13, %v3151_v36 }
 0x27a   : > { %4623 = vmatmul.mubr.bf16.gmra.mxu1 %v11929_v45  ;;  %v4318_v46 = vpop.f32.mrf.mxu1  ;;  %2912 = vst.msk [vmem:[#allocation2] sm:$0xff] %vm12588_vm2, %v9153_v14  ;;  %v2886_v50 = vmax.f32 %v2873_v15, 0.0  ;;  %v2877_v19 = vadd.f32 %v2876_v18, %v12424_v53  ;;  %4722 = vmatprep.mubr.bf16.mxu0 %v10410_v32 }
 0x27b   : > { %v2878_v20 = vpop.f32.mrf.mxu0  ;;  %v4319_v3 = vadd.f32 %v4318_v46, %v3147_v35 }
 0x27c   : > { %v4320_v22 = vpop.f32.mrf.mxu1  ;;  %v9154_v23 = vpack.c.bf16 %v2886_v50, %v2885_v43  ;;  %v2879_v25 = vadd.f32 %v2878_v20, %v2828_v17  ;;  %v2887_v45 = vmax.f32 %v2877_v19, 0.0 }
 0x27d   : > { %v2880_v26 = vpop.f32.mrf.mxu0  ;;  %v4321_v6 = vadd.f32 %v4320_v22, %v3151_v36 }
 0x27e   : > { %v4322_v10 = vpop.f32.mrf.mxu1  ;;  %2913 = vst.msk [vmem:[#allocation2 + $0x8] sm:$0xff] %vm12588_vm2, %v9154_v23  ;;  %v2888_v57 = vmax.f32 %v2879_v25, 0.0 }
 0x27f   : > { %v2881_v31 = vpop.f32.mrf.mxu0 }
 0x280   : > { %v4323_v53 = vpop.f32.mrf.mxu1  ;;  %v9155_v42 = vpack.c.bf16 %v2888_v57, %v2887_v45 }
 0x282   : > { %2917 = vst.msk [vmem:[#allocation2 + $0x10] sm:$0x11] %vm12601_vm5, %v9155_v42 }
 0x2b1   : > { %v4359_v38 = vpop.f32.mrf.mxu0 }
 0x2b2   : > { %v4410_v40 = vpop.f32.mrf.mxu1  ;;  %v4360_v1 = vadd.f32 %v4359_v38, %v4309_v37  ;;  %v9938_v38 = vld [vmem:[%s13650_s7 + $0x70] ss:$8 sps:$4 sm:$0xff]  }
 0x2b3   : > { %v4361_v39 = vpop.f32.mrf.mxu0 }
 0x2b4   : > { %v4412_v47 = vpop.f32.mrf.mxu1  ;;  %v4411_v49 = vadd.f32 %v4410_v40, %v4360_v1  ;;  %v4362_v55 = vadd.f32 %v4361_v39, %v4311_v44  ;;  %v9940_v40 = vld [vmem:[%s13650_s7 + $0x74] ss:$8 sps:$4 sm:$0xff]   ;;  %v9943_v44 = vld [vmem:[%s13650_s7 + $0x64] ss:$8 sps:$4 sm:$0xff]   ;;  %v9941_v1 = vld [vmem:[%s13650_s7 + $0x60] ss:$8 sps:$4 sm:$0xff]  }
 0x2b5   : > { %v4363_v56 = vpop.f32.mrf.mxu0  ;;  %4896 = vmatprep.subr.bf16.mxu1 %v9940_v40  ;;  %v9946_v39 = vld [vmem:[%s13650_s7 + $0x54] ss:$8 sps:$4 sm:$0xff]  }
 0x2b6   : > { %v4414_v7 = vpop.f32.mrf.mxu1  ;;  %v4413_v60 = vadd.f32 %v4412_v47, %v4362_v55  ;;  %v4364_v61 = vadd.f32 %v4363_v56, %v4313_v54  ;;  %4897 = vmatpush1.bf16.msra.mxu1 %v9938_v38  ;;  %v9944_v47 = vld [vmem:[%s13650_s7 + $0x50] ss:$8 sps:$4 sm:$0xff]   ;;  %v9949_v54 = vld [vmem:[%s13650_s7 + $0x44] ss:$8 sps:$4 sm:$0xff]   ;;  %v9952_v55 = vld [vmem:[%s13650_s7 + $0x34] ss:$8 sps:$4 sm:$0xff]  }
 0x2b7   : > { %v4365_v62 = vpop.f32.mrf.mxu0  ;;  %4898 = vmatprep.subr.bf16.mxu1 %v9943_v44  ;;  %v9950_v56 = vld [vmem:[%s13650_s7 + $0x30] ss:$8 sps:$4 sm:$0xff]   ;;  %v9901_v44 = vld [vmem:[%s13650_s7 + $0x134] ss:$8 sps:$4 sm:$0xff]  }
 0x2b8   : > { %v4416_v0 = vpop.f32.mrf.mxu1  ;;  %v4415_v58 = vadd.f32 %v4414_v7, %v4364_v61  ;;  %v4366_v4 = vadd.f32 %v4365_v62, %v4315_v59  ;;  %v9955_v7 = vld [vmem:[%s13650_s7 + $0x24] ss:$8 sps:$4 sm:$0xff]   ;;  %v9953_v59 = vld [vmem:[%s13650_s7 + $0x20] ss:$8 sps:$4 sm:$0xff]   ;;  %v9956_v61 = vld [vmem:[%s13650_s7 + $0x10] ss:$8 sps:$4 sm:$0xff]  }
 0x2b9   : > { %v4369_v63 = vpop.f32.mrf.mxu0  ;;  %v9961_v62 = vld [vmem:[%s13650_s7 + $0x4] ss:$8 sps:$4 sm:$0xff]  }
 0x2ba   : > { %v4420_v5 = vpop.f32.mrf.mxu1  ;;  %v4417_v8 = vadd.f32 %v4416_v0, %v4366_v4  ;;  %v4370_v52 = vadd.f32 %v4369_v63, %v4319_v3  ;;  %4899 = vmatpush1.bf16.msra.mxu1 %v9941_v1  ;;  %v9959_v0 = vld [vmem:[%s13650_s7] ss:$8 sps:$4 sm:$0xff]   ;;  %v9964_v3 = vld [vmem:[%s13650_s7 + $0xb4] ss:$8 sps:$4 sm:$0xff]  }
 0x2bb   : > { %v4371_v48 = vpop.f32.mrf.mxu0  ;;  %4900 = vmatprep.subr.bf16.mxu1 %v9946_v39  ;;  %v9898_v1 = vld [vmem:[%s13649_s6] sm:$0xff]   ;;  %v9899_v39 = vld [vmem:[%s13650_s7 + $0x130] ss:$8 sps:$4 sm:$0xff]  }
 0x2bc   : > { %v4422_v51 = vpop.f32.mrf.mxu1  ;;  %v4372_v24 = vadd.f32 %v4371_v48, %v4321_v6  ;;  %v4421_v41 = vadd.f32 %v4420_v5, %v4370_v52  ;;  %v9967_v48 = vld [vmem:[%s13650_s7 + $0xa4] ss:$8 sps:$4 sm:$0xff]  }
 0x2bd   : > { %v4373_v9 = vpop.f32.mrf.mxu0 }
 0x2be   : > { %v4424_v11 = vpop.f32.mrf.mxu1  ;;  %v12612_v30 = vadd.f32 %v4422_v51, %v4372_v24  ;;  %4901 = vmatpush1.bf16.msra.mxu1 %v9944_v47  ;;  %v9904_v47 = vld [vmem:[%s13650_s7 + $0x124] ss:$8 sps:$4 sm:$0xff]  }
 0x2bf   : > { %v4374_v12 = vpop.f32.mrf.mxu0  ;;  %4902 = vmatprep.subr.bf16.mxu1 %v9949_v54  ;;  %v9902_v54 = vld [vmem:[%s13650_s7 + $0x120] ss:$8 sps:$4 sm:$0xff]  }
 0x2c0   : > { %v4425_v34 = vpop.f32.mrf.mxu1 }
 0x2f1   : > { %v4461_v27 = vpop.f32.mrf.mxu0 }
 0x2f2   : > { %v4512_v28 = vpop.f32.mrf.mxu1  ;;  %v4462_v13 = vadd.f32 %v4461_v27, %v4411_v49  ;;  %v9947_v49 = vld [vmem:[%s13650_s7 + $0x40] ss:$8 sps:$4 sm:$0xff]  }
 0x2f3   : > { %v4463_v14 = vpop.f32.mrf.mxu0  ;;  %4903 = vmatpush1.bf16.msra.mxu1 %v9947_v49  ;;  %v9908_v49 = vld [vmem:[%s13650_s7 + $0x114] ss:$8 sps:$4 sm:$0xff]  }
 0x2f4   : > { %v4514_v15 = vpop.f32.mrf.mxu1  ;;  %v4513_v18 = vadd.f32 %v4512_v28, %v4462_v13  ;;  %v4464_v46 = vadd.f32 %v4463_v14, %v4413_v60  ;;  %4904 = vmatprep.subr.bf16.mxu1 %v9952_v55  ;;  %v9958_v60 = vld [vmem:[%s13650_s7 + $0x14] ss:$8 sps:$4 sm:$0xff]   ;;  %v9965_v28 = vld [vmem:[%s13650_s7 + $0xa0] ss:$8 sps:$4 sm:$0xff]  }
 0x2f5   : > { %v4465_v17 = vpop.f32.mrf.mxu0  ;;  %v9905_v55 = vld [vmem:[%s13649_s6 + $0x8] ss:$0 sps:$4 sm:$0x11]  }
 0x2f6   : > { %v4516_v43 = vpop.f32.mrf.mxu1  ;;  %v4515_v50 = vadd.f32 %v4514_v15, %v4464_v46  ;;  %v4466_v19 = vadd.f32 %v4465_v17, %v4415_v58 }
 0x2f7   : > { %v4467_v20 = vpop.f32.mrf.mxu0  ;;  %4905 = vmatpush1.bf16.msra.mxu1 %v9950_v56  ;;  %v9906_v56 = vld [vmem:[%s13650_s7 + $0x110] ss:$8 sps:$4 sm:$0xff]  }
 0x2f8   : > { %v4518_v22 = vpop.f32.mrf.mxu1  ;;  %v4517_v23 = vadd.f32 %v4516_v43, %v4466_v19  ;;  %v4468_v25 = vadd.f32 %v4467_v20, %v4417_v8  ;;  %4906 = vmatprep.subr.bf16.mxu1 %v9955_v7  ;;  %v9962_v8 = vld [vmem:[%s13650_s7 + $0xb0] ss:$8 sps:$4 sm:$0xff]   ;;  %v9911_v7 = vld [vmem:[%s13650_s7 + $0x104] ss:$8 sps:$4 sm:$0xff]  }
 0x2f9   : > { %v4471_v26 = vpop.f32.mrf.mxu0 }
 0x2fa   : > { %v4522_v10 = vpop.f32.mrf.mxu1  ;;  %v4519_v45 = vadd.f32 %v4518_v22, %v4468_v25  ;;  %v4472_v57 = vadd.f32 %v4471_v26, %v4421_v41 }
 0x2fb   : > { %v4473_v31 = vpop.f32.mrf.mxu0  ;;  %4907 = vmatpush1.bf16.msra.mxu1 %v9953_v59  ;;  %v9909_v59 = vld [vmem:[%s13650_s7 + $0x100] ss:$8 sps:$4 sm:$0xff]  }
 0x2fc   : > { %v4524_v53 = vpop.f32.mrf.mxu1  ;;  %v12615_v42 = vadd.f32 %v4522_v10, %v4472_v57  ;;  %4908 = vmatprep.subr.bf16.mxu1 %v9958_v60  ;;  %v4474_v51 = vadd.f32 %v4473_v31, %v12612_v30  ;;  %v9914_v60 = vld [vmem:[%s13650_s7 + $0xf4] ss:$8 sps:$4 sm:$0xff]  }
 0x2fd   : > { %v4475_v33 = vpop.f32.mrf.mxu0 }
 0x2fe   : > { %v4526_v35 = vpop.f32.mrf.mxu1  ;;  %v4525_v15 = vadd.f32 %v4524_v53, %v4474_v51  ;;  %v9930_v51 = vld [vmem:[%s13650_s7 + $0x150] ss:$8 sps:$4 sm:$0xff]  }
 0x2ff   : > { %v4476_v36 = vpop.f32.mrf.mxu0  ;;  %4909 = vmatpush1.bf16.msra.mxu1 %v9956_v61  ;;  %v9912_v61 = vld [vmem:[%s13650_s7 + $0xf0] ss:$8 sps:$4 sm:$0xff]  }
 0x300   : > { %v4527_v37 = vpop.f32.mrf.mxu1  ;;  %4910 = vmatprep.subr.bf16.mxu1 %v9961_v62  ;;  %v9917_v62 = vld [vmem:[%s13650_s7 + $0xe4] ss:$8 sps:$4 sm:$0xff]  }
 0x303   : > { %4911 = vmatpush1.bf16.msra.mxu1 %v9959_v0  ;;  %v9915_v0 = vld [vmem:[%s13650_s7 + $0xe0] ss:$8 sps:$4 sm:$0xff]  }
 0x304   : > { %4920 = vmatprep.subr.bf16.mxu1 %v9964_v3  ;;  %v9920_v3 = vld [vmem:[%s13650_s7 + $0xd4] ss:$8 sps:$4 sm:$0xff]  }
 0x307   : > { %4921 = vmatpush2.bf16.msra.mxu1 %v9962_v8  ;;  %v9929_v8 = vld [vmem:[%s13650_s7 + $0x164] ss:$8 sps:$4 sm:$0xff]  }
 0x308   : > { %4922 = vmatprep.subr.bf16.mxu1 %v9967_v48  ;;  %v9932_v48 = vld [vmem:[%s13650_s7 + $0x154] ss:$8 sps:$4 sm:$0xff]  }
 0x30b   : > { %4923 = vmatpush2.bf16.msra.mxu1 %v9965_v28  ;;  %v9971_v28 = vld [vmem:[%s13650_s7 + $0x80] ss:$8 sps:$4 sm:$0xff]  }
 0x331   : > { %v4563_v58 = vpop.f32.mrf.mxu0 }
 0x332   : > { %v4614_v4 = vpop.f32.mrf.mxu1  ;;  %v4564_v63 = vadd.f32 %v4563_v58, %v4513_v18  ;;  %v9918_v58 = vld [vmem:[%s13650_s7 + $0xd0] ss:$8 sps:$4 sm:$0xff]  }
 0x333   : > { %v4565_v5 = vpop.f32.mrf.mxu0 }
 0x334   : > { %v4616_v6 = vpop.f32.mrf.mxu1  ;;  %v4566_v52 = vadd.f32 %v4565_v5, %v4515_v50  ;;  %v4615_v9 = vadd.f32 %v4614_v4, %v4564_v63  ;;  %v9923_v4 = vld [vmem:[%s13650_s7 + $0xc4] ss:$8 sps:$4 sm:$0xff]   ;;  %v9921_v63 = vld [vmem:[%s13650_s7 + $0xc0] ss:$8 sps:$4 sm:$0xff]   ;;  %v9926_v5 = vld [vmem:[%s13650_s7 + $0x174] ss:$8 sps:$4 sm:$0xff]  }
 0x335   : > { %v4567_v24 = vpop.f32.mrf.mxu0 }
 0x336   : > { %v4618_v41 = vpop.f32.mrf.mxu1  ;;  %v4568_v11 = vadd.f32 %v4567_v24, %v4517_v23  ;;  %v4617_v12 = vadd.f32 %v4616_v6, %v4566_v52  ;;  %v4631_v17 = vmax.f32 %v4615_v9, 0.0  ;;  %v9924_v6 = vld [vmem:[%s13650_s7 + $0x170] ss:$8 sps:$4 sm:$0xff]   ;;  %v9927_v52 = vld [vmem:[%s13650_s7 + $0x160] ss:$8 sps:$4 sm:$0xff]  }
 0x337   : > { %v4569_v34 = vpop.f32.mrf.mxu0  ;;  %v9935_v24 = vld [vmem:[%s13650_s7 + $0x144] ss:$8 sps:$4 sm:$0xff]  }
 0x338   : > { %v4620_v27 = vpop.f32.mrf.mxu1  ;;  %v4619_v13 = vadd.f32 %v4618_v41, %v4568_v11  ;;  %v4570_v14 = vadd.f32 %v4569_v34, %v4519_v45  ;;  %v4632_v19 = vmax.f32 %v4617_v12, 0.0  ;;  %v9933_v41 = vld [vmem:[%s13650_s7 + $0x140] ss:$8 sps:$4 sm:$0xff]   ;;  %v9936_v9 = vld [vmem:[%s13649_s6 + $0xc] sm:$0xff]   ;;  %v9970_v11 = vld [vmem:[%s13650_s7 + $0x94] ss:$8 sps:$4 sm:$0xff]  }
 0x339   : > { %v4573_v18 = vpop.f32.mrf.mxu0  ;;  %v9968_v12 = vld [vmem:[%s13650_s7 + $0x90] ss:$8 sps:$4 sm:$0xff]   ;;  %4924 = vmatprep.subr.bf16.mxu1 %v9970_v11  ;;  %v9937_v34 = vld [vmem:[%s13649_s6 + $0x14] ss:$0 sps:$4 sm:$0x11]  }
 0x33a   : > { %v4624_v46 = vpop.f32.mrf.mxu1  ;;  %v4633_v30 = vmax.f32 %v4619_v13, 0.0  ;;  %v4621_v43 = vadd.f32 %v4620_v27, %v4570_v14  ;;  %v4574_v50 = vadd.f32 %v4573_v18, %v12615_v42  ;;  %4925 = vmatpush2.bf16.msra.mxu1 %v9968_v12  ;;  %v9973_v27 = vld [vmem:[%s13650_s7 + $0x84] ss:$8 sps:$4 sm:$0xff]   ;;  %v9974_v13 = vld [vmem:[%s13650_s7 + $0x1f0] ss:$8 sps:$4 sm:$0xff]  }
 0x33b   : > { %v4575_v20 = vpop.f32.mrf.mxu0  ;;  %4926 = vmatprep.subr.bf16.mxu1 %v9973_v27  ;;  %v9976_v14 = vld [vmem:[%s13650_s7 + $0x1f4] ss:$8 sps:$4 sm:$0xff]   ;;  %v9977_v18 = vld [vmem:[%s13650_s7 + $0x1e0] ss:$8 sps:$4 sm:$0xff]  }
 0x33c   : > { %v4626_v22 = vpop.f32.mrf.mxu1  ;;  %v12679_v23 = vpack.c.bf16 %v4633_v30, %v4631_v17  ;;  %v4634_v25 = vmax.f32 %v4621_v43, 0.0  ;;  %v4625_v26 = vadd.f32 %v4624_v46, %v4574_v50  ;;  %v4576_v10 = vadd.f32 %v4575_v20, %v4525_v15  ;;  %v9979_v15 = vld [vmem:[%s13650_s7 + $0x1e4] ss:$8 sps:$4 sm:$0xff]   ;;  %v9982_v46 = vld [vmem:[%s13650_s7 + $0x1d4] ss:$8 sps:$4 sm:$0xff]  }
 0x33d   : > { %v4577_v57 = vpop.f32.mrf.mxu0  ;;  %v9980_v17 = vld [vmem:[%s13650_s7 + $0x1d0] ss:$8 sps:$4 sm:$0xff]   ;;  %v9985_v30 = vld [vmem:[%s13650_s7 + $0x1c4] ss:$8 sps:$4 sm:$0xff]   ;;  %v9983_v43 = vld [vmem:[%s13650_s7 + $0x1c0] ss:$8 sps:$4 sm:$0xff]  }
 0x33e   : > { %v4628_v45 = vpop.f32.mrf.mxu1  ;;  %v12681_v31 = vpack.c.bf16 %v4634_v25, %v4632_v19  ;;  %v4635_v53 = vmax.f32 %v4625_v26, 0.0  ;;  %v4627_v33 = vadd.f32 %v4626_v22, %v4576_v10  ;;  %4927 = vmatpush2.bf16.msra.mxu1 %v9971_v28  ;;  %v9988_v50 = vld [vmem:[%s13650_s7 + $0x1b4] ss:$8 sps:$4 sm:$0xff]   ;;  %v9986_v19 = vld [vmem:[%s13650_s7 + $0x1b0] ss:$8 sps:$4 sm:$0xff]  }
 0x33f   : > { %v4578_v35 = vpop.f32.mrf.mxu0  ;;  %v9991_v20 = vld [vmem:[%s13650_s7 + $0x1a4] ss:$8 sps:$4 sm:$0xff]   ;;  %v9989_v22 = vld [vmem:[%s13650_s7 + $0x1a0] ss:$8 sps:$4 sm:$0xff]   ;;  %v9992_v25 = vld [vmem:[%s13650_s7 + $0x190] ss:$8 sps:$4 sm:$0xff]  }
 0x340   : > { %v4629_v36 = vpop.f32.mrf.mxu1  ;;  %v12683_v37 = vpack.c.bf16 %v4635_v53, %v4635_v53  ;;  %v4636_v42 = vmax.f32 %v4627_v33, 0.0  ;;  %v9997_v26 = vld [vmem:[%s13650_s7 + $0x184] ss:$8 sps:$4 sm:$0xff]   ;;  %v9995_v10 = vld [vmem:[%s13650_s7 + $0x180] ss:$8 sps:$4 sm:$0xff]  }
 0x341   : > { %v10000_v57 = vld [vmem:[%s13650_s7 + $0x234] ss:$8 sps:$4 sm:$0xff]   ;;  %v9998_v45 = vld [vmem:[%s13650_s7 + $0x230] ss:$8 sps:$4 sm:$0xff]   ;;  %v10001_v53 = vld [vmem:[%s13650_s7 + $0x220] ss:$8 sps:$4 sm:$0xff]  }
 0x342   : > { %v12685_v38 = vpack.c.bf16 %v4636_v42, %v4636_v42  ;;  %v12691_v40 = vsel %vm2914_vm3, %v12683_v37, 0  ;;  %v10006_v33 = vld [vmem:[%s13650_s7 + $0x214] ss:$8 sps:$4 sm:$0xff]   ;;  %v10004_v35 = vld [vmem:[%s13650_s7 + $0x210] ss:$8 sps:$4 sm:$0xff]  }
 0x343   : > { %v10009_v36 = vld [vmem:[%s13650_s7 + $0x204] ss:$8 sps:$4 sm:$0xff]   ;;  %v10012_v27 = vld [vmem:[%s13652_s9 + $0x134] ss:$8 sps:$4 sm:$0xff]  }
 0x344   : > { %8697 = vmatprep.subr.msk.bf16.mxu0 %vm2914_vm3, %v12685_v38  ;;  %v10015_v28 = vld [vmem:[%s13652_s9 + $0x124] ss:$8 sps:$4 sm:$0xff]  }
 0x345   : > { %4703 = vmatpush1.bf16.msra.mxu0 %v12691_v40 }
 0x346   : > { %4704 = vmatprep.subr.bf16.mxu0 %v12681_v31 }
 0x349   : > { %4705 = vmatpush1.bf16.msra.mxu0 %v12679_v23 }
 0x34a   : > { %5072 = vmatprep.subr.bf16.mxu0 %v9901_v44 }
 0x34c   : > { %8698 = vmatmul.mubr.msk.bf16.vlgmr.msra.gmra.mxu0 %vm4677_vm6, %v9898_v1 }
 0x34d   : > { %5073 = vmatpush1.bf16.msra.mxu0 %v9899_v39  ;;  %4732 = vmatprep.mubr.bf16.mxu0 %v10410_v32 }
 0x34e   : > { %5074 = vmatprep.subr.bf16.mxu0 %v9904_v47 }
 0x351   : > { %5075 = vmatpush1.bf16.msra.mxu0 %v9902_v54 }
 0x352   : > { %5076 = vmatprep.subr.bf16.mxu0 %v9908_v49 }
 0x354   : > { %8699 = vmatmul.mubr.msk.bf16.gmra.mxu0 %vm4677_vm6, %v9905_v55 }
 0x355   : > { %5077 = vmatpush1.bf16.msra.mxu0 %v9906_v56  ;;  %8750 = vmatprep.mubr.msk.bf16.mxu0 %vm4889_vm7, %v12681_v31 }
 0x356   : > { %5078 = vmatprep.subr.bf16.mxu0 %v9911_v7 }
 0x359   : > { %5079 = vmatpush1.bf16.msra.mxu0 %v9909_v59 }
 0x35a   : > { %5080 = vmatprep.subr.bf16.mxu0 %v9914_v60 }
 0x35d   : > { %5081 = vmatpush1.bf16.msra.mxu0 %v9912_v61 }
 0x35e   : > { %5082 = vmatprep.subr.bf16.mxu0 %v9917_v62 }
 0x361   : > { %5083 = vmatpush1.bf16.msra.mxu0 %v9915_v0 }
 0x362   : > { %5084 = vmatprep.subr.bf16.mxu0 %v9920_v3 }
 0x365   : > { %5085 = vmatpush1.bf16.msra.mxu0 %v9918_v58 }
 0x366   : > { %5086 = vmatprep.subr.bf16.mxu0 %v9923_v4 }
 0x369   : > { %5087 = vmatpush1.bf16.msra.mxu0 %v9921_v63 }
 0x36a   : > { %5096 = vmatprep.subr.bf16.mxu0 %v9926_v5 }
 0x36d   : > { %5097 = vmatpush2.bf16.msra.mxu0 %v9924_v6 }
 0x36e   : > { %5098 = vmatprep.subr.bf16.mxu0 %v9929_v8 }
 0x371   : > { %5099 = vmatpush2.bf16.msra.mxu0 %v9927_v52 }
 0x372   : > { %5100 = vmatprep.subr.bf16.mxu0 %v9932_v48 }
 0x375   : > { %5101 = vmatpush2.bf16.msra.mxu0 %v9930_v51 }
 0x376   : > { %5102 = vmatprep.subr.bf16.mxu0 %v9935_v24 }
 0x379   : > { %5103 = vmatpush2.bf16.msra.mxu0 %v9933_v41 }
 0x37a   : > { %8757 = vmatprep.subr.msk.bf16.mxu0 %vm2914_vm3, %v12685_v38 }
 0x37c   : > { %5105 = vmatmul.mubr.bf16.vlgmr.msra.gmra.mxu0 %v12679_v23 }
 0x37d   : > { %8751 = vmatprep.mubr.msk.bf16.mxu0 %vm4889_vm7, %v12685_v38  ;;  %5154 = vmatpush1.bf16.msra.mxu0 %v12691_v40 }
 0x37e   : > { %5155 = vmatprep.subr.bf16.mxu0 %v12681_v31  ;;  %v10003_v31 = vld [vmem:[%s13650_s7 + $0x224] ss:$8 sps:$4 sm:$0xff]  }
 0x381   : > { %5156 = vmatpush1.bf16.msra.mxu0 %v12679_v23  ;;  %v9994_v23 = vld [vmem:[%s13650_s7 + $0x194] ss:$8 sps:$4 sm:$0xff]  }
 0x382   : > { %5347 = vmatprep.subr.bf16.mxu0 %v9976_v14  ;;  %v10018_v14 = vld [vmem:[%s13652_s9 + $0x114] ss:$8 sps:$4 sm:$0xff]  }
 0x384   : > { %5115 = vmatmul.mubr.bf16.gmra.mxu0 %v12683_v37  ;;  %v10007_v37 = vld [vmem:[%s13650_s7 + $0x200] ss:$8 sps:$4 sm:$0xff]  }
 0x385   : > { %5173 = vmatprep.mubr.bf16.mxu0 %v10410_v32 }
 0x38c   : > { %8758 = vmatmul.mubr.msk.bf16.vlgmr.msra.gmra.mxu0 %vm4677_vm6, %v9936_v9 }
 0x38d   : > { %5183 = vmatprep.mubr.bf16.mxu0 %v10410_v32  ;;  %5348 = vmatpush1.bf16.msra.mxu0 %v9974_v13  ;;  %v10013_v13 = vld [vmem:[%s13652_s9 + $0x120] ss:$8 sps:$4 sm:$0xff]  }
 0x38e   : > { %5349 = vmatprep.subr.bf16.mxu0 %v9979_v15  ;;  %v10016_v15 = vld [vmem:[%s13652_s9 + $0x110] ss:$8 sps:$4 sm:$0xff]  }
 0x391   : > { %5350 = vmatpush1.bf16.msra.mxu0 %v9977_v18  ;;  %v10021_v18 = vld [vmem:[%s13652_s9 + $0x104] ss:$8 sps:$4 sm:$0xff]  }
 0x392   : > { %5351 = vmatprep.subr.bf16.mxu0 %v9982_v46  ;;  %v10019_v46 = vld [vmem:[%s13652_s9 + $0x100] ss:$8 sps:$4 sm:$0xff]  }
 0x394   : > { %8759 = vmatmul.mubr.msk.bf16.gmra.mxu0 %vm4677_vm6, %v9937_v34  ;;  %v10010_v34 = vld [vmem:[%s13652_s9 + $0x130] ss:$8 sps:$4 sm:$0xff]  }
 0x395   : > { %5352 = vmatpush1.bf16.msra.mxu0 %v9980_v17  ;;  %v10024_v17 = vld [vmem:[%s13652_s9 + $0xf4] ss:$8 sps:$4 sm:$0xff]  }
 0x396   : > { %5353 = vmatprep.subr.bf16.mxu0 %v9985_v30  ;;  %v10022_v30 = vld [vmem:[%s13652_s9 + $0xf0] ss:$8 sps:$4 sm:$0xff]  }
 0x399   : > { %5354 = vmatpush1.bf16.msra.mxu0 %v9983_v43  ;;  %v10027_v43 = vld [vmem:[%s13652_s9 + $0xe4] ss:$8 sps:$4 sm:$0xff]  }
 0x39a   : > { %5355 = vmatprep.subr.bf16.mxu0 %v9988_v50  ;;  %v10025_v50 = vld [vmem:[%s13652_s9 + $0xe0] ss:$8 sps:$4 sm:$0xff]  }
 0x39d   : > { %5356 = vmatpush1.bf16.msra.mxu0 %v9986_v19  ;;  %v10030_v19 = vld [vmem:[%s13652_s9 + $0xd4] ss:$8 sps:$4 sm:$0xff]  }
 0x39e   : > { %5357 = vmatprep.subr.bf16.mxu0 %v9991_v20  ;;  %v10028_v20 = vld [vmem:[%s13652_s9 + $0xd0] ss:$8 sps:$4 sm:$0xff]  }
 0x3a1   : > { %5358 = vmatpush1.bf16.msra.mxu0 %v9989_v22  ;;  %v10033_v22 = vld [vmem:[%s13652_s9 + $0xc4] ss:$8 sps:$4 sm:$0xff]  }
 0x3a2   : > { %5359 = vmatprep.subr.bf16.mxu0 %v9994_v23  ;;  %v10031_v23 = vld [vmem:[%s13652_s9 + $0xc0] ss:$8 sps:$4 sm:$0xff]  }
 0x3a5   : > { %5360 = vmatpush1.bf16.msra.mxu0 %v9992_v25  ;;  %v10036_v25 = vld [vmem:[%s13652_s9 + $0x174] ss:$8 sps:$4 sm:$0xff]  }
 0x3a6   : > { %5361 = vmatprep.subr.bf16.mxu0 %v9997_v26  ;;  %v10034_v26 = vld [vmem:[%s13652_s9 + $0x170] ss:$8 sps:$4 sm:$0xff]  }
 0x3a9   : > { %5362 = vmatpush1.bf16.msra.mxu0 %v9995_v10  ;;  %v10039_v10 = vld [vmem:[%s13652_s9 + $0x164] ss:$8 sps:$4 sm:$0xff]  }
 0x3aa   : > { %5371 = vmatprep.subr.bf16.mxu0 %v10000_v57  ;;  %v10037_v57 = vld [vmem:[%s13652_s9 + $0x160] ss:$8 sps:$4 sm:$0xff]  }
 0x3ad   : > { %5372 = vmatpush2.bf16.msra.mxu0 %v9998_v45  ;;  %v10042_v45 = vld [vmem:[%s13652_s9 + $0x154] ss:$8 sps:$4 sm:$0xff]  }
 0x3ae   : > { %5373 = vmatprep.subr.bf16.mxu0 %v10003_v31  ;;  %v10040_v31 = vld [vmem:[%s13652_s9 + $0x150] ss:$8 sps:$4 sm:$0xff]  }
 0x3b1   : > { %5374 = vmatpush2.bf16.msra.mxu0 %v10001_v53  ;;  %v10045_v53 = vld [vmem:[%s13652_s9 + $0x144] ss:$8 sps:$4 sm:$0xff]  }
 0x3b2   : > { %5375 = vmatprep.subr.bf16.mxu0 %v10006_v33  ;;  %v10043_v33 = vld [vmem:[%s13652_s9 + $0x140] ss:$8 sps:$4 sm:$0xff]  }
 0x3b5   : > { %5376 = vmatpush2.bf16.msra.mxu0 %v10004_v35 }
 0x3b6   : > { %5377 = vmatprep.subr.bf16.mxu0 %v10009_v36 }
 0x3b9   : > { %5378 = vmatpush2.bf16.msra.mxu0 %v10007_v37 }
 0x3ba   : > { %5862 = vmatprep.subr.bf16.mxu0 %v10012_v27 }
 0x40c   : > { %v4724_v42 = vpop.f32.mrf.mxu0 }
 0x40e   : > { %v4726_v38 = vpop.f32.mrf.mxu0 }
 0x410   : > { %v4728_v40 = vpop.f32.mrf.mxu0 }
 0x411   : > { %v4741_v39 = vpack.c.bf16 %v4728_v40, %v4724_v42 }
 0x412   : > { %v4730_v44 = vpop.f32.mrf.mxu0 }
 0x413   : > { %v4742_v1 = vpack.c.bf16 %v4730_v44, %v4726_v38 }
 0x414   : > { %v4734_v47 = vpop.f32.mrf.mxu0 }
 0x415   : > { %8724 = vmatprep.mubr.msk.bf16.mxu1 %vm4889_vm7, %v4742_v1  ;;  %v4743_v56 = vpack.c.bf16 %v4734_v47, %v4734_v47 }
 0x416   : > { %4929 = vmatmul.mubr.bf16.vlgmr.msra.gmra.mxu1 %v4741_v39  ;;  %v4736_v54 = vpop.f32.mrf.mxu0  ;;  %v5404_v39 = vld [vmem:[%s13651_s8] sm:$0x3] }
 0x417   : > { %v4744_v49 = vpack.c.bf16 %v4736_v54, %v4736_v54 }
 0x418   : > { %v4738_v55 = vpop.f32.mrf.mxu0 }
 0x419   : > { %8725 = vmatprep.mubr.msk.bf16.mxu1 %vm4889_vm7, %v4744_v49 }
 0x41a   : > { %v4739_v7 = vpop.f32.mrf.mxu0 }
 0x41e   : > { %4939 = vmatmul.mubr.bf16.gmra.mxu1 %v4743_v56  ;;  %v5409_v56 = vrot.slane %v5404_v39, %v11872_v16 }
 0x41f   : > { %5513 = vmatprep.mubr.bf16.mxu1 %v10410_v32 }
 0x43c   : > { %v12885_v59 = vpop.f32.mrf.mxu0 }
 0x43e   : > { %v12887_v60 = vpop.f32.mrf.mxu0 }
 0x440   : > { %v12889_v61 = vpop.f32.mrf.mxu0 }
 0x442   : > { %v12891_v62 = vpop.f32.mrf.mxu0 }
 0x444   : > { %v12893_v0 = vpop.f32.mrf.mxu0 }
 0x446   : > { %v12895_v3 = vpop.f32.mrf.mxu0 }
 0x448   : > { %v5120_v58 = vpop.f32.mrf.mxu0 }
 0x449   : > { %v5413_v58 = vrot.slane %v5404_v39, %v11886_v21  ;;  %v10072_v39 = vld [vmem:[%s13652_s9 + $0xb0] ss:$8 sps:$4 sm:$0xff]  }
 0x44a   : > { %v5121_v4 = vpop.f32.mrf.mxu0 }
 0x44c   : > { %v5175_v63 = vpop.f32.mrf.mxu0 }
 0x44e   : > { %v5177_v5 = vpop.f32.mrf.mxu0 }
 0x450   : > { %v5179_v6 = vpop.f32.mrf.mxu0 }
 0x451   : > { %v5192_v48 = vpack.c.bf16 %v5179_v6, %v5175_v63 }
 0x452   : > { %v5181_v8 = vpop.f32.mrf.mxu0 }
 0x453   : > { %v5193_v52 = vpack.c.bf16 %v5181_v8, %v5177_v5 }
 0x454   : > { %v5185_v51 = vpop.f32.mrf.mxu0 }
 0x455   : > { %8808 = vmatprep.mubr.msk.bf16.mxu0 %vm4889_vm7, %v5193_v52  ;;  %v5194_v12 = vpack.c.bf16 %v5185_v51, %v5185_v51 }
 0x456   : > { %v5187_v24 = vpop.f32.mrf.mxu0  ;;  %5380 = vmatmul.mubr.bf16.vlgmr.msra.gmra.mxu0 %v5192_v48 }
 0x457   : > { %v5195_v41 = vpack.c.bf16 %v5187_v24, %v5187_v24  ;;  %5863 = vmatpush1.bf16.msra.mxu0 %v10010_v34 }
 0x458   : > { %v5189_v9 = vpop.f32.mrf.mxu0  ;;  %5864 = vmatprep.subr.bf16.mxu0 %v10015_v28 }
 0x459   : > { %8809 = vmatprep.mubr.msk.bf16.mxu0 %vm4889_vm7, %v5195_v41 }
 0x45a   : > { %v5190_v11 = vpop.f32.mrf.mxu0 }
 0x45b   : > { %5865 = vmatpush1.bf16.msra.mxu0 %v10013_v13 }
 0x45c   : > { %5866 = vmatprep.subr.bf16.mxu0 %v10018_v14 }
 0x45e   : > { %5390 = vmatmul.mubr.bf16.gmra.mxu0 %v5194_v12 }
 0x45f   : > { %5867 = vmatpush1.bf16.msra.mxu0 %v10016_v15 }
 0x460   : > { %5868 = vmatprep.subr.bf16.mxu0 %v10021_v18 }
 0x463   : > { %5869 = vmatpush1.bf16.msra.mxu0 %v10019_v46 }
 0x464   : > { %5870 = vmatprep.subr.bf16.mxu0 %v10024_v17 }
 0x467   : > { %5871 = vmatpush1.bf16.msra.mxu0 %v10022_v30 }
 0x468   : > { %5872 = vmatprep.subr.bf16.mxu0 %v10027_v43 }
 0x46b   : > { %5873 = vmatpush1.bf16.msra.mxu0 %v10025_v50 }
 0x46c   : > { %5874 = vmatprep.subr.bf16.mxu0 %v10030_v19 }
 0x46f   : > { %5875 = vmatpush1.bf16.msra.mxu0 %v10028_v20  ;;  %v10049_v20 = vld [vmem:[%s13652_s9 + $0x74] ss:$8 sps:$4 sm:$0xff]  }
 0x470   : > { %5876 = vmatprep.subr.bf16.mxu0 %v10033_v22  ;;  %v10046_v22 = vld [vmem:[%s13649_s6 + $0x18] sm:$0xff]  }
 0x473   : > { %5877 = vmatpush1.bf16.msra.mxu0 %v10031_v23  ;;  %v10047_v23 = vld [vmem:[%s13652_s9 + $0x70] ss:$8 sps:$4 sm:$0xff]  }
 0x474   : > { %5886 = vmatprep.subr.bf16.mxu0 %v10036_v25  ;;  %v10052_v25 = vld [vmem:[%s13652_s9 + $0x64] ss:$8 sps:$4 sm:$0xff]  }
 0x477   : > { %5887 = vmatpush2.bf16.msra.mxu0 %v10034_v26  ;;  %v10050_v26 = vld [vmem:[%s13652_s9 + $0x60] ss:$8 sps:$4 sm:$0xff]  }
 0x478   : > { %5888 = vmatprep.subr.bf16.mxu0 %v10039_v10  ;;  %v10055_v10 = vld [vmem:[%s13652_s9 + $0x54] ss:$8 sps:$4 sm:$0xff]  }
 0x47b   : > { %5889 = vmatpush2.bf16.msra.mxu0 %v10037_v57  ;;  %v10056_v57 = vld [vmem:[%s13649_s6 + $0x20] ss:$0 sps:$4 sm:$0x11]  }
 0x47c   : > { %5890 = vmatprep.subr.bf16.mxu0 %v10042_v45  ;;  %v10053_v45 = vld [vmem:[%s13652_s9 + $0x50] ss:$8 sps:$4 sm:$0xff]  }
 0x47f   : > { %5891 = vmatpush2.bf16.msra.mxu0 %v10040_v31  ;;  %v10059_v31 = vld [vmem:[%s13652_s9 + $0x44] ss:$8 sps:$4 sm:$0xff]  }
 0x480   : > { %5892 = vmatprep.subr.bf16.mxu0 %v10045_v53  ;;  %v10057_v53 = vld [vmem:[%s13652_s9 + $0x40] ss:$8 sps:$4 sm:$0xff]  }
 0x483   : > { %5893 = vmatpush2.bf16.msra.mxu0 %v10043_v33  ;;  %v10062_v33 = vld [vmem:[%s13652_s9 + $0x34] ss:$8 sps:$4 sm:$0xff]  }
 0x4d6   : > { %v4930_v35 = vpop.f32.mrf.mxu1 }
 0x4d7   : > { %v5107_v47 = vadd.f32 %v12885_v59, %v4930_v35  ;;  %v10060_v35 = vld [vmem:[%s13652_s9 + $0x30] ss:$8 sps:$4 sm:$0xff]  }
 0x4d8   : > { %v4932_v36 = vpop.f32.mrf.mxu1 }
 0x4d9   : > { %v5109_v49 = vadd.f32 %v12887_v60, %v4932_v36  ;;  %v10065_v36 = vld [vmem:[%s13652_s9 + $0x24] ss:$8 sps:$4 sm:$0xff]  }
 0x4da   : > { %v4934_v37 = vpop.f32.mrf.mxu1 }
 0x4db   : > { %v5111_v4 = vadd.f32 %v12889_v61, %v4934_v37  ;;  %v10063_v37 = vld [vmem:[%s13652_s9 + $0x20] ss:$8 sps:$4 sm:$0xff]  }
 0x4dc   : > { %v4936_v42 = vpop.f32.mrf.mxu1 }
 0x4dd   : > { %v5113_v6 = vadd.f32 %v12891_v62, %v4936_v42  ;;  %v10068_v42 = vld [vmem:[%s13652_s9 + $0x14] ss:$8 sps:$4 sm:$0xff]  }
 0x4de   : > { %v4940_v38 = vpop.f32.mrf.mxu1 }
 0x4df   : > { %v5117_v59 = vadd.f32 %v12893_v0, %v4940_v38  ;;  %v10066_v38 = vld [vmem:[%s13652_s9 + $0x10] ss:$8 sps:$4 sm:$0xff]  }
 0x4e0   : > { %v4942_v40 = vpop.f32.mrf.mxu1 }
 0x4e1   : > { %v5119_v41 = vadd.f32 %v12895_v3, %v4942_v40  ;;  %v10071_v40 = vld [vmem:[%s13652_s9 + $0x4] ss:$8 sps:$4 sm:$0xff]  }
 0x4e2   : > { %v4944_v44 = vpop.f32.mrf.mxu1 }
 0x4e3   : > { %v10069_v44 = vld [vmem:[%s13652_s9] ss:$8 sps:$4 sm:$0xff]  }
 0x4e4   : > { %v4945_v1 = vpop.f32.mrf.mxu1 }
 0x4e5   : > { %v10074_v1 = vld [vmem:[%s13652_s9 + $0xb4] ss:$8 sps:$4 sm:$0xff]  }
 0x516   : > { %v5381_v54 = vpop.f32.mrf.mxu0 }
 0x517   : > { %v5398_v55 = vadd.f32 %v5381_v54, %v5107_v47  ;;  %v10077_v47 = vld [vmem:[%s13652_s9 + $0xa4] ss:$8 sps:$4 sm:$0xff]   ;;  %v10075_v54 = vld [vmem:[%s13652_s9 + $0xa0] ss:$8 sps:$4 sm:$0xff]  }
 0x518   : > { %v5383_v7 = vpop.f32.mrf.mxu0 }
 0x519   : > { %v5399_v63 = vadd.f32 %v5383_v7, %v5109_v49  ;;  %v5416_v8 = vadd.f32 %v5409_v56, %v5398_v55  ;;  %v10080_v49 = vld [vmem:[%s13652_s9 + $0x94] ss:$8 sps:$4 sm:$0xff]   ;;  %v10078_v55 = vld [vmem:[%s13652_s9 + $0x90] ss:$8 sps:$4 sm:$0xff]   ;;  %v10081_v7 = vld [vmem:[%s13652_s9 + $0x80] ss:$8 sps:$4 sm:$0xff]  }
 0x51a   : > { %v5385_v5 = vpop.f32.mrf.mxu0 }
 0x51b   : > { %v5400_v52 = vadd.f32 %v5385_v5, %v5111_v4  ;;  %v5417_v48 = vadd.f32 %v5413_v58, %v5399_v63  ;;  %v5422_v11 = vmax.f32 %v5416_v8, 0.0 }
 0x51c   : > { %v5387_v51 = vpop.f32.mrf.mxu0 }
 0x51d   : > { %v5418_v24 = vadd.f32 %v5409_v56, %v5400_v52  ;;  %v5401_v60 = vadd.f32 %v5387_v51, %v5113_v6  ;;  %v5423_v61 = vmax.f32 %v5417_v48, 0.0 }
 0x51e   : > { %v5391_v9 = vpop.f32.mrf.mxu0 }
 0x51f   : > { %v5424_v12 = vmax.f32 %v5418_v24, 0.0  ;;  %v5419_v34 = vadd.f32 %v5413_v58, %v5401_v60  ;;  %v5402_v27 = vadd.f32 %v5391_v9, %v5117_v59 }
 0x520   : > { %v5393_v28 = vpop.f32.mrf.mxu0 }
 0x521   : > { %v12982_v13 = vpack.c.bf16 %v5424_v12, %v5422_v11  ;;  %v5425_v62 = vmax.f32 %v5419_v34, 0.0  ;;  %v5420_v14 = vadd.f32 %v5409_v56, %v5402_v27  ;;  %v5403_v15 = vadd.f32 %v5393_v28, %v5119_v41  ;;  %v10083_v56 = vld [vmem:[%s13652_s9 + $0x84] ss:$8 sps:$4 sm:$0xff]  }
 0x522   : > { %v5395_v18 = vpop.f32.mrf.mxu0 }
 0x523   : > { %v12984_v46 = vpack.c.bf16 %v5425_v62, %v5423_v61  ;;  %v5426_v0 = vmax.f32 %v5420_v14, 0.0  ;;  %v5421_v17 = vadd.f32 %v5413_v58, %v5403_v15  ;;  %v10088_v61 = vld [vmem:[%s13652_s9 + $0x1f4] ss:$8 sps:$4 sm:$0xff]   ;;  %v10084_v14 = vld [vmem:[%s13649_s6 + $0x24] sm:$0xff]   ;;  %v10086_v15 = vld [vmem:[%s13652_s9 + $0x1f0] ss:$8 sps:$4 sm:$0xff]  }
 0x524   : > { %v5396_v30 = vpop.f32.mrf.mxu0  ;;  %v10091_v18 = vld [vmem:[%s13652_s9 + $0x1e4] ss:$8 sps:$4 sm:$0xff]  }
 0x525   : > { %v5430_v43 = vpack.c.bf16 %v5426_v0, %v5426_v0  ;;  %v5427_v3 = vmax.f32 %v5421_v17, 0.0  ;;  %8892 = vmatprep.mubr.msk.bf16.mxu0 %vm4889_vm7, %v12984_v46  ;;  %v10085_v0 = vld [vmem:[%s13649_s6 + $0x2c] ss:$0 sps:$4 sm:$0x11]   ;;  %v10092_v17 = vld [vmem:[%s13652_s9 + $0x1d0] ss:$8 sps:$4 sm:$0xff]  }
 0x526   : > { %5895 = vmatmul.mubr.bf16.vlgmr.msra.gmra.mxu0 %v12982_v13  ;;  %v10095_v30 = vld [vmem:[%s13652_s9 + $0x1c0] ss:$8 sps:$4 sm:$0xff]  }
 0x527   : > { %v5431_v50 = vpack.c.bf16 %v5427_v3, %v5427_v3  ;;  %v12992_v19 = vsel %vm2914_vm3, %v5430_v43, 0  ;;  %v10098_v3 = vld [vmem:[%s13652_s9 + $0x1b0] ss:$8 sps:$4 sm:$0xff]  }
 0x529   : > { %8839 = vmatprep.subr.msk.bf16.mxu1 %vm2914_vm3, %v5431_v50  ;;  %8893 = vmatprep.mubr.msk.bf16.mxu0 %vm4889_vm7, %v5431_v50 }
 0x52a   : > { %5494 = vmatpush1.bf16.msra.mxu1 %v12992_v19 }
 0x52b   : > { %5495 = vmatprep.subr.bf16.mxu1 %v12984_v46 }
 0x52e   : > { %5496 = vmatpush1.bf16.msra.mxu1 %v12982_v13  ;;  %5905 = vmatmul.mubr.bf16.gmra.mxu0 %v5430_v43  ;;  %v10100_v43 = vld [vmem:[%s13652_s9 + $0x1b4] ss:$8 sps:$4 sm:$0xff]  }
 0x52f   : > { %5686 = vmatprep.subr.bf16.mxu1 %v10049_v20  ;;  %v10106_v20 = vld [vmem:[%s13652_s9 + $0x194] ss:$8 sps:$4 sm:$0xff]  }
 0x531   : > { %8840 = vmatmul.mubr.msk.bf16.vlgmr.msra.gmra.mxu1 %vm4677_vm6, %v10046_v22  ;;  %v10104_v22 = vld [vmem:[%s13652_s9 + $0x190] ss:$8 sps:$4 sm:$0xff]  }
 0x532   : > { %5687 = vmatpush1.bf16.msra.mxu1 %v10047_v23  ;;  %5523 = vmatprep.mubr.bf16.mxu1 %v10410_v32  ;;  %v10109_v23 = vld [vmem:[%s13652_s9 + $0x184] ss:$8 sps:$4 sm:$0xff]  }
 0x533   : > { %5688 = vmatprep.subr.bf16.mxu1 %v10052_v25  ;;  %v10107_v25 = vld [vmem:[%s13652_s9 + $0x180] ss:$8 sps:$4 sm:$0xff]  }
 0x536   : > { %5689 = vmatpush1.bf16.msra.mxu1 %v10050_v26  ;;  %v10112_v26 = vld [vmem:[%s13652_s9 + $0x234] ss:$8 sps:$4 sm:$0xff]  }
 0x537   : > { %5690 = vmatprep.subr.bf16.mxu1 %v10055_v10  ;;  %v10110_v10 = vld [vmem:[%s13652_s9 + $0x230] ss:$8 sps:$4 sm:$0xff]  }
 0x539   : > { %8841 = vmatmul.mubr.msk.bf16.gmra.mxu1 %vm4677_vm6, %v10056_v57  ;;  %v10115_v57 = vld [vmem:[%s13652_s9 + $0x224] ss:$8 sps:$4 sm:$0xff]  }
 0x53a   : > { %5691 = vmatpush1.bf16.msra.mxu1 %v10053_v45  ;;  %v10113_v45 = vld [vmem:[%s13652_s9 + $0x220] ss:$8 sps:$4 sm:$0xff]  }
 0x53b   : > { %5692 = vmatprep.subr.bf16.mxu1 %v10059_v31  ;;  %v10118_v31 = vld [vmem:[%s13652_s9 + $0x214] ss:$8 sps:$4 sm:$0xff]  }
 0x53e   : > { %5693 = vmatpush1.bf16.msra.mxu1 %v10057_v53  ;;  %v10116_v53 = vld [vmem:[%s13652_s9 + $0x210] ss:$8 sps:$4 sm:$0xff]  }
 0x53f   : > { %5694 = vmatprep.subr.bf16.mxu1 %v10062_v33  ;;  %v10121_v33 = vld [vmem:[%s13652_s9 + $0x204] ss:$8 sps:$4 sm:$0xff]  }
 0x542   : > { %5695 = vmatpush1.bf16.msra.mxu1 %v10060_v35  ;;  %v10119_v35 = vld [vmem:[%s13652_s9 + $0x200] ss:$8 sps:$4 sm:$0xff]  }
 0x543   : > { %5696 = vmatprep.subr.bf16.mxu1 %v10065_v36 }
 0x546   : > { %5697 = vmatpush1.bf16.msra.mxu1 %v10063_v37 }
 0x547   : > { %5698 = vmatprep.subr.bf16.mxu1 %v10068_v42 }
 0x54a   : > { %5699 = vmatpush1.bf16.msra.mxu1 %v10066_v38 }
 0x54b   : > { %5700 = vmatprep.subr.bf16.mxu1 %v10071_v40 }
 0x54e   : > { %5701 = vmatpush1.bf16.msra.mxu1 %v10069_v44 }
 0x54f   : > { %5710 = vmatprep.subr.bf16.mxu1 %v10074_v1 }
 0x552   : > { %5711 = vmatpush2.bf16.msra.mxu1 %v10072_v39 }
 0x553   : > { %5712 = vmatprep.subr.bf16.mxu1 %v10077_v47 }
 0x556   : > { %5713 = vmatpush2.bf16.msra.mxu1 %v10075_v54 }
 0x557   : > { %5714 = vmatprep.subr.bf16.mxu1 %v10080_v49 }
 0x55a   : > { %5715 = vmatpush2.bf16.msra.mxu1 %v10078_v55 }
 0x55b   : > { %5716 = vmatprep.subr.bf16.mxu1 %v10083_v56 }
 0x55e   : > { %5717 = vmatpush2.bf16.msra.mxu1 %v10081_v7 }
 0x55f   : > { %8899 = vmatprep.subr.msk.bf16.mxu1 %vm2914_vm3, %v5431_v50  ;;  %v10103_v50 = vld [vmem:[%s13652_s9 + $0x1a4] ss:$8 sps:$4 sm:$0xff]  }
 0x5e6   : > { %v13079_v58 = vpop.f32.mrf.mxu0 }
 0x5e8   : > { %v13081_v4 = vpop.f32.mrf.mxu0 }
 0x5ea   : > { %v13083_v63 = vpop.f32.mrf.mxu0 }
 0x5ec   : > { %v13085_v5 = vpop.f32.mrf.mxu0 }
 0x5ee   : > { %v13087_v6 = vpop.f32.mrf.mxu0 }
 0x5f0   : > { %v13089_v8 = vpop.f32.mrf.mxu0 }
 0x5f1   : > { %v5515_v52 = vpop.f32.mrf.mxu1 }
 0x5f2   : > { %v5910_v48 = vpop.f32.mrf.mxu0 }
 0x5f3   : > { %v5517_v51 = vpop.f32.mrf.mxu1 }
 0x5f4   : > { %v5911_v59 = vpop.f32.mrf.mxu0 }
 0x5f5   : > { %v5519_v24 = vpop.f32.mrf.mxu1 }
 0x5f6   : > { %v5532_v9 = vpack.c.bf16 %v5519_v24, %v5515_v52 }
 0x5f7   : > { %v5521_v60 = vpop.f32.mrf.mxu1 }
 0x5f8   : > { %v5533_v41 = vpack.c.bf16 %v5521_v60, %v5517_v51 }
 0x5f9   : > { %v5525_v11 = vpop.f32.mrf.mxu1 }
 0x5fa   : > { %8866 = vmatprep.mubr.msk.bf16.mxu1 %vm4889_vm7, %v5533_v41  ;;  %v5534_v62 = vpack.c.bf16 %v5525_v11, %v5525_v11  ;;  %v6194_v41 = vld [vmem:[%s13653_s10] sm:$0x3] }
 0x5fb   : > { %5719 = vmatmul.mubr.bf16.vlgmr.msra.gmra.mxu1 %v5532_v9  ;;  %v5527_v12 = vpop.f32.mrf.mxu1  ;;  %v6199_v11 = vrot.slane %v6194_v41, %v11872_v16 }
 0x5fc   : > { %5944 = vmatpush1.bf16.msra.mxu1 %v12992_v19  ;;  %v5535_v34 = vpack.c.bf16 %v5527_v12, %v5527_v12  ;;  %v10101_v19 = vld [vmem:[%s13652_s9 + $0x1a0] ss:$8 sps:$4 sm:$0xff]  }
 0x5fd   : > { %5945 = vmatprep.subr.bf16.mxu1 %v12984_v46  ;;  %v5529_v27 = vpop.f32.mrf.mxu1  ;;  %v10094_v46 = vld [vmem:[%s13652_s9 + $0x1d4] ss:$8 sps:$4 sm:$0xff]  }
 0x5fe   : > { %8867 = vmatprep.mubr.msk.bf16.mxu1 %vm4889_vm7, %v5535_v34 }
 0x5ff   : > { %v5530_v28 = vpop.f32.mrf.mxu1 }
 0x600   : > { %5946 = vmatpush1.bf16.msra.mxu1 %v12982_v13  ;;  %v10089_v13 = vld [vmem:[%s13652_s9 + $0x1e0] ss:$8 sps:$4 sm:$0xff]  }
 0x601   : > { %6137 = vmatprep.subr.bf16.mxu1 %v10088_v61  ;;  %v6203_v61 = vrot.slane %v6194_v41, %v11886_v21 }
 0x603   : > { %5729 = vmatmul.mubr.bf16.gmra.mxu1 %v5534_v62 }
 0x604   : > { %5963 = vmatprep.mubr.bf16.mxu1 %v10410_v32 }
 0x60b   : > { %8900 = vmatmul.mubr.msk.bf16.vlgmr.msra.gmra.mxu1 %vm4677_vm6, %v10084_v14 }
 0x60c   : > { %5973 = vmatprep.mubr.bf16.mxu1 %v10410_v32  ;;  %6138 = vmatpush1.bf16.msra.mxu1 %v10086_v15  ;;  %v10097_v32 = vld [vmem:[%s13652_s9 + $0x1c4] ss:$8 sps:$4 sm:$0xff]  }
 0x60d   : > { %6139 = vmatprep.subr.bf16.mxu1 %v10091_v18 }
 0x610   : > { %6140 = vmatpush1.bf16.msra.mxu1 %v10089_v13 }
 0x611   : > { %6141 = vmatprep.subr.bf16.mxu1 %v10094_v46 }
 0x613   : > { %8901 = vmatmul.mubr.msk.bf16.gmra.mxu1 %vm4677_vm6, %v10085_v0 }
 0x614   : > { %6142 = vmatpush1.bf16.msra.mxu1 %v10092_v17 }
 0x615   : > { %6143 = vmatprep.subr.bf16.mxu1 %v10097_v32 }
 0x618   : > { %6144 = vmatpush1.bf16.msra.mxu1 %v10095_v30 }
 0x619   : > { %6145 = vmatprep.subr.bf16.mxu1 %v10100_v43 }
 0x61c   : > { %6146 = vmatpush1.bf16.msra.mxu1 %v10098_v3 }
 0x61d   : > { %6147 = vmatprep.subr.bf16.mxu1 %v10103_v50 }
 0x620   : > { %6148 = vmatpush1.bf16.msra.mxu1 %v10101_v19 }
 0x621   : > { %6149 = vmatprep.subr.bf16.mxu1 %v10106_v20 }
 0x624   : > { %6150 = vmatpush1.bf16.msra.mxu1 %v10104_v22 }
 0x625   : > { %6151 = vmatprep.subr.bf16.mxu1 %v10109_v23 }
 0x628   : > { %6152 = vmatpush1.bf16.msra.mxu1 %v10107_v25 }
 0x629   : > { %6161 = vmatprep.subr.bf16.mxu1 %v10112_v26 }
 0x62c   : > { %6162 = vmatpush2.bf16.msra.mxu1 %v10110_v10 }
 0x62d   : > { %6163 = vmatprep.subr.bf16.mxu1 %v10115_v57 }
 0x630   : > { %6164 = vmatpush2.bf16.msra.mxu1 %v10113_v45 }
 0x631   : > { %6165 = vmatprep.subr.bf16.mxu1 %v10118_v31 }
 0x634   : > { %6166 = vmatpush2.bf16.msra.mxu1 %v10116_v53 }
 0x635   : > { %6167 = vmatprep.subr.bf16.mxu1 %v10121_v33 }
 0x638   : > { %6168 = vmatpush2.bf16.msra.mxu1 %v10119_v35 }
 0x6bb   : > { %v5720_v36 = vpop.f32.mrf.mxu1 }
 0x6bc   : > { %v5897_v9 = vadd.f32 %v13079_v58, %v5720_v36 }
 0x6bd   : > { %v5722_v37 = vpop.f32.mrf.mxu1 }
 0x6be   : > { %v5899_v34 = vadd.f32 %v13081_v4, %v5722_v37 }
 0x6bf   : > { %v5724_v42 = vpop.f32.mrf.mxu1 }
 0x6c0   : > { %v5901_v62 = vadd.f32 %v13083_v63, %v5724_v42 }
 0x6c1   : > { %v5726_v38 = vpop.f32.mrf.mxu1 }
 0x6c2   : > { %v5903_v13 = vadd.f32 %v13085_v5, %v5726_v38 }
 0x6c3   : > { %v5730_v40 = vpop.f32.mrf.mxu1 }
 0x6c4   : > { %v5907_v58 = vadd.f32 %v13087_v6, %v5730_v40 }
 0x6c5   : > { %v5732_v44 = vpop.f32.mrf.mxu1 }
 0x6c6   : > { %v5909_v21 = vadd.f32 %v13089_v8, %v5732_v44 }
 0x6c7   : > { %v5734_v1 = vpop.f32.mrf.mxu1 }
 0x6c9   : > { %v5735_v39 = vpop.f32.mrf.mxu1 }
 0x6cb   : > { %v5965_v47 = vpop.f32.mrf.mxu1 }
 0x6cd   : > { %v5967_v54 = vpop.f32.mrf.mxu1 }
 0x6cf   : > { %v5969_v49 = vpop.f32.mrf.mxu1 }
 0x6d0   : > { %v5982_v7 = vpack.c.bf16 %v5969_v49, %v5965_v47 }
 0x6d1   : > { %v5971_v55 = vpop.f32.mrf.mxu1 }
 0x6d2   : > { %v5983_v56 = vpack.c.bf16 %v5971_v55, %v5967_v54 }
 0x6d3   : > { %v5975_v52 = vpop.f32.mrf.mxu1 }
 0x6d4   : > { %8950 = vmatprep.mubr.msk.bf16.mxu1 %vm4889_vm7, %v5983_v56  ;;  %v5984_v60 = vpack.c.bf16 %v5975_v52, %v5975_v52 }
 0x6d5   : > { %6170 = vmatmul.mubr.bf16.vlgmr.msra.gmra.mxu1 %v5982_v7  ;;  %v5977_v48 = vpop.f32.mrf.mxu1 }
 0x6d6   : > { %v5985_v51 = vpack.c.bf16 %v5977_v48, %v5977_v48 }
 0x6d7   : > { %v5979_v59 = vpop.f32.mrf.mxu1 }
 0x6d8   : > { %8951 = vmatprep.mubr.msk.bf16.mxu1 %vm4889_vm7, %v5985_v51 }
 0x6d9   : > { %v5980_v24 = vpop.f32.mrf.mxu1 }
 0x6dd   : > { %6180 = vmatmul.mubr.bf16.gmra.mxu1 %v5984_v60 }
 0x795   : > { %v6171_v12 = vpop.f32.mrf.mxu1 }
 0x796   : > { %v6188_v27 = vadd.f32 %v6171_v12, %v5897_v9 }
 0x797   : > { %v6173_v28 = vpop.f32.mrf.mxu1 }
 0x798   : > { %v6206_v14 = vadd.f32 %v6199_v11, %v6188_v27  ;;  %v6189_v15 = vadd.f32 %v6173_v28, %v5899_v34 }
 0x799   : > { %v6175_v18 = vpop.f32.mrf.mxu1 }
 0x79a   : > { %v6207_v46 = vadd.f32 %v6203_v61, %v6189_v15  ;;  %v6190_v0 = vadd.f32 %v6175_v18, %v5901_v62  ;;  %v6212_v16 = vmax.f32 %v6206_v14, 0.0 }
 0x79b   : > { %v6177_v17 = vpop.f32.mrf.mxu1 }
 0x79c   : > { %v6213_v32 = vmax.f32 %v6207_v46, 0.0  ;;  %v6208_v30 = vadd.f32 %v6199_v11, %v6190_v0  ;;  %v6191_v4 = vadd.f32 %v6177_v17, %v5903_v13 }
 0x79d   : > { %v6181_v43 = vpop.f32.mrf.mxu1 }
 0x79e   : > { %v9156_v3 = vpack.c.bf16 %v6213_v32, %v6212_v16  ;;  %v6209_v50 = vadd.f32 %v6203_v61, %v6191_v4  ;;  %v6192_v63 = vadd.f32 %v6181_v43, %v5907_v58  ;;  %v6214_v5 = vmax.f32 %v6208_v30, 0.0 }
 0x79f   : > { %v6183_v19 = vpop.f32.mrf.mxu1 }
 0x7a0   : > { %6238 = vst.msk [vmem:[#allocation3] sm:$0xff] %vm12588_vm2, %v9156_v3  ;;  %v6215_v20 = vmax.f32 %v6209_v50, 0.0  ;;  %v6210_v22 = vadd.f32 %v6199_v11, %v6192_v63  ;;  %v6193_v23 = vadd.f32 %v6183_v19, %v5909_v21 }
 0x7a1   : > { %v6185_v6 = vpop.f32.mrf.mxu1 }
 0x7a2   : > { %v9157_v25 = vpack.c.bf16 %v6215_v20, %v6214_v5  ;;  %v6211_v26 = vadd.f32 %v6203_v61, %v6193_v23  ;;  %v6216_v57 = vmax.f32 %v6210_v22, 0.0 }
 0x7a3   : > { %v6186_v10 = vpop.f32.mrf.mxu1 }
 0x7a4   : > { %6239 = vst.msk [vmem:[#allocation3 + $0x8] sm:$0xff] %vm12588_vm2, %v9157_v25  ;;  %v6217_v8 = vmax.f32 %v6211_v26, 0.0 }
 0x7a6   : > { %v9158_v45 = vpack.c.bf16 %v6217_v8, %v6216_v57 }
 0x7a8   : > { %6240 = vst.msk [vmem:[#allocation3 + $0x10] sm:$0x11] %vm12601_vm5, %v9158_v45 }
 0x7a9 PF: > { %v10136_v31 = vld [vmem:[%s11000_s15 + $0x18c] ss:$28 sps:$4 sm:$0xff]   ;;  %v10138_v2 = vld [vmem:[%s11000_s15 + $0x194] ss:$28 sps:$4 sm:$0xff]   ;;  %v10144_v35 = vld [vmem:[%s11000_s15 + $0x15c] ss:$28 sps:$4 sm:$0xff]   ;;  %s13676_s29 = scalar_lea.vmem %s13656_s13, %s13681_s28 }
 0x7aa   : > { %6893 = vmatprep.subr.bf16.mxu0 %v10136_v31  ;;  %v10140_v53 = vld [vmem:[%s11000_s15 + $0x188] ss:$28 sps:$4 sm:$0xff]   ;;  %v10141_v33 = vld [vmem:[%s11000_s15 + $0x190] ss:$28 sps:$4 sm:$0xff]   ;;  %6944 = vmatprep.subr.bf16.mxu1 %v10138_v2  ;;  %v10147_v37 = vld [vmem:[%s11000_s15 + $0x158] ss:$28 sps:$4 sm:$0xff]  }
 0x7ab   : > { %v10142_v29 = vld [vmem:[%s11000_s15 + $0x154] ss:$28 sps:$4 sm:$0xff]   ;;  %6894 = vmatpush1.bf16.msra.mxu0 %v10140_v53  ;;  %6945 = vmatpush1.bf16.msra.mxu1 %v10141_v33  ;;  %v10148_v42 = vld [vmem:[%s11000_s15 + $0x11c] ss:$28 sps:$4 sm:$0xff]   ;;  %v10150_v38 = vld [vmem:[%s11000_s15 + $0x124] ss:$28 sps:$4 sm:$0xff]  }
 0x7ac   : > { %v10146_v36 = vld [vmem:[%s11000_s15 + $0x150] ss:$28 sps:$4 sm:$0xff]   ;;  %6895 = vmatprep.subr.bf16.mxu0 %v10142_v29  ;;  %6946 = vmatprep.subr.bf16.mxu1 %v10144_v35  ;;  %v10152_v40 = vld [vmem:[%s11000_s15 + $0x118] ss:$28 sps:$4 sm:$0xff]   ;;  %v10153_v44 = vld [vmem:[%s11000_s15 + $0x120] ss:$28 sps:$4 sm:$0xff]  }
 0x7ad   : > { %v10154_v1 = vld [vmem:[%s11000_s15 + $0xe4] ss:$28 sps:$4 sm:$0xff]   ;;  %v10156_v39 = vld [vmem:[%s11000_s15 + $0xec] ss:$28 sps:$4 sm:$0xff]   ;;  %v10162_v55 = vld [vmem:[%s11000_s15 + $0xb4] ss:$28 sps:$4 sm:$0xff]  }
 0x7ae   : > { %v10158_v47 = vld [vmem:[%s11000_s15 + $0xe0] ss:$28 sps:$4 sm:$0xff]   ;;  %v10159_v54 = vld [vmem:[%s11000_s15 + $0xe8] ss:$28 sps:$4 sm:$0xff]   ;;  %v10165_v7 = vld [vmem:[%s11000_s15 + $0xb0] ss:$28 sps:$4 sm:$0xff]  }
 0x7af   : > { %6896 = vmatpush1.bf16.msra.mxu0 %v10146_v36  ;;  %6947 = vmatpush1.bf16.msra.mxu1 %v10147_v37  ;;  %v10160_v49 = vld [vmem:[%s11000_s15 + $0xac] ss:$28 sps:$4 sm:$0xff]   ;;  %v10166_v52 = vld [vmem:[%s11000_s15 + $0x74] ss:$28 sps:$4 sm:$0xff]   ;;  %v10168_v48 = vld [vmem:[%s11000_s15 + $0x7c] ss:$28 sps:$4 sm:$0xff]  }
 0x7b0   : > { %6897 = vmatprep.subr.bf16.mxu0 %v10148_v42  ;;  %6948 = vmatprep.subr.bf16.mxu1 %v10150_v38  ;;  %v10164_v56 = vld [vmem:[%s11000_s15 + $0xa8] ss:$28 sps:$4 sm:$0xff]   ;;  %v10170_v51 = vld [vmem:[%s11000_s15 + $0x70] ss:$28 sps:$4 sm:$0xff]   ;;  %v10171_v59 = vld [vmem:[%s11000_s15 + $0x78] ss:$28 sps:$4 sm:$0xff]  }
 0x7b1   : > { %v10172_v24 = vld [vmem:[%s11000_s15 + $0x3c] ss:$28 sps:$4 sm:$0xff]   ;;  %v10174_v60 = vld [vmem:[%s11000_s15 + $0x44] ss:$28 sps:$4 sm:$0xff]   ;;  %v10180_v12 = vld [vmem:[%s11000_s15 + $0xc] ss:$28 sps:$4 sm:$0xff]  }
 0x7b2   : > { %v10176_v41 = vld [vmem:[%s11000_s15 + $0x38] ss:$28 sps:$4 sm:$0xff]   ;;  %v10177_v9 = vld [vmem:[%s11000_s15 + $0x40] ss:$28 sps:$4 sm:$0xff]   ;;  %v10183_v27 = vld [vmem:[%s11000_s15 + $0x8] ss:$28 sps:$4 sm:$0xff]  }
 0x7b3   : > { %6898 = vmatpush1.bf16.msra.mxu0 %v10152_v40  ;;  %6949 = vmatpush1.bf16.msra.mxu1 %v10153_v44  ;;  %v10178_v11 = vld [vmem:[%s11000_s15 + $0x4] ss:$28 sps:$4 sm:$0xff]   ;;  %v10184_v61 = vld [vmem:[%s11000_s15 + $0x26c] ss:$28 sps:$4 sm:$0xff]   ;;  %v10186_v28 = vld [vmem:[%s11000_s15 + $0x274] ss:$28 sps:$4 sm:$0xff]  }
 0x7b4   : > { %6899 = vmatprep.subr.bf16.mxu0 %v10154_v1  ;;  %6950 = vmatprep.subr.bf16.mxu1 %v10156_v39  ;;  %v10182_v34 = vld [vmem:[%s11000_s15] ss:$28 sps:$4 sm:$0xff]   ;;  %vm6886_vm8 = vcmask 523264   ;;  %v10188_v62 = vld [vmem:[%s11000_s15 + $0x268] ss:$28 sps:$4 sm:$0xff]   ;;  %v10411_v5 = vmov 0  }
 0x7b5   : > { %v10189_v14 = vld [vmem:[%s11000_s15 + $0x270] ss:$28 sps:$4 sm:$0xff]   ;;  %v13234_v18 = vld [vmem:[#allocation3 + $0x4] ss:$8 sps:$4 sm:$0xff]   ;;  %v10195_v0 = vld [vmem:[%s11000_s15 + $0x238] ss:$28 sps:$4 sm:$0xff]  }
 0x7b6   : > { %v10190_v15 = vld [vmem:[%s11000_s15 + $0x234] ss:$28 sps:$4 sm:$0xff]   ;;  %v10192_v13 = vld [vmem:[%s11000_s15 + $0x23c] ss:$28 sps:$4 sm:$0xff]   ;;  %9043 = vmatprep.mubr.msk.bf16.mxu0 %vm6886_vm8, %v13234_v18  ;;  %9045 = vmatprep.mubr.msk.bf16.mxu1 %vm6886_vm8, %v13234_v18  ;;  %v10198_v17 = vld [vmem:[%s11000_s15 + $0x204] ss:$28 sps:$4 sm:$0xff]  }
 0x7b7   : > { %6900 = vmatpush1.bf16.msra.mxu0 %v10158_v47  ;;  %6951 = vmatpush1.bf16.msra.mxu1 %v10159_v54  ;;  %v10194_v46 = vld [vmem:[%s11000_s15 + $0x230] ss:$28 sps:$4 sm:$0xff]   ;;  %v10196_v58 = vld [vmem:[%s11000_s15 + $0x1fc] ss:$28 sps:$4 sm:$0xff]   ;;  %v10202_v30 = vld [vmem:[%s11000_s15 + $0x1c4] ss:$28 sps:$4 sm:$0xff]  }
 0x7b8   : > { %6901 = vmatprep.subr.bf16.mxu0 %v10160_v49  ;;  %6952 = vmatprep.subr.bf16.mxu1 %v10162_v55  ;;  %v10200_v16 = vld [vmem:[%s11000_s15 + $0x1f8] ss:$28 sps:$4 sm:$0xff]   ;;  %v10201_v32 = vld [vmem:[%s11000_s15 + $0x200] ss:$28 sps:$4 sm:$0xff]   ;;  %v10204_v4 = vld [vmem:[%s11000_s15 + $0x1cc] ss:$28 sps:$4 sm:$0xff]  }
 0x7b9   : > { %v10206_v43 = vld [vmem:[%s11000_s15 + $0x1c0] ss:$28 sps:$4 sm:$0xff]   ;;  %v10207_v21 = vld [vmem:[%s11000_s15 + $0x1c8] ss:$28 sps:$4 sm:$0xff]   ;;  %v10211_v63 = vld [vmem:[%s11000_s15 + $0x198] ss:$28 sps:$4 sm:$0xff]  }
 0x7ba   : > { %v10213_v3 = vld [vmem:[%s11000_s15 + $0x19c] ss:$28 sps:$4 sm:$0xff]   ;;  %v10217_v20 = vld [vmem:[%s11000_s15 + $0x164] ss:$28 sps:$4 sm:$0xff]   ;;  %v10221_v6 = vld [vmem:[%s11000_s15 + $0x12c] ss:$28 sps:$4 sm:$0xff]  }
 0x7bb   : > { %6902 = vmatpush1.bf16.msra.mxu0 %v10164_v56  ;;  %6953 = vmatpush1.bf16.msra.mxu1 %v10165_v7  ;;  %v13252_v50 = vld [vmem:[#allocation3] ss:$8 sps:$4 sm:$0xff]   ;;  %v10218_v23 = vld [vmem:[%s11000_s15 + $0x168] ss:$28 sps:$4 sm:$0xff]   ;;  %v10222_v8 = vld [vmem:[%s11000_s15 + $0x130] ss:$28 sps:$4 sm:$0xff]  }
 0x7bc   : > { %6903 = vmatprep.subr.bf16.mxu0 %v10166_v52  ;;  %6954 = vmatprep.subr.bf16.mxu1 %v10168_v48  ;;  %v10214_v19 = vld [vmem:[%s11000_s15 + $0x1a0] ss:$28 sps:$4 sm:$0xff]   ;;  %v6342_v25 = vld [vmem:[#allocation3 + $0x10] sm:$0x11]  ;;  %v10225_v45 = vld [vmem:[%s11000_s15 + $0xf4] ss:$28 sps:$4 sm:$0xff]  }
 0x7bd   : > { %v10215_v22 = vld [vmem:[%s11000_s15 + $0x160] ss:$28 sps:$4 sm:$0xff]   ;;  %v10219_v26 = vld [vmem:[%s11000_s15 + $0x128] ss:$28 sps:$4 sm:$0xff]   ;;  %v13265_v10 = vcombine.high %v6342_v25, %v6342_v25  ;;  %v13267_v57 = vcombine.low %v6342_v25, %v6342_v25  ;;  %v10223_v31 = vld [vmem:[%s11000_s15 + $0xf0] ss:$28 sps:$4 sm:$0xff]  }
 0x7be   : > { %v10226_v2 = vld [vmem:[%s11000_s15 + $0xf8] ss:$28 sps:$4 sm:$0xff]   ;;  %v10230_v29 = vld [vmem:[%s11000_s15 + $0xc0] ss:$28 sps:$4 sm:$0xff]   ;;  %v10234_v37 = vld [vmem:[%s11000_s15 + $0x88] ss:$28 sps:$4 sm:$0xff]  }
 0x7bf   : > { %6904 = vmatpush1.bf16.msra.mxu0 %v10170_v51  ;;  %6955 = vmatpush1.bf16.msra.mxu1 %v10171_v59  ;;  %v10229_v53 = vld [vmem:[%s11000_s15 + $0xbc] ss:$28 sps:$4 sm:$0xff]   ;;  %v10233_v35 = vld [vmem:[%s11000_s15 + $0x84] ss:$28 sps:$4 sm:$0xff]   ;;  %v10237_v42 = vld [vmem:[%s11000_s15 + $0x4c] ss:$28 sps:$4 sm:$0xff]  }
 0x7c0   : > { %6905 = vmatprep.subr.bf16.mxu0 %v10172_v24  ;;  %6956 = vmatprep.subr.bf16.mxu1 %v10174_v60  ;;  %v10227_v33 = vld [vmem:[%s11000_s15 + $0xb8] ss:$28 sps:$4 sm:$0xff]   ;;  %v10231_v36 = vld [vmem:[%s11000_s15 + $0x80] ss:$28 sps:$4 sm:$0xff]   ;;  %v10235_v38 = vld [vmem:[%s11000_s15 + $0x48] ss:$28 sps:$4 sm:$0xff]  }
 0x7c1   : > { %v10238_v40 = vld [vmem:[%s11000_s15 + $0x50] ss:$28 sps:$4 sm:$0xff]   ;;  %v10242_v39 = vld [vmem:[%s11000_s15 + $0x18] ss:$28 sps:$4 sm:$0xff]   ;;  %v10246_v49 = vld [vmem:[%s11000_s15 + $0x280] ss:$28 sps:$4 sm:$0xff]  }
 0x7c2   : > { %v10241_v44 = vld [vmem:[%s11000_s15 + $0x14] ss:$28 sps:$4 sm:$0xff]   ;;  %v10245_v47 = vld [vmem:[%s11000_s15 + $0x27c] ss:$28 sps:$4 sm:$0xff]   ;;  %v10251_v55 = vld [vmem:[%s11000_s15 + $0x244] ss:$28 sps:$4 sm:$0xff]  }
 0x7c3   : > { %6906 = vmatpush1.bf16.msra.mxu0 %v10176_v41  ;;  %6957 = vmatpush1.bf16.msra.mxu1 %v10177_v9  ;;  %v10239_v1 = vld [vmem:[%s11000_s15 + $0x10] ss:$28 sps:$4 sm:$0xff]   ;;  %v10243_v54 = vld [vmem:[%s11000_s15 + $0x278] ss:$28 sps:$4 sm:$0xff]   ;;  %v10249_v56 = vld [vmem:[%s11000_s15 + $0x240] ss:$28 sps:$4 sm:$0xff]  }
 0x7c4   : > { %6907 = vmatprep.subr.bf16.mxu0 %v10178_v11  ;;  %6958 = vmatprep.subr.bf16.mxu1 %v10180_v12  ;;  %v10252_v7 = vld [vmem:[%s11000_s15 + $0x248] ss:$28 sps:$4 sm:$0xff]   ;;  %v10256_v51 = vld [vmem:[%s11000_s15 + $0x210] ss:$28 sps:$4 sm:$0xff]   ;;  %v10260_v60 = vld [vmem:[%s11000_s15 + $0x1d8] ss:$28 sps:$4 sm:$0xff]  }
 0x7c5   : > { %v10255_v52 = vld [vmem:[%s11000_s15 + $0x20c] ss:$28 sps:$4 sm:$0xff]   ;;  %v10259_v59 = vld [vmem:[%s11000_s15 + $0x1d4] ss:$28 sps:$4 sm:$0xff]   ;;  %v10303_v25 = vld [vmem:[%s10998_s21] ss:$28 sps:$4 sm:$0xff]  }
 0x7c6   : > { %v10253_v48 = vld [vmem:[%s11000_s15 + $0x208] ss:$28 sps:$4 sm:$0xff]   ;;  %v10257_v24 = vld [vmem:[%s11000_s15 + $0x1d0] ss:$28 sps:$4 sm:$0xff]   ;;  %s9159_s28 = smul.u32 (%p10522_p5), 56, %s10503_s16 }
 0x7c7   : > { %6908 = vmatpush1.bf16.msra.mxu0 %v10182_v34  ;;  %6959 = vmatpush1.bf16.msra.mxu1 %v10183_v27  ;;  %v10263_v41 = vld [vmem:[%s10998_s21 + $0x18c] ss:$28 sps:$4 sm:$0xff]   ;;  %v10266_v9 = vld [vmem:[%s10998_s21 + $0x194] ss:$28 sps:$4 sm:$0xff]   ;;  %v10272_v27 = vld [vmem:[%s10998_s21 + $0x15c] ss:$28 sps:$4 sm:$0xff]  }
 0x7c8   : > { %6917 = vmatprep.subr.bf16.mxu0 %v10184_v61  ;;  %6968 = vmatprep.subr.bf16.mxu1 %v10186_v28  ;;  %v10261_v11 = vld [vmem:[%s10998_s21 + $0x188] ss:$28 sps:$4 sm:$0xff]   ;;  %v10264_v12 = vld [vmem:[%s10998_s21 + $0x190] ss:$28 sps:$4 sm:$0xff]   ;;  %v10270_v28 = vld [vmem:[%s10998_s21 + $0x158] ss:$28 sps:$4 sm:$0xff]   ;;  %s13595_s27 = scalar_lea.vmem (%p10522_p5), %s13657_s14, %s9159_s28 }
 0x7c9   : > { %v10269_v34 = vld [vmem:[%s10998_s21 + $0x154] ss:$28 sps:$4 sm:$0xff]  }
 0x7ca   : > { %v10267_v61 = vld [vmem:[%s10998_s21 + $0x150] ss:$28 sps:$4 sm:$0xff]  }
 0x7cb   : > { %6918 = vmatpush2.bf16.msra.mxu0 %v10188_v62  ;;  %6969 = vmatpush2.bf16.msra.mxu1 %v10189_v14  ;;  %v10275_v62 = vld [vmem:[%s10998_s21 + $0x11c] ss:$28 sps:$4 sm:$0xff]   ;;  %v10278_v14 = vld [vmem:[%s10998_s21 + $0x124] ss:$28 sps:$4 sm:$0xff]  }
 0x7cc   : > { %6919 = vmatprep.subr.bf16.mxu0 %v10190_v15  ;;  %6970 = vmatprep.subr.bf16.mxu1 %v10192_v13  ;;  %v10273_v15 = vld [vmem:[%s10998_s21 + $0x118] ss:$28 sps:$4 sm:$0xff]   ;;  %v10281_v13 = vld [vmem:[%s10998_s21 + $0xe4] ss:$28 sps:$4 sm:$0xff]  }
 0x7cf   : > { %6920 = vmatpush2.bf16.msra.mxu0 %v10194_v46  ;;  %6971 = vmatpush2.bf16.msra.mxu1 %v10195_v0  ;;  %v10284_v46 = vld [vmem:[%s10998_s21 + $0xec] ss:$28 sps:$4 sm:$0xff]   ;;  %v10279_v0 = vld [vmem:[%s10998_s21 + $0xe0] ss:$28 sps:$4 sm:$0xff]  }
 0x7d0   : > { %6921 = vmatprep.subr.bf16.mxu0 %v10196_v58  ;;  %6972 = vmatprep.subr.bf16.mxu1 %v10198_v17  ;;  %v13338_v58 = vld [vmem:[#allocation2 + $0x4] ss:$8 sps:$4 sm:$0xff]  }
 0x7d1   : > { %v10282_v17 = vld [vmem:[%s10998_s21 + $0xe8] ss:$28 sps:$4 sm:$0xff]  }
 0x7d3   : > { %6922 = vmatpush2.bf16.msra.mxu0 %v10200_v16  ;;  %6973 = vmatpush2.bf16.msra.mxu1 %v10201_v32  ;;  %v10287_v16 = vld [vmem:[%s10998_s21 + $0xac] ss:$28 sps:$4 sm:$0xff]   ;;  %v10290_v32 = vld [vmem:[%s10998_s21 + $0xb4] ss:$28 sps:$4 sm:$0xff]  }
 0x7d4   : > { %6923 = vmatprep.subr.bf16.mxu0 %v10202_v30  ;;  %6974 = vmatprep.subr.bf16.mxu1 %v10204_v4  ;;  %v10285_v30 = vld [vmem:[%s10998_s21 + $0xa8] ss:$28 sps:$4 sm:$0xff]   ;;  %v10288_v4 = vld [vmem:[%s10998_s21 + $0xb0] ss:$28 sps:$4 sm:$0xff]  }
 0x7d7   : > { %6924 = vmatpush2.bf16.msra.mxu0 %v10206_v43  ;;  %6975 = vmatpush2.bf16.msra.mxu1 %v10207_v21  ;;  %v10293_v43 = vld [vmem:[%s10998_s21 + $0x74] ss:$28 sps:$4 sm:$0xff]   ;;  %v10296_v21 = vld [vmem:[%s10998_s21 + $0x7c] ss:$28 sps:$4 sm:$0xff]  }
 0x7d8   : > { %6995 = vmatprep.subr.bf16.mxu0 %v10213_v3  ;;  %7046 = vmatprep.subr.bf16.mxu1 %v10411_v5  ;;  %v10291_v3 = vld [vmem:[%s10998_s21 + $0x70] ss:$28 sps:$4 sm:$0xff]  }
 0x7da   : > { %6926 = vmatmul.mubr.bf16.vlgmr.msra.gmra.mxu0 %v13252_v50  ;;  %6977 = vmatmul.mubr.bf16.vlgmr.msra.gmra.mxu1 %v13252_v50 }
 0x7db   : > { %6996 = vmatpush1.bf16.msra.mxu0 %v10211_v63  ;;  %7047 = vmatpush1.bf16.msra.mxu1 %v10214_v19  ;;  %v10299_v63 = vld [vmem:[%s10998_s21 + $0x3c] ss:$28 sps:$4 sm:$0xff]   ;;  %v10302_v19 = vld [vmem:[%s10998_s21 + $0x44] ss:$28 sps:$4 sm:$0xff]  }
 0x7dc   : > { %6997 = vmatprep.subr.bf16.mxu0 %v10217_v20  ;;  %7048 = vmatprep.subr.bf16.mxu1 %v10411_v5  ;;  %v10297_v20 = vld [vmem:[%s10998_s21 + $0x38] ss:$28 sps:$4 sm:$0xff]  }
 0x7dd   : > { %9044 = vmatprep.mubr.msk.bf16.mxu0 %vm6886_vm8, %v13265_v10  ;;  %9046 = vmatprep.mubr.msk.bf16.mxu1 %vm6886_vm8, %v13265_v10 }
 0x7df   : > { %6998 = vmatpush1.bf16.msra.mxu0 %v10215_v22  ;;  %7049 = vmatpush1.bf16.msra.mxu1 %v10218_v23  ;;  %v10300_v22 = vld [vmem:[%s10998_s21 + $0x40] ss:$28 sps:$4 sm:$0xff]  }
 0x7e0   : > { %6999 = vmatprep.subr.bf16.mxu0 %v10221_v6  ;;  %7050 = vmatprep.subr.bf16.mxu1 %v10411_v5  ;;  %v10305_v23 = vld [vmem:[%s10998_s21 + $0x4] ss:$28 sps:$4 sm:$0xff]   ;;  %v10308_v6 = vld [vmem:[%s10998_s21 + $0xc] ss:$28 sps:$4 sm:$0xff]  }
 0x7e2   : > { %6936 = vmatmul.mubr.bf16.gmra.mxu0 %v13267_v57  ;;  %6987 = vmatmul.mubr.bf16.gmra.mxu1 %v13267_v57 }
 0x7e3   : > { %7000 = vmatpush1.bf16.msra.mxu0 %v10219_v26  ;;  %7051 = vmatpush1.bf16.msra.mxu1 %v10222_v8  ;;  %v10306_v26 = vld [vmem:[%s10998_s21 + $0x8] ss:$28 sps:$4 sm:$0xff]  }
 0x7e4   : > { %7001 = vmatprep.subr.bf16.mxu0 %v10225_v45  ;;  %7052 = vmatprep.subr.bf16.mxu1 %v10411_v5  ;;  %v10309_v8 = vld [vmem:[%s10998_s21 + $0x268] ss:$28 sps:$4 sm:$0xff]   ;;  %v10312_v45 = vld [vmem:[%s10998_s21 + $0x270] ss:$28 sps:$4 sm:$0xff]  }
 0x7e5   : > { %9047 = vmatprep.mubr.msk.bf16.mxu0 %vm6886_vm8, %v13234_v18  ;;  %9049 = vmatprep.mubr.msk.bf16.mxu1 %vm6886_vm8, %v13234_v18  ;;  %v10276_v18 = vld [vmem:[%s10998_s21 + $0x120] ss:$28 sps:$4 sm:$0xff]  }
 0x7e7   : > { %7002 = vmatpush1.bf16.msra.mxu0 %v10223_v31  ;;  %7053 = vmatpush1.bf16.msra.mxu1 %v10226_v2  ;;  %v10317_v31 = vld [vmem:[%s10998_s21 + $0x234] ss:$28 sps:$4 sm:$0xff]   ;;  %v10320_v2 = vld [vmem:[%s10998_s21 + $0x23c] ss:$28 sps:$4 sm:$0xff]  }
 0x7e8   : > { %7003 = vmatprep.subr.bf16.mxu0 %v10229_v53  ;;  %7054 = vmatprep.subr.bf16.mxu1 %v10411_v5  ;;  %v10315_v53 = vld [vmem:[%s10998_s21 + $0x230] ss:$28 sps:$4 sm:$0xff]  }
 0x7eb   : > { %7004 = vmatpush1.bf16.msra.mxu0 %v10227_v33  ;;  %7055 = vmatpush1.bf16.msra.mxu1 %v10230_v29  ;;  %v10318_v33 = vld [vmem:[%s10998_s21 + $0x238] ss:$28 sps:$4 sm:$0xff]  }
 0x7ec   : > { %7005 = vmatprep.subr.bf16.mxu0 %v10233_v35  ;;  %7056 = vmatprep.subr.bf16.mxu1 %v10411_v5  ;;  %v10323_v29 = vld [vmem:[%s10998_s21 + $0x1fc] ss:$28 sps:$4 sm:$0xff]   ;;  %v10326_v35 = vld [vmem:[%s10998_s21 + $0x204] ss:$28 sps:$4 sm:$0xff]  }
 0x7ef   : > { %7006 = vmatpush1.bf16.msra.mxu0 %v10231_v36  ;;  %7057 = vmatpush1.bf16.msra.mxu1 %v10234_v37  ;;  %v10321_v36 = vld [vmem:[%s10998_s21 + $0x1f8] ss:$28 sps:$4 sm:$0xff]   ;;  %v10324_v37 = vld [vmem:[%s10998_s21 + $0x200] ss:$28 sps:$4 sm:$0xff]  }
 0x7f0   : > { %7007 = vmatprep.subr.bf16.mxu0 %v10237_v42  ;;  %7058 = vmatprep.subr.bf16.mxu1 %v10411_v5  ;;  %v10329_v42 = vld [vmem:[%s10998_s21 + $0x1c4] ss:$28 sps:$4 sm:$0xff]  }
 0x7f3   : > { %7008 = vmatpush1.bf16.msra.mxu0 %v10235_v38  ;;  %7059 = vmatpush1.bf16.msra.mxu1 %v10238_v40  ;;  %v10332_v38 = vld [vmem:[%s10998_s21 + $0x1cc] ss:$28 sps:$4 sm:$0xff]   ;;  %v10327_v40 = vld [vmem:[%s10998_s21 + $0x1c0] ss:$28 sps:$4 sm:$0xff]  }
 0x7f4   : > { %7009 = vmatprep.subr.bf16.mxu0 %v10241_v44  ;;  %7060 = vmatprep.subr.bf16.mxu1 %v10411_v5  ;;  %v10330_v44 = vld [vmem:[%s10998_s21 + $0x1c8] ss:$28 sps:$4 sm:$0xff]  }
 0x7f7   : > { %7010 = vmatpush1.bf16.msra.mxu0 %v10239_v1  ;;  %7061 = vmatpush1.bf16.msra.mxu1 %v10242_v39  ;;  %v10338_v1 = vld [vmem:[%s10998_s21 + $0x19c] ss:$28 sps:$4 sm:$0xff]   ;;  %v13380_v39 = vld [vmem:[#allocation2] ss:$8 sps:$4 sm:$0xff]  }
 0x7f8   : > { %7019 = vmatprep.subr.bf16.mxu0 %v10245_v47  ;;  %7070 = vmatprep.subr.bf16.mxu1 %v10411_v5  ;;  %v6243_v47 = vld [vmem:[#allocation2 + $0x10] sm:$0x11] }
 0x7fb   : > { %7020 = vmatpush2.bf16.msra.mxu0 %v10243_v54  ;;  %7071 = vmatpush2.bf16.msra.mxu1 %v10246_v49  ;;  %v10336_v54 = vld [vmem:[%s10998_s21 + $0x198] ss:$28 sps:$4 sm:$0xff]   ;;  %v10339_v49 = vld [vmem:[%s10998_s21 + $0x1a0] ss:$28 sps:$4 sm:$0xff]  }
 0x7fc   : > { %7021 = vmatprep.subr.bf16.mxu0 %v10251_v55  ;;  %7072 = vmatprep.subr.bf16.mxu1 %v10411_v5  ;;  %v10342_v55 = vld [vmem:[%s10998_s21 + $0x164] ss:$28 sps:$4 sm:$0xff]  }
 0x7ff   : > { %7022 = vmatpush2.bf16.msra.mxu0 %v10249_v56  ;;  %7073 = vmatpush2.bf16.msra.mxu1 %v10252_v7  ;;  %v13386_v56 = vcombine.high %v6243_v47, %v6243_v47  ;;  %v10340_v7 = vld [vmem:[%s10998_s21 + $0x160] ss:$28 sps:$4 sm:$0xff]  }
 0x800   : > { %7023 = vmatprep.subr.bf16.mxu0 %v10255_v52  ;;  %7074 = vmatprep.subr.bf16.mxu1 %v10411_v5  ;;  %v10343_v52 = vld [vmem:[%s10998_s21 + $0x168] ss:$28 sps:$4 sm:$0xff]  }
 0x803   : > { %7024 = vmatpush2.bf16.msra.mxu0 %v10253_v48  ;;  %7075 = vmatpush2.bf16.msra.mxu1 %v10256_v51  ;;  %v10348_v48 = vld [vmem:[%s10998_s21 + $0x12c] ss:$28 sps:$4 sm:$0xff]   ;;  %v13398_v51 = vcombine.low %v6243_v47, %v6243_v47 }
 0x804   : > { %7025 = vmatprep.subr.bf16.mxu0 %v10259_v59  ;;  %7076 = vmatprep.subr.bf16.mxu1 %v10411_v5  ;;  %v10346_v59 = vld [vmem:[%s10998_s21 + $0x128] ss:$28 sps:$4 sm:$0xff]  }
 0x807   : > { %7026 = vmatpush2.bf16.msra.mxu0 %v10257_v24  ;;  %7077 = vmatpush2.bf16.msra.mxu1 %v10260_v60  ;;  %v10349_v24 = vld [vmem:[%s10998_s21 + $0x130] ss:$28 sps:$4 sm:$0xff]  }
 0x808   : > { %7547 = vmatprep.subr.bf16.mxu0 %v10263_v41  ;;  %7598 = vmatprep.subr.bf16.mxu1 %v10266_v9  ;;  %v10352_v60 = vld [vmem:[%s10998_s21 + $0xf4] ss:$28 sps:$4 sm:$0xff]  }
 0x809   : > { %v10350_v41 = vld [vmem:[%s10998_s21 + $0xf0] ss:$28 sps:$4 sm:$0xff]   ;;  %v10353_v9 = vld [vmem:[%s10998_s21 + $0xf8] ss:$28 sps:$4 sm:$0xff]  }
 0x80a   : > { %7028 = vmatmul.mubr.bf16.vlgmr.msra.gmra.mxu0 %v13252_v50  ;;  %7079 = vmatmul.mubr.bf16.vlgmr.msra.gmra.mxu1 %v13252_v50  ;;  %v10294_v50 = vld [vmem:[%s10998_s21 + $0x78] ss:$28 sps:$4 sm:$0xff]  }
 0x80b   : > { %7548 = vmatpush1.bf16.msra.mxu0 %v10261_v11  ;;  %7599 = vmatpush1.bf16.msra.mxu1 %v10264_v12  ;;  %v10356_v11 = vld [vmem:[%s10998_s21 + $0xbc] ss:$28 sps:$4 sm:$0xff]  }
 0x80c   : > { %7549 = vmatprep.subr.bf16.mxu0 %v10269_v34  ;;  %7600 = vmatprep.subr.bf16.mxu1 %v10272_v27  ;;  %v10354_v12 = vld [vmem:[%s10998_s21 + $0xb8] ss:$28 sps:$4 sm:$0xff]   ;;  %v10357_v34 = vld [vmem:[%s10998_s21 + $0xc0] ss:$28 sps:$4 sm:$0xff]  }
 0x80d   : > { %9048 = vmatprep.mubr.msk.bf16.mxu0 %vm6886_vm8, %v13265_v10  ;;  %9050 = vmatprep.mubr.msk.bf16.mxu1 %vm6886_vm8, %v13265_v10  ;;  %v10311_v10 = vld [vmem:[%s10998_s21 + $0x26c] ss:$28 sps:$4 sm:$0xff]   ;;  %v10360_v27 = vld [vmem:[%s10998_s21 + $0x84] ss:$28 sps:$4 sm:$0xff]  }
 0x80f   : > { %7550 = vmatpush1.bf16.msra.mxu0 %v10267_v61  ;;  %7601 = vmatpush1.bf16.msra.mxu1 %v10270_v28  ;;  %v10358_v61 = vld [vmem:[%s10998_s21 + $0x80] ss:$28 sps:$4 sm:$0xff]   ;;  %v10361_v28 = vld [vmem:[%s10998_s21 + $0x88] ss:$28 sps:$4 sm:$0xff]  }
 0x810   : > { %7551 = vmatprep.subr.bf16.mxu0 %v10275_v62  ;;  %7602 = vmatprep.subr.bf16.mxu1 %v10278_v14  ;;  %v10364_v62 = vld [vmem:[%s10998_s21 + $0x4c] ss:$28 sps:$4 sm:$0xff]  }
 0x811   : > { %v10362_v14 = vld [vmem:[%s10998_s21 + $0x48] ss:$28 sps:$4 sm:$0xff]  }
 0x812   : > { %7038 = vmatmul.mubr.bf16.gmra.mxu0 %v13267_v57  ;;  %7087 = vmatmul.mubr.bf16.gmra.mxu1 %v13267_v57  ;;  %v10314_v57 = vld [vmem:[%s10998_s21 + $0x274] ss:$28 sps:$4 sm:$0xff]  }
 0x813   : > { %7552 = vmatpush1.bf16.msra.mxu0 %v10273_v15  ;;  %7603 = vmatpush1.bf16.msra.mxu1 %v10276_v18  ;;  %v10365_v15 = vld [vmem:[%s10998_s21 + $0x50] ss:$28 sps:$4 sm:$0xff]  }
 0x814   : > { %7553 = vmatprep.subr.bf16.mxu0 %v10281_v13  ;;  %7604 = vmatprep.subr.bf16.mxu1 %v10284_v46  ;;  %v10368_v18 = vld [vmem:[%s10998_s21 + $0x14] ss:$28 sps:$4 sm:$0xff]  }
 0x815   : > { %9139 = vmatprep.mubr.msk.bf16.mxu0 %vm6886_vm8, %v13338_v58  ;;  %9141 = vmatprep.mubr.msk.bf16.mxu1 %vm6886_vm8, %v13338_v58  ;;  %v10366_v13 = vld [vmem:[%s10998_s21 + $0x10] ss:$28 sps:$4 sm:$0xff]   ;;  %v10369_v46 = vld [vmem:[%s10998_s21 + $0x18] ss:$28 sps:$4 sm:$0xff]  }
 0x817   : > { %7554 = vmatpush1.bf16.msra.mxu0 %v10279_v0  ;;  %7605 = vmatpush1.bf16.msra.mxu1 %v10282_v17  ;;  %v10372_v0 = vld [vmem:[%s10998_s21 + $0x27c] ss:$28 sps:$4 sm:$0xff]  }
 0x818   : > { %7555 = vmatprep.subr.bf16.mxu0 %v10287_v16  ;;  %7606 = vmatprep.subr.bf16.mxu1 %v10290_v32  ;;  %v10373_v17 = vld [vmem:[%s10998_s21 + $0x280] ss:$28 sps:$4 sm:$0xff]  }
 0x819   : > { %v10376_v16 = vld [vmem:[%s10998_s21 + $0x244] ss:$28 sps:$4 sm:$0xff]  }
 0x81a   : > { %v10374_v32 = vld [vmem:[%s10998_s21 + $0x240] ss:$28 sps:$4 sm:$0xff]  }
 0x81b   : > { %7556 = vmatpush1.bf16.msra.mxu0 %v10285_v30  ;;  %7607 = vmatpush1.bf16.msra.mxu1 %v10288_v4  ;;  %v10377_v30 = vld [vmem:[%s10998_s21 + $0x248] ss:$28 sps:$4 sm:$0xff]  }
 0x81c   : > { %7557 = vmatprep.subr.bf16.mxu0 %v10293_v43  ;;  %7608 = vmatprep.subr.bf16.mxu1 %v10296_v21  ;;  %v10380_v4 = vld [vmem:[%s10998_s21 + $0x20c] ss:$28 sps:$4 sm:$0xff]  }
 0x81d   : > { %v10378_v43 = vld [vmem:[%s10998_s21 + $0x208] ss:$28 sps:$4 sm:$0xff]   ;;  %v10381_v21 = vld [vmem:[%s10998_s21 + $0x210] ss:$28 sps:$4 sm:$0xff]  }
 0x81f   : > { %7558 = vmatpush1.bf16.msra.mxu0 %v10291_v3  ;;  %7609 = vmatpush1.bf16.msra.mxu1 %v10294_v50  ;;  %v10384_v3 = vld [vmem:[%s10998_s21 + $0x1d4] ss:$28 sps:$4 sm:$0xff]  }
 0x820   : > { %7559 = vmatprep.subr.bf16.mxu0 %v10299_v63  ;;  %7610 = vmatprep.subr.bf16.mxu1 %v10302_v19  ;;  %v10382_v50 = vld [vmem:[%s10998_s21 + $0x1d0] ss:$28 sps:$4 sm:$0xff]   ;;  %v10385_v63 = vld [vmem:[%s10998_s21 + $0x1d8] ss:$28 sps:$4 sm:$0xff]  }
 0x823   : > { %7560 = vmatpush1.bf16.msra.mxu0 %v10297_v20  ;;  %7611 = vmatpush1.bf16.msra.mxu1 %v10300_v22 }
 0x824   : > { %7561 = vmatprep.subr.bf16.mxu0 %v10305_v23  ;;  %7612 = vmatprep.subr.bf16.mxu1 %v10308_v6 }
 0x827   : > { %7562 = vmatpush1.bf16.msra.mxu0 %v10303_v25  ;;  %7613 = vmatpush1.bf16.msra.mxu1 %v10306_v26 }
 0x828   : > { %7571 = vmatprep.subr.bf16.mxu0 %v10311_v10  ;;  %7622 = vmatprep.subr.bf16.mxu1 %v10314_v57 }
 0x82b   : > { %7572 = vmatpush2.bf16.msra.mxu0 %v10309_v8  ;;  %7623 = vmatpush2.bf16.msra.mxu1 %v10312_v45 }
 0x82c   : > { %7573 = vmatprep.subr.bf16.mxu0 %v10317_v31  ;;  %7624 = vmatprep.subr.bf16.mxu1 %v10320_v2 }
 0x82f   : > { %7574 = vmatpush2.bf16.msra.mxu0 %v10315_v53  ;;  %7625 = vmatpush2.bf16.msra.mxu1 %v10318_v33 }
 0x830   : > { %7575 = vmatprep.subr.bf16.mxu0 %v10323_v29  ;;  %7626 = vmatprep.subr.bf16.mxu1 %v10326_v35 }
 0x833   : > { %7576 = vmatpush2.bf16.msra.mxu0 %v10321_v36  ;;  %7627 = vmatpush2.bf16.msra.mxu1 %v10324_v37 }
 0x834   : > { %7577 = vmatprep.subr.bf16.mxu0 %v10329_v42  ;;  %7628 = vmatprep.subr.bf16.mxu1 %v10332_v38 }
 0x837   : > { %7578 = vmatpush2.bf16.msra.mxu0 %v10327_v40  ;;  %7629 = vmatpush2.bf16.msra.mxu1 %v10330_v44 }
 0x838   : > { %7649 = vmatprep.subr.bf16.mxu0 %v10338_v1  ;;  %7700 = vmatprep.subr.bf16.mxu1 %v10411_v5 }
 0x83a   : > { %7580 = vmatmul.mubr.bf16.vlgmr.msra.gmra.mxu0 %v13380_v39  ;;  %7631 = vmatmul.mubr.bf16.vlgmr.msra.gmra.mxu1 %v13380_v39 }
 0x83b   : > { %7650 = vmatpush1.bf16.msra.mxu0 %v10336_v54  ;;  %7701 = vmatpush1.bf16.msra.mxu1 %v10339_v49 }
 0x83c   : > { %7651 = vmatprep.subr.bf16.mxu0 %v10342_v55  ;;  %7702 = vmatprep.subr.bf16.mxu1 %v10411_v5 }
 0x83d   : > { %9140 = vmatprep.mubr.msk.bf16.mxu0 %vm6886_vm8, %v13386_v56  ;;  %9142 = vmatprep.mubr.msk.bf16.mxu1 %vm6886_vm8, %v13386_v56 }
 0x83f   : > { %7652 = vmatpush1.bf16.msra.mxu0 %v10340_v7  ;;  %7703 = vmatpush1.bf16.msra.mxu1 %v10343_v52  ;;  %v7750_v52 = vlaneseq }
 0x840   : > { %7653 = vmatprep.subr.bf16.mxu0 %v10348_v48  ;;  %7704 = vmatprep.subr.bf16.mxu1 %v10411_v5 }
 0x841   : > { %v13483_v48 = vshrl.u32 %v7750_v52, 7  ;;  %v7834_v52 = vld [vmem:[%s10996_s26 + $0x38] sm:$0xff] }
 0x842   : > { %7590 = vmatmul.mubr.bf16.gmra.mxu0 %v13398_v51  ;;  %7641 = vmatmul.mubr.bf16.gmra.mxu1 %v13398_v51 }
 0x843   : > { %7654 = vmatpush1.bf16.msra.mxu0 %v10346_v59  ;;  %7705 = vmatpush1.bf16.msra.mxu1 %v10349_v24  ;;  %v7760_v59 = vsub.s32 2, %v13483_v48  ;;  %v13492_v24 = vld [vmem:[%s13676_s29] sm:$0xff] }
 0x844   : > { %7655 = vmatprep.subr.bf16.mxu0 %v10352_v60  ;;  %7706 = vmatprep.subr.bf16.mxu1 %v10411_v5  ;;  %v7756_v60 = vsub.s32 1, %v13483_v48 }
 0x845   : > { %9143 = vmatprep.mubr.msk.bf16.mxu0 %vm6886_vm8, %v13338_v58  ;;  %9145 = vmatprep.mubr.msk.bf16.mxu1 %vm6886_vm8, %v13338_v58  ;;  %v10370_v58 = vld [vmem:[%s10998_s21 + $0x278] ss:$28 sps:$4 sm:$0xff]  }
 0x847   : > { %7656 = vmatpush1.bf16.msra.mxu0 %v10350_v41  ;;  %7707 = vmatpush1.bf16.msra.mxu1 %v10353_v9  ;;  %v7764_v41 = vsub.s32 3, %v13483_v48 }
 0x848   : > { %7657 = vmatprep.subr.bf16.mxu0 %v10356_v11  ;;  %7708 = vmatprep.subr.bf16.mxu1 %v10411_v5  ;;  %v13500_v11 = vrot.slane %v13492_v24, %v7760_v59 }
 0x84b   : > { %7658 = vmatpush1.bf16.msra.mxu0 %v10354_v12  ;;  %7709 = vmatpush1.bf16.msra.mxu1 %v10357_v34 }
 0x84c   : > { %7659 = vmatprep.subr.bf16.mxu0 %v10360_v27  ;;  %7710 = vmatprep.subr.bf16.mxu1 %v10411_v5 }
 0x84f   : > { %7660 = vmatpush1.bf16.msra.mxu0 %v10358_v61  ;;  %7711 = vmatpush1.bf16.msra.mxu1 %v10361_v28  ;;  %v13503_v28 = vrot.slane %v13492_v24, %v7756_v60 }
 0x850   : > { %7661 = vmatprep.subr.bf16.mxu0 %v10364_v62  ;;  %7712 = vmatprep.subr.bf16.mxu1 %v10411_v5  ;;  %v13506_v62 = vrot.slane %v13492_v24, %v7764_v41 }
 0x853   : > { %7662 = vmatpush1.bf16.msra.mxu0 %v10362_v14  ;;  %7713 = vmatpush1.bf16.msra.mxu1 %v10365_v15 }
 0x854   : > { %7663 = vmatprep.subr.bf16.mxu0 %v10368_v18  ;;  %7714 = vmatprep.subr.bf16.mxu1 %v10411_v5 }
 0x857   : > { %7664 = vmatpush1.bf16.msra.mxu0 %v10366_v13  ;;  %7715 = vmatpush1.bf16.msra.mxu1 %v10369_v46 }
 0x858   : > { %7673 = vmatprep.subr.bf16.mxu0 %v10372_v0  ;;  %7724 = vmatprep.subr.bf16.mxu1 %v10411_v5 }
 0x85b   : > { %7674 = vmatpush2.bf16.msra.mxu0 %v10370_v58  ;;  %7725 = vmatpush2.bf16.msra.mxu1 %v10373_v17  ;;  %v7827_v58 = vld [vmem:[%s10996_s26] sm:$0xff]  ;;  %v7829_v17 = vld [vmem:[%s10996_s26 + $0x10] sm:$0xff] }
 0x85c   : > { %7675 = vmatprep.subr.bf16.mxu0 %v10376_v16  ;;  %7726 = vmatprep.subr.bf16.mxu1 %v10411_v5 }
 0x85f   : > { %7676 = vmatpush2.bf16.msra.mxu0 %v10374_v32  ;;  %7727 = vmatpush2.bf16.msra.mxu1 %v10377_v30 }
 0x860   : > { %7677 = vmatprep.subr.bf16.mxu0 %v10380_v4  ;;  %7728 = vmatprep.subr.bf16.mxu1 %v10411_v5 }
 0x863   : > { %7678 = vmatpush2.bf16.msra.mxu0 %v10378_v43  ;;  %7729 = vmatpush2.bf16.msra.mxu1 %v10381_v21 }
 0x864   : > { %7679 = vmatprep.subr.bf16.mxu0 %v10384_v3  ;;  %7730 = vmatprep.subr.bf16.mxu1 %v10411_v5  ;;  %v7828_v3 = vld [vmem:[%s10996_s26 + $0x8] sm:$0xff] }
 0x867   : > { %7680 = vmatpush2.bf16.msra.mxu0 %v10382_v50  ;;  %7731 = vmatpush2.bf16.msra.mxu1 %v10385_v63  ;;  %v7830_v50 = vld [vmem:[%s10996_s26 + $0x18] sm:$0xff] }
 0x86a   : > { %7682 = vmatmul.mubr.bf16.vlgmr.msra.gmra.mxu0 %v13380_v39  ;;  %7733 = vmatmul.mubr.bf16.vlgmr.msra.gmra.mxu1 %v13380_v39 }
 0x86b   : > { %9144 = vmatprep.mubr.msk.bf16.mxu0 %vm6886_vm8, %v13386_v56  ;;  %9146 = vmatprep.mubr.msk.bf16.mxu1 %vm6886_vm8, %v13386_v56 }
 0x872   : > { %7692 = vmatmul.mubr.bf16.gmra.mxu0 %v13398_v51  ;;  %7741 = vmatmul.mubr.bf16.gmra.mxu1 %v13398_v51  ;;  %v7752_v51 = vsub.s32 0, %v13483_v48 }
 0x874   : > { %v13497_v9 = vrot.slane %v13492_v24, %v7752_v51  ;;  %v7836_v51 = vld [vmem:[%s10996_s26 + $0x48] sm:$0xff] }
 0x89a   : > { %v6927_v19 = vpop.f32.mrf.mxu0  ;;  %v6978_v20 = vpop.f32.mrf.mxu1 }
 0x89c   : > { %v6929_v22 = vpop.f32.mrf.mxu0  ;;  %v6980_v5 = vpop.f32.mrf.mxu1 }
 0x89e   : > { %v6931_v23 = vpop.f32.mrf.mxu0  ;;  %v6982_v6 = vpop.f32.mrf.mxu1 }
 0x8a0   : > { %v13453_v25 = vpop.f32.mrf.mxu0  ;;  %v13455_v26 = vpop.f32.mrf.mxu1 }
 0x8a2   : > { %v13457_v10 = vpop.f32.mrf.mxu0  ;;  %v13459_v57 = vpop.f32.mrf.mxu1 }
 0x8a4   : > { %v13461_v8 = vpop.f32.mrf.mxu0  ;;  %v13463_v45 = vpop.f32.mrf.mxu1 }
 0x8a6   : > { %v6941_v31 = vpop.f32.mrf.mxu0  ;;  %v6992_v2 = vpop.f32.mrf.mxu1 }
 0x8a8   : > { %v6942_v53 = vpop.f32.mrf.mxu0  ;;  %v6993_v33 = vpop.f32.mrf.mxu1 }
 0x8ca   : > { %v13465_v29 = vpop.f32.mrf.mxu0  ;;  %v13467_v35 = vpop.f32.mrf.mxu1 }
 0x8cc   : > { %v13469_v36 = vpop.f32.mrf.mxu0  ;;  %v7082_v37 = vpop.f32.mrf.mxu1 }
 0x8ce   : > { %v13471_v42 = vpop.f32.mrf.mxu0  ;;  %v13473_v38 = vpop.f32.mrf.mxu1 }
 0x8d0   : > { %v13475_v40 = vpop.f32.mrf.mxu0  ;;  %v7085_v44 = vpop.f32.mrf.mxu1 }
 0x8d2   : > { %v13477_v1 = vpop.f32.mrf.mxu0  ;;  %v13479_v39 = vpop.f32.mrf.mxu1 }
 0x8d4   : > { %v13481_v47 = vpop.f32.mrf.mxu0  ;;  %v7090_v54 = vpop.f32.mrf.mxu1 }
 0x8d6   : > { %v7043_v49 = vpop.f32.mrf.mxu0  ;;  %v7091_v55 = vpop.f32.mrf.mxu1 }
 0x8d8   : > { %v7044_v56 = vpop.f32.mrf.mxu0  ;;  %v7092_v7 = vpop.f32.mrf.mxu1 }
 0x8fa   : > { %v7581_v12 = vpop.f32.mrf.mxu0  ;;  %v7632_v34 = vpop.f32.mrf.mxu1 }
 0x8fb   : > { %v7582_v27 = vadd.f32 %v7581_v12, %v6927_v19  ;;  %v7633_v61 = vadd.f32 %v7632_v34, %v6978_v20 }
 0x8fc   : > { %v7583_v14 = vpop.f32.mrf.mxu0  ;;  %v7634_v15 = vpop.f32.mrf.mxu1 }
 0x8fd   : > { %v7785_v18 = vadd.f32 %v13497_v9, %v7582_v27  ;;  %v7787_v13 = vadd.f32 %v13500_v11, %v7633_v61  ;;  %v7584_v46 = vadd.f32 %v7583_v14, %v6929_v22  ;;  %v7635_v0 = vadd.f32 %v7634_v15, %v6980_v5  ;;  %v7835_v61 = vld [vmem:[%s10996_s26 + $0x40] sm:$0xff]  ;;  %v7837_v14 = vld [vmem:[%s10996_s26 + $0x50] sm:$0xff] }
 0x8fe   : > { %v7585_v16 = vpop.f32.mrf.mxu0  ;;  %v7636_v32 = vpop.f32.mrf.mxu1 }
 0x8ff   : > { %v7806_v30 = vmul.f32 0.2, %v7785_v18  ;;  %v7808_v4 = vmul.f32 0.2, %v7787_v13  ;;  %v7786_v43 = vadd.f32 %v13503_v28, %v7584_v46  ;;  %v7788_v21 = vadd.f32 %v13506_v62, %v7635_v0 }
 0x900   : > { %v7586_v63 = vadd.f32 %v7585_v16, %v6931_v23  ;;  %v7637_v19 = vadd.f32 %v7636_v32, %v6982_v6  ;;  %v7587_v20 = vpop.f32.mrf.mxu0  ;;  %v7638_v31 = vpop.f32.mrf.mxu1 }
 0x901   : > { %v7848_v22 = vadd.f32 %v7827_v58, %v7806_v30  ;;  %v7850_v5 = vadd.f32 %v7829_v17, %v7808_v4  ;;  %v7807_v2 = vmul.f32 0.2, %v7786_v43  ;;  %v7809_v53 = vmul.f32 0.2, %v7788_v21 }
 0x902   : > { %v7792_v33 = vadd.f32 %v13497_v9, %v7586_v63  ;;  %v7794_v37 = vadd.f32 %v13500_v11, %v7637_v19  ;;  %v7588_v44 = vadd.f32 %v7587_v20, %v13453_v25  ;;  %v7639_v54 = vadd.f32 %v7638_v31, %v13455_v26  ;;  %v7591_v23 = vpop.f32.mrf.mxu0  ;;  %v7642_v6 = vpop.f32.mrf.mxu1  ;;  %v7843_v63 = vld [vmem:[%s10996_s26 + $0x80] sm:$0x3] }
 0x903   : > { %v7869_v49 = vmax.f32 %v7848_v22, 0.0  ;;  %v7871_v55 = vmax.f32 %v7850_v5, 0.0  ;;  %v7849_v56 = vadd.f32 %v7828_v3, %v7807_v2  ;;  %v7851_v7 = vadd.f32 %v7830_v50, %v7809_v53  ;;  %v7841_v50 = vld [vmem:[%s10996_s26 + $0x70] sm:$0x3]  ;;  %v7842_v5 = vld [vmem:[%s10996_s26 + $0x78] sm:$0x3] }
 0x904   : > { %v7813_v59 = vmul.f32 0.2, %v7792_v33  ;;  %v7815_v60 = vmul.f32 0.2, %v7794_v37  ;;  %v7793_v41 = vadd.f32 %v13503_v28, %v7588_v44  ;;  %v7795_v25 = vadd.f32 %v13506_v62, %v7639_v54  ;;  %v7593_v12 = vpop.f32.mrf.mxu0  ;;  %v7644_v26 = vpop.f32.mrf.mxu1  ;;  %v7844_v2 = vld [vmem:[%s10996_s26 + $0x88] sm:$0x3] }
 0x905   : > { %7890 = vst [vmem:[%s11002_s1] sm:$0xff] %v7869_v49  ;;  %7892 = vst [vmem:[%s11002_s1 + $0x10] sm:$0xff] %v7871_v55  ;;  %v7870_v34 = vmax.f32 %v7849_v56, 0.0  ;;  %v7872_v27 = vmax.f32 %v7851_v7, 0.0  ;;  %v7592_v15 = vadd.f32 %v7591_v23, %v13457_v10  ;;  %v7643_v18 = vadd.f32 %v7642_v6, %v13459_v57 }
 0x906   : > { %v7855_v13 = vadd.f32 %v7834_v52, %v7813_v59  ;;  %v7857_v46 = vadd.f32 %v7836_v51, %v7815_v60  ;;  %v7814_v0 = vmul.f32 0.2, %v7793_v41  ;;  %v7816_v58 = vmul.f32 0.2, %v7795_v25  ;;  %v7595_v17 = vpop.f32.mrf.mxu0  ;;  %v7646_v16 = vpop.f32.mrf.mxu1 }
 0x907   : > { %7891 = vst [vmem:[%s11002_s1 + $0x8] sm:$0xff] %v7870_v34  ;;  %7893 = vst [vmem:[%s11002_s1 + $0x18] sm:$0xff] %v7872_v27  ;;  %v7799_v32 = vadd.f32 %v13497_v9, %v7592_v15  ;;  %v7801_v30 = vadd.f32 %v13500_v11, %v7643_v18  ;;  %v7594_v10 = vadd.f32 %v7593_v12, %v13461_v8  ;;  %v7768_v55 = vsub.s32 4, %v13483_v48  ;;  %v7833_v15 = vld [vmem:[%s10996_s26 + $0x30] sm:$0xff]  ;;  %v7832_v17 = vld [vmem:[%s10996_s26 + $0x28] sm:$0xff] }
 0x908   : > { %v7645_v57 = vadd.f32 %v7644_v26, %v13463_v45  ;;  %v7876_v4 = vmax.f32 %v7855_v13, 0.0  ;;  %v7878_v43 = vmax.f32 %v7857_v46, 0.0  ;;  %v7856_v21 = vadd.f32 %v7835_v61, %v7814_v0  ;;  %v7596_v19 = vpop.f32.mrf.mxu0  ;;  %v7647_v20 = vpop.f32.mrf.mxu1 }
 0x909   : > { %v7858_v3 = vadd.f32 %v7837_v14, %v7816_v58  ;;  %v7820_v9 = vmul.f32 0.2, %v7799_v32  ;;  %v7822_v31 = vmul.f32 0.2, %v7801_v30  ;;  %v7800_v11 = vadd.f32 %v13503_v28, %v7594_v10  ;;  %v7840_v19 = vld [vmem:[%s10996_s26 + $0x68] sm:$0xff] }
 0x90a   : > { %v7802_v8 = vadd.f32 %v13506_v62, %v7645_v57  ;;  %7897 = vst [vmem:[%s11002_s1 + $0x38] sm:$0xff] %v7876_v4  ;;  %7899 = vst [vmem:[%s11002_s1 + $0x48] sm:$0xff] %v7878_v43  ;;  %v7877_v45 = vmax.f32 %v7856_v21, 0.0  ;;  %v7776_v56 = vsub.s32 6, %v13483_v48  ;;  %v7772_v7 = vsub.s32 5, %v13483_v48  ;;  %v7831_v48 = vld [vmem:[%s10996_s26 + $0x20] sm:$0xff] }
 0x90b   : > { %v7879_v22 = vmax.f32 %v7858_v3, 0.0  ;;  %v7862_v53 = vadd.f32 %v7841_v50, %v7820_v9  ;;  %v7864_v33 = vadd.f32 %v7843_v63, %v7822_v31  ;;  %v7821_v37 = vmul.f32 0.2, %v7800_v11  ;;  %v7838_v57 = vld [vmem:[%s10996_s26 + $0x58] sm:$0xff] }
 0x90c   : > { %v7823_v44 = vmul.f32 0.2, %v7802_v8  ;;  %7898 = vst [vmem:[%s11002_s1 + $0x40] sm:$0xff] %v7877_v45  ;;  %v7769_v52 = vrot.slane %v13492_v24, %v7768_v55  ;;  %v7777_v51 = vrot.slane %v13492_v24, %v7776_v56  ;;  %v7773_v12 = vrot.slane %v13492_v24, %v7772_v7 }
 0x90d   : > { %7900 = vst [vmem:[%s11002_s1 + $0x50] sm:$0xff] %v7879_v22  ;;  %v7883_v54 = vmax.f32 %v7862_v53, 0.0  ;;  %v7885_v28 = vmax.f32 %v7864_v33, 0.0  ;;  %v7863_v23 = vadd.f32 %v7842_v5, %v7821_v37  ;;  %v7839_v5 = vld [vmem:[%s10996_s26 + $0x60] sm:$0xff] }
 0x90e   : > { %v7865_v62 = vadd.f32 %v7844_v2, %v7823_v44  ;;  %v7845_v44 = vld [vmem:[%s10996_s26 + $0x90] sm:$0x3] }
 0x90f   : > { %7904 = vst [vmem:[%s11002_s1 + $0x70] sm:$0x3] %v7883_v54  ;;  %7906 = vst [vmem:[%s11002_s1 + $0x80] sm:$0x3] %v7885_v28  ;;  %v7884_v6 = vmax.f32 %v7863_v23, 0.0 }
 0x910   : > { %v7886_v49 = vmax.f32 %v7865_v62, 0.0  ;;  %v7847_v23 = vld [vmem:[%s10996_s26 + $0xa0] sm:$0x3] }
 0x911   : > { %7905 = vst [vmem:[%s11002_s1 + $0x78] sm:$0x3] %v7884_v6  ;;  %v7846_v6 = vld [vmem:[%s10996_s26 + $0x98] sm:$0x3] }
 0x912   : > { %7907 = vst [vmem:[%s11002_s1 + $0x88] sm:$0x3] %v7886_v49 }
 0x92a   : > { %v7683_v59 = vpop.f32.mrf.mxu0  ;;  %v7734_v60 = vpop.f32.mrf.mxu1 }
 0x92b   : > { %v7684_v41 = vadd.f32 %v7683_v59, %v13465_v29  ;;  %v7735_v25 = vadd.f32 %v7734_v60, %v13467_v35 }
 0x92c   : > { %v7685_v26 = vpop.f32.mrf.mxu0  ;;  %v7736_v34 = vpop.f32.mrf.mxu1 }
 0x92d   : > { %v7789_v27 = vadd.f32 %v7769_v52, %v7684_v41  ;;  %v7791_v61 = vadd.f32 %v7777_v51, %v7735_v25  ;;  %v7686_v14 = vadd.f32 %v7685_v26, %v13469_v36 }
 0x92e   : > { %v7687_v18 = vpop.f32.mrf.mxu0  ;;  %v7737_v13 = vpop.f32.mrf.mxu1 }
 0x92f   : > { %v7810_v46 = vmul.f32 0.2, %v7789_v27  ;;  %v7812_v0 = vmul.f32 0.2, %v7791_v61  ;;  %v7790_v58 = vadd.f32 %v7773_v12, %v7686_v14  ;;  %v7688_v29 = vadd.f32 %v7687_v18, %v13471_v42  ;;  %v7933_v27 = vld [vmem:[%s11002_s1] sm:$0xff] (%p10522_p5)  ;;  %v7935_v61 = vld [vmem:[%s11002_s1 + $0x8] sm:$0xff] (%p10522_p5) }
 0x930   : > { %v7738_v35 = vadd.f32 %v7737_v13, %v13473_v38  ;;  %v7689_v24 = vpop.f32.mrf.mxu0  ;;  %v7739_v16 = vpop.f32.mrf.mxu1  ;;  %v7937_v14 = vld [vmem:[%s11002_s1 + $0x10] sm:$0xff] (%p10522_p5)  ;;  %7934 = vst [vmem:[%s13595_s27] sm:$0xff] (%p10522_p5), %v7933_v27  ;;  %7936 = vst [vmem:[%s13595_s27 + $0x8] sm:$0xff] (%p10522_p5), %v7935_v61 }
 0x931   : > { %v7852_v32 = vadd.f32 %v7831_v48, %v7810_v46  ;;  %v7854_v30 = vadd.f32 %v7833_v15, %v7812_v0  ;;  %v7811_v10 = vmul.f32 0.2, %v7790_v58  ;;  %v7796_v36 = vadd.f32 %v7769_v52, %v7688_v29  ;;  %v7939_v48 = vld [vmem:[%s11002_s1 + $0x18] sm:$0xff] (%p10522_p5)  ;;  %v7949_v0 = vld [vmem:[%s11002_s1 + $0x40] sm:$0xff] (%p10522_p5)  ;;  %7938 = vst [vmem:[%s13595_s27 + $0x10] sm:$0xff] (%p10522_p5), %v7937_v14  ;;  %v7951_v58 = vld [vmem:[%s11002_s1 + $0x48] sm:$0xff] (%p10522_p5) }
 0x932   : > { %v7798_v4 = vadd.f32 %v7777_v51, %v7738_v35  ;;  %v7690_v43 = vadd.f32 %v7689_v24, %v13475_v40  ;;  %v7693_v21 = vpop.f32.mrf.mxu0  ;;  %v7742_v3 = vpop.f32.mrf.mxu1  ;;  %v7947_v46 = vld [vmem:[%s11002_s1 + $0x38] sm:$0xff] (%p10522_p5)  ;;  %7940 = vst [vmem:[%s13595_s27 + $0x18] sm:$0xff] (%p10522_p5), %v7939_v48  ;;  %7950 = vst [vmem:[%s13595_s27 + $0x78] sm:$0xff] (%p10522_p5), %v7949_v0  ;;  %v7953_v29 = vld [vmem:[%s11002_s1 + $0x50] sm:$0xff] (%p10522_p5) }
 0x933   : > { %v7873_v42 = vmax.f32 %v7852_v32, 0.0  ;;  %v7875_v50 = vmax.f32 %v7854_v30, 0.0  ;;  %v7853_v63 = vadd.f32 %v7832_v17, %v7811_v10  ;;  %v7817_v38 = vmul.f32 0.2, %v7796_v36  ;;  %7948 = vst [vmem:[%s13595_s27 + $0x70] sm:$0xff] (%p10522_p5), %v7947_v46  ;;  %7952 = vst [vmem:[%s13595_s27 + $0x80] sm:$0xff] (%p10522_p5), %v7951_v58 }
 0x934   : > { %v7819_v20 = vmul.f32 0.2, %v7798_v4  ;;  %v7797_v9 = vadd.f32 %v7773_v12, %v7690_v43  ;;  %v7694_v31 = vadd.f32 %v7693_v21, %v13477_v1  ;;  %v7743_v11 = vadd.f32 %v7742_v3, %v13479_v39  ;;  %v7695_v8 = vpop.f32.mrf.mxu0  ;;  %v7744_v45 = vpop.f32.mrf.mxu1  ;;  %7954 = vst [vmem:[%s13595_s27 + $0x88] sm:$0xff] (%p10522_p5), %v7953_v29  ;;  %v7961_v16 = vld [vmem:[%s11002_s1 + $0x70] sm:$0xff] (%p10522_p5)  ;;  %v7963_v32 = vld [vmem:[%s11002_s1 + $0x78] sm:$0xff] (%p10522_p5)  ;;  %v7965_v30 = vld [vmem:[%s11002_s1 + $0x80] sm:$0xff] (%p10522_p5) }
 0x935   : > { %7894 = vst [vmem:[%s11002_s1 + $0x20] sm:$0xff] %v7873_v42  ;;  %7896 = vst [vmem:[%s11002_s1 + $0x30] sm:$0xff] %v7875_v50  ;;  %v7874_v40 = vmax.f32 %v7853_v63, 0.0  ;;  %v7859_v22 = vadd.f32 %v7838_v57, %v7817_v38  ;;  %v7696_v2 = vadd.f32 %v7695_v8, %v13481_v47  ;;  %v7967_v10 = vld [vmem:[%s11002_s1 + $0x88] sm:$0xff] (%p10522_p5) }
 0x936   : > { %v7861_v53 = vadd.f32 %v7840_v19, %v7819_v20  ;;  %v7818_v33 = vmul.f32 0.2, %v7797_v9  ;;  %v7803_v37 = vadd.f32 %v7769_v52, %v7694_v31  ;;  %v7805_v1 = vadd.f32 %v7777_v51, %v7743_v11  ;;  %v7697_v39 = vpop.f32.mrf.mxu0  ;;  %v7745_v54 = vpop.f32.mrf.mxu1  ;;  %7962 = vst [vmem:[%s13595_s27 + $0xe0] sm:$0xff] (%p10522_p5), %v7961_v16  ;;  %7964 = vst [vmem:[%s13595_s27 + $0xe8] sm:$0xff] (%p10522_p5), %v7963_v32 }
 0x937   : > { %7895 = vst [vmem:[%s11002_s1 + $0x28] sm:$0xff] %v7874_v40  ;;  %v7880_v28 = vmax.f32 %v7859_v22, 0.0  ;;  %v7804_v62 = vadd.f32 %v7773_v12, %v7696_v2  ;;  %7966 = vst [vmem:[%s13595_s27 + $0xf0] sm:$0xff] (%p10522_p5), %v7965_v30 }
 0x938   : > { %v7882_v49 = vmax.f32 %v7861_v53, 0.0  ;;  %v7860_v55 = vadd.f32 %v7839_v5, %v7818_v33  ;;  %v7824_v56 = vmul.f32 0.2, %v7803_v37  ;;  %v7826_v47 = vmul.f32 0.2, %v7805_v1  ;;  %v7698_v7 = vpop.f32.mrf.mxu0  ;;  %v7746_v52 = vpop.f32.mrf.mxu1  ;;  %7968 = vst [vmem:[%s13595_s27 + $0xf8] sm:$0xff] (%p10522_p5), %v7967_v10 }
 0x939   : > { %7901 = vst [vmem:[%s11002_s1 + $0x58] sm:$0xff] %v7880_v28  ;;  %v7825_v51 = vmul.f32 0.2, %v7804_v62 }
 0x93a   : > { %7903 = vst [vmem:[%s11002_s1 + $0x68] sm:$0xff] %v7882_v49  ;;  %v7881_v59 = vmax.f32 %v7860_v55, 0.0  ;;  %v7866_v60 = vadd.f32 %v7845_v44, %v7824_v56  ;;  %v7868_v41 = vadd.f32 %v7847_v23, %v7826_v47 }
 0x93b   : > { %v7867_v25 = vadd.f32 %v7846_v6, %v7825_v51  ;;  %7917 = sbr.rel (!%p10522_p5) target bundleno = 2376 (0x948), region = 159 }
 0x93c   : > { %7902 = vst [vmem:[%s11002_s1 + $0x60] sm:$0xff] %v7881_v59  ;;  %v7887_v26 = vmax.f32 %v7866_v60, 0.0  ;;  %v7889_v12 = vmax.f32 %v7868_v41, 0.0  ;;  %v7941_v15 = vld [vmem:[%s11002_s1 + $0x20] sm:$0xff] (%p10522_p5)  ;;  %v7945_v13 = vld [vmem:[%s11002_s1 + $0x30] sm:$0xff] (%p10522_p5) }
 0x93d   : > { %v7888_v34 = vmax.f32 %v7867_v25, 0.0  ;;  %7942 = vst [vmem:[%s13595_s27 + $0x20] sm:$0xff] (%p10522_p5), %v7941_v15  ;;  %7946 = vst [vmem:[%s13595_s27 + $0x30] sm:$0xff] (%p10522_p5), %v7945_v13 }
 0x93e   : > { %7908 = vst [vmem:[%s11002_s1 + $0x90] sm:$0x3] %v7887_v26  ;;  %7910 = vst [vmem:[%s11002_s1 + $0xa0] sm:$0x3] %v7889_v12  ;;  %v7943_v18 = vld [vmem:[%s11002_s1 + $0x28] sm:$0xff] (%p10522_p5) }
 0x93f   : > { %7909 = vst [vmem:[%s11002_s1 + $0x98] sm:$0x3] %v7888_v34  ;;  %7944 = vst [vmem:[%s13595_s27 + $0x28] sm:$0xff] (%p10522_p5), %v7943_v18 }
 0x940   : > { %v7955_v17 = vld [vmem:[%s11002_s1 + $0x58] sm:$0xff] }
 0x941   : > { %7956 = vst [vmem:[%s13595_s27 + $0x90] sm:$0xff] %v7955_v17  ;;  %v7959_v24 = vld [vmem:[%s11002_s1 + $0x68] sm:$0xff] }
 0x942   : > { %7960 = vst [vmem:[%s13595_s27 + $0xa0] sm:$0xff] %v7959_v24 }
 0x943   : > { %v7957_v35 = vld [vmem:[%s11002_s1 + $0x60] sm:$0xff] }
 0x944   : > { %7958 = vst [vmem:[%s13595_s27 + $0x98] sm:$0xff] %v7957_v35 }
 0x945   : > { %v7969_v36 = vld [vmem:[%s11002_s1 + $0x90] sm:$0xff]  ;;  %v7973_v4 = vld [vmem:[%s11002_s1 + $0xa0] sm:$0xff] }
 0x946   : > { %v7971_v57 = vld [vmem:[%s11002_s1 + $0x98] sm:$0xff]  ;;  %7970 = vst [vmem:[%s13595_s27 + $0x100] sm:$0xff] %v7969_v36  ;;  %7974 = vst [vmem:[%s13595_s27 + $0x110] sm:$0xff] %v7973_v4 }
 0x947   : > { %7972 = vst [vmem:[%s13595_s27 + $0x108] sm:$0xff] %v7971_v57 }
 0x948 PF: > { %s13677_s15 = sld [smem:[#allocation9_spill]] }
 0x949   : > { %s13678_s29 = sld [smem:[#allocation8_spill]] }
 0x94a   : > { %s13679_s30 = sld [smem:[#allocation10_spill]] }
 0x94e   : > { %p21_p12 = scmp.ge.s32.totalorder %s13677_s15, 4  }
 0x950   :  { %23 = sbr.rel (!%p21_p12) target bundleno = 6 (0x6), region = 251 }

</bundles_post_ra>
